<compile_context>
chip_gen: v6e
topology: v6e:2x2x1
jax: 0.10.0
libtpu: 0.0.40
codegen_flags: <defaults>
</compile_context>

<pallas_src>
import jax
import jax.numpy as jnp
from jax.experimental import pallas as pl
from jax.experimental.pallas import tpu as pltpu


# ----------------------------------------------------------------------------
# Fused kernel: in-kernel padding -> conv3x3 (3->3) + x-half of conv3x3 (6->1)
#               in one tap sweep -> channel softmax -> softmax-half of the
#               6->1 conv -> alpha composition.
# One grid step = one batch element.  Weights/biases live in SMEM.
# ----------------------------------------------------------------------------
def _make_fused_kernel(H, W):
    f32 = jnp.float32

    def kernel(x_ref, wt_ref, bt_ref, wm_ref, bm_ref,
               trimap_ref, alpha_ref, pad_ref):
        # x_ref      : (1, 3, H, W)    VMEM input block (one batch element)
        # wt_ref     : (81,)           SMEM  t_net weights (3,3,3,3) OIHW flat
        # bt_ref     : (3,)            SMEM
        # wm_ref     : (54,)           SMEM  m_net weights (1,6,3,3) OIHW flat
        # bm_ref     : (1,)            SMEM
        # trimap_ref : (1, 3, H, W)    VMEM output (trimap logits)
        # alpha_ref  : (1, 1, H, W)    VMEM output (alpha_p)
        # pad_ref    : (6, H+2, W+2)   VMEM scratch: zero-padded [x ; softmax]

        # ---- in-kernel zero padding of the input (channels 0..2) -----------
        pad_ref[...] = jnp.zeros((6, H + 2, W + 2), f32)
        for c in range(3):
            pad_ref[c, 1:H + 1, 1:W + 1] = x_ref[0, c]

        # ---- Pass 1: one sweep over the 27 input taps.
        #      Each window is loaded ONCE and drives 4 independent
        #      accumulators: trimap logits (3) + x-half of m_net conv (1). ----
        t_acc = [jnp.full((H, W), bt_ref[co], f32) for co in range(3)]
        mx_acc = jnp.full((H, W), bm_ref[0], f32)
        for ci in range(3):
            for kh in range(3):
                for kw in range(3):
                    win = pad_ref[ci, kh:kh + H, kw:kw + W]
                    tap = ci * 9 + kh * 3 + kw
                    for co in range(3):
                        t_acc[co] = t_acc[co] + wt_ref[co * 27 + tap] * win
                    mx_acc = mx_acc + wm_ref[tap] * win

        # ---- trimap logits out + channel softmax (stays on-chip) -----------
        for co in range(3):
            trimap_ref[0, co] = t_acc[co]
        m = jnp.maximum(jnp.maximum(t_acc[0], t_acc[1]), t_acc[2])
        e = [jnp.exp(t - m) for t in t_acc]
        inv = 1.0 / (e[0] + e[1] + e[2])
        soft = [ei * inv for ei in e]            # [bg, fg, unsure]

        # ---- padded softmax into channels 3..5 (replaces torch.cat + pad) ---
        for c in range(3):
            pad_ref[3 + c, 1:H + 1, 1:W + 1] = soft[c]

        # ---- Pass 2: softmax half of the 6->1 conv.
        #      Two interleaved accumulators break the serial MAC chain. ------
        ms0 = jnp.zeros((H, W), f32)
        ms1 = jnp.zeros((H, W), f32)
        t = 0
        for ci in range(3):
            for kh in range(3):
                for kw in range(3):
                    win = pad_ref[3 + ci, kh:kh + H, kw:kw + W]
                    wv = wm_ref[(3 + ci) * 9 + kh * 3 + kw]
                    if t % 2 == 0:
                        ms0 = ms0 + wv * win
                    else:
                        ms1 = ms1 + wv * win
                    t += 1
        alpha_r = mx_acc + ms0 + ms1

        # ---- alpha_p = fg + unsure * alpha_r --------------------------------
        alpha_ref[0, 0] = soft[1] + soft[2] * alpha_r

    return kernel


def net_forward(x, params):
    """x: (N, 3, H, W) float32 -> (trimap (N,3,H,W), alpha_p (N,1,H,W))."""
    N, C, H, W = x.shape
    assert C == 3
    wt = params["w_t"].reshape(-1).astype(jnp.float32)
    bt = params["b_t"].astype(jnp.float32)
    wm = params["w_m"].reshape(-1).astype(jnp.float32)
    bm = params["b_m"].astype(jnp.float32)

    smem = pl.BlockSpec(memory_space=pltpu.MemorySpace.SMEM)
    return pl.pallas_call(
        _make_fused_kernel(H, W),
        out_shape=(jax.ShapeDtypeStruct((N, 3, H, W), jnp.float32),
                   jax.ShapeDtypeStruct((N, 1, H, W), jnp.float32)),
        grid=(N,),
        in_specs=[
            pl.BlockSpec((1, 3, H, W), lambda n: (n, 0, 0, 0)),
            smem, smem, smem, smem,
        ],
        out_specs=(pl.BlockSpec((1, 3, H, W), lambda n: (n, 0, 0, 0)),
                   pl.BlockSpec((1, 1, H, W), lambda n: (n, 0, 0, 0))),
        scratch_shapes=[pltpu.VMEM((6, H + 2, W + 2), jnp.float32)],
        compiler_params=pltpu.CompilerParams(
            dimension_semantics=("parallel",)),
    )(x, wt, bt, wm, bm)


# ----------------------------------------------------------------------------
# Pure-JAX reference (for a correctness check)
# ----------------------------------------------------------------------------
def _conv_ref(x, w, b):
    y = jax.lax.conv_general_dilated(
        x, w, window_strides=(1, 1), padding=((1, 1), (1, 1)),
        dimension_numbers=("NCHW", "OIHW", "NCHW"))
    return y + b[None, :, None, None]


def net_forward_ref(x, params):
    trimap = _conv_ref(x, params["w_t"], params["b_t"])
    ts = jax.nn.softmax(trimap, axis=1)
    m_in = jnp.concatenate([x, ts], axis=1)
    alpha_r = _conv_ref(m_in, params["w_m"], params["b_m"])
    fg = ts[:, 1:2]
    unsure = ts[:, 2:3]
    return trimap, fg + unsure * alpha_r


if __name__ == "__main__":
    key = jax.random.PRNGKey(0)
    k_x, k_wt, k_bt, k_wm, k_bm = jax.random.split(key, 5)

    N, C, H, W = 2, 3, 16, 16
    x = jax.random.normal(k_x, (N, C, H, W), dtype=jnp.float32)

    params = {
        "w_t": 0.2 * jax.random.normal(k_wt, (3, 3, 3, 3), dtype=jnp.float32),
        "b_t": 0.1 * jax.random.normal(k_bt, (3,), dtype=jnp.float32),
        "w_m": 0.2 * jax.random.normal(k_wm, (1, 6, 3, 3), dtype=jnp.float32),
        "b_m": 0.1 * jax.random.normal(k_bm, (1,), dtype=jnp.float32),
    }

    trimap, alpha_p = jax.block_until_ready(net_forward(x, params))
    trimap_ref, alpha_p_ref = net_forward_ref(x, params)

    assert trimap.shape == (N, 3, H, W) and alpha_p.shape == (N, 1, H, W)
    assert jnp.allclose(trimap, trimap_ref, atol=1e-4, rtol=1e-4)
    assert jnp.allclose(alpha_p, alpha_p_ref, atol=1e-4, rtol=1e-4)

    print("KERNEL_OK")
</pallas_src>

<mosaic_0001>
module attributes {stable_mosaic.version = 11 : i64} {
  func.func @kernel(%arg0: i32, %arg1: memref<1x3x16x16xf32, #tpu.memory_space<vmem>>, %arg2: memref<81xf32, #tpu.memory_space<smem>>, %arg3: memref<3xf32, #tpu.memory_space<smem>>, %arg4: memref<54xf32, #tpu.memory_space<smem>>, %arg5: memref<1xf32, #tpu.memory_space<smem>>, %arg6: memref<1x3x16x16xf32, #tpu.memory_space<vmem>>, %arg7: memref<1x1x16x16xf32, #tpu.memory_space<vmem>>, %arg8: memref<6x18x18xf32, #tpu.memory_space<vmem>>) attributes {dimension_semantics = [#tpu.dimension_semantics<parallel>], iteration_bounds = array<i64: 2>, scalar_prefetch = 0 : i64, scratch_operands = 1 : i64, tpu.core_type = #tpu.core_type<tc>, window_params = [{transform_indices = @transform_0, window_bounds = array<i64: 1, 3, 16, 16>}, {transform_indices = @transform_1, window_bounds = array<i64: 81>}, {transform_indices = @transform_2, window_bounds = array<i64: 3>}, {transform_indices = @transform_3, window_bounds = array<i64: 54>}, {transform_indices = @transform_4, window_bounds = array<i64: 1>}, {transform_indices = @transform_5, window_bounds = array<i64: 1, 3, 16, 16>}, {transform_indices = @transform_6, window_bounds = array<i64: 1, 1, 16, 16>}]} {
    %cst = arith.constant 0.000000e+00 : f32
    %0 = vector.broadcast %cst : f32 to vector<6x18x18xf32>
    %c0 = arith.constant 0 : index
    %c0_0 = arith.constant 0 : index
    %c0_1 = arith.constant 0 : index
    %1 = vector.load %arg8[%c0, %c0_0, %c0_1] : memref<6x18x18xf32, #tpu.memory_space<vmem>>, vector<6x18x18xf32>
    tpu.vector_store %arg8[%c0, %c0_0, %c0_1], %0 {strides = array<i32>} : memref<6x18x18xf32, #tpu.memory_space<vmem>>, vector<6x18x18xf32>,
    %c0_2 = arith.constant 0 : index
    %c0_3 = arith.constant 0 : index
    %c0_4 = arith.constant 0 : index
    %c0_5 = arith.constant 0 : index
    %2 = vector.load %arg1[%c0_2, %c0_3, %c0_4, %c0_5] : memref<1x3x16x16xf32, #tpu.memory_space<vmem>>, vector<1x1x16x16xf32>
    %3 = vector.shape_cast %2 : vector<1x1x16x16xf32> to vector<16x16xf32>
    %c0_6 = arith.constant 0 : index
    %c1 = arith.constant 1 : index
    %c1_7 = arith.constant 1 : index
    %4 = vector.load %arg8[%c0_6, %c1, %c1_7] : memref<6x18x18xf32, #tpu.memory_space<vmem>>, vector<1x16x16xf32>
    %5 = vector.shape_cast %4 : vector<1x16x16xf32> to vector<16x16xf32>
    %6 = vector.shape_cast %3 : vector<16x16xf32> to vector<1x16x16xf32>
    tpu.vector_store %arg8[%c0_6, %c1, %c1_7], %6 {strides = array<i32>} : memref<6x18x18xf32, #tpu.memory_space<vmem>>, vector<1x16x16xf32>,
    %c0_8 = arith.constant 0 : index
    %c1_9 = arith.constant 1 : index
    %c0_10 = arith.constant 0 : index
    %c0_11 = arith.constant 0 : index
    %7 = vector.load %arg1[%c0_8, %c1_9, %c0_10, %c0_11] : memref<1x3x16x16xf32, #tpu.memory_space<vmem>>, vector<1x1x16x16xf32>
    %8 = vector.shape_cast %7 : vector<1x1x16x16xf32> to vector<16x16xf32>
    %c1_12 = arith.constant 1 : index
    %c1_13 = arith.constant 1 : index
    %c1_14 = arith.constant 1 : index
    %9 = vector.load %arg8[%c1_12, %c1_13, %c1_14] : memref<6x18x18xf32, #tpu.memory_space<vmem>>, vector<1x16x16xf32>
    %10 = vector.shape_cast %9 : vector<1x16x16xf32> to vector<16x16xf32>
    %11 = vector.shape_cast %8 : vector<16x16xf32> to vector<1x16x16xf32>
    tpu.vector_store %arg8[%c1_12, %c1_13, %c1_14], %11 {strides = array<i32>} : memref<6x18x18xf32, #tpu.memory_space<vmem>>, vector<1x16x16xf32>,
    %c0_15 = arith.constant 0 : index
    %c2 = arith.constant 2 : index
    %c0_16 = arith.constant 0 : index
    %c0_17 = arith.constant 0 : index
    %12 = vector.load %arg1[%c0_15, %c2, %c0_16, %c0_17] : memref<1x3x16x16xf32, #tpu.memory_space<vmem>>, vector<1x1x16x16xf32>
    %13 = vector.shape_cast %12 : vector<1x1x16x16xf32> to vector<16x16xf32>
    %c2_18 = arith.constant 2 : index
    %c1_19 = arith.constant 1 : index
    %c1_20 = arith.constant 1 : index
    %14 = vector.load %arg8[%c2_18, %c1_19, %c1_20] : memref<6x18x18xf32, #tpu.memory_space<vmem>>, vector<1x16x16xf32>
    %15 = vector.shape_cast %14 : vector<1x16x16xf32> to vector<16x16xf32>
    %16 = vector.shape_cast %13 : vector<16x16xf32> to vector<1x16x16xf32>
    tpu.vector_store %arg8[%c2_18, %c1_19, %c1_20], %16 {strides = array<i32>} : memref<6x18x18xf32, #tpu.memory_space<vmem>>, vector<1x16x16xf32>,
    %c0_21 = arith.constant 0 : index
    %17 = memref.load %arg3[%c0_21] : memref<3xf32, #tpu.memory_space<smem>>
    %18 = vector.broadcast %17 : f32 to vector<16x16xf32>
    %c1_22 = arith.constant 1 : index
    %19 = memref.load %arg3[%c1_22] : memref<3xf32, #tpu.memory_space<smem>>
    %20 = vector.broadcast %19 : f32 to vector<16x16xf32>
    %c2_23 = arith.constant 2 : index
    %21 = memref.load %arg3[%c2_23] : memref<3xf32, #tpu.memory_space<smem>>
    %22 = vector.broadcast %21 : f32 to vector<16x16xf32>
    %c0_24 = arith.constant 0 : index
    %23 = memref.load %arg5[%c0_24] : memref<1xf32, #tpu.memory_space<smem>>
    %24 = vector.broadcast %23 : f32 to vector<16x16xf32>
    %c0_25 = arith.constant 0 : index
    %c0_26 = arith.constant 0 : index
    %c0_27 = arith.constant 0 : index
    %25 = vector.load %arg8[%c0_25, %c0_26, %c0_27] : memref<6x18x18xf32, #tpu.memory_space<vmem>>, vector<1x16x16xf32>
    %26 = vector.shape_cast %25 : vector<1x16x16xf32> to vector<16x16xf32>
    %c0_28 = arith.constant 0 : index
    %27 = memref.load %arg2[%c0_28] : memref<81xf32, #tpu.memory_space<smem>>
    %28 = vector.broadcast %27 : f32 to vector<16x16xf32>
    %29 = arith.mulf %28, %26 : vector<16x16xf32>
    %30 = arith.addf %18, %29 : vector<16x16xf32>
    %c27 = arith.constant 27 : index
    %31 = memref.load %arg2[%c27] : memref<81xf32, #tpu.memory_space<smem>>
    %32 = vector.broadcast %31 : f32 to vector<16x16xf32>
    %33 = arith.mulf %32, %26 : vector<16x16xf32>
    %34 = arith.addf %20, %33 : vector<16x16xf32>
    %c54 = arith.constant 54 : index
    %35 = memref.load %arg2[%c54] : memref<81xf32, #tpu.memory_space<smem>>
    %36 = vector.broadcast %35 : f32 to vector<16x16xf32>
    %37 = arith.mulf %36, %26 : vector<16x16xf32>
    %38 = arith.addf %22, %37 : vector<16x16xf32>
    %c0_29 = arith.constant 0 : index
    %39 = memref.load %arg4[%c0_29] : memref<54xf32, #tpu.memory_space<smem>>
    %40 = vector.broadcast %39 : f32 to vector<16x16xf32>
    %41 = arith.mulf %40, %26 : vector<16x16xf32>
    %42 = arith.addf %24, %41 : vector<16x16xf32>
    %c0_30 = arith.constant 0 : index
    %c0_31 = arith.constant 0 : index
    %c1_32 = arith.constant 1 : index
    %43 = vector.load %arg8[%c0_30, %c0_31, %c1_32] : memref<6x18x18xf32, #tpu.memory_space<vmem>>, vector<1x16x16xf32>
    %44 = vector.shape_cast %43 : vector<1x16x16xf32> to vector<16x16xf32>
    %c1_33 = arith.constant 1 : index
    %45 = memref.load %arg2[%c1_33] : memref<81xf32, #tpu.memory_space<smem>>
    %46 = vector.broadcast %45 : f32 to vector<16x16xf32>
    %47 = arith.mulf %46, %44 : vector<16x16xf32>
    %48 = arith.addf %30, %47 : vector<16x16xf32>
    %c28 = arith.constant 28 : index
    %49 = memref.load %arg2[%c28] : memref<81xf32, #tpu.memory_space<smem>>
    %50 = vector.broadcast %49 : f32 to vector<16x16xf32>
    %51 = arith.mulf %50, %44 : vector<16x16xf32>
    %52 = arith.addf %34, %51 : vector<16x16xf32>
    %c55 = arith.constant 55 : index
    %53 = memref.load %arg2[%c55] : memref<81xf32, #tpu.memory_space<smem>>
    %54 = vector.broadcast %53 : f32 to vector<16x16xf32>
    %55 = arith.mulf %54, %44 : vector<16x16xf32>
    %56 = arith.addf %38, %55 : vector<16x16xf32>
    %c1_34 = arith.constant 1 : index
    %57 = memref.load %arg4[%c1_34] : memref<54xf32, #tpu.memory_space<smem>>
    %58 = vector.broadcast %57 : f32 to vector<16x16xf32>
    %59 = arith.mulf %58, %44 : vector<16x16xf32>
    %60 = arith.addf %42, %59 : vector<16x16xf32>
    %c0_35 = arith.constant 0 : index
    %c0_36 = arith.constant 0 : index
    %c2_37 = arith.constant 2 : index
    %61 = vector.load %arg8[%c0_35, %c0_36, %c2_37] : memref<6x18x18xf32, #tpu.memory_space<vmem>>, vector<1x16x16xf32>
    %62 = vector.shape_cast %61 : vector<1x16x16xf32> to vector<16x16xf32>
    %c2_38 = arith.constant 2 : index
    %63 = memref.load %arg2[%c2_38] : memref<81xf32, #tpu.memory_space<smem>>
    %64 = vector.broadcast %63 : f32 to vector<16x16xf32>
    %65 = arith.mulf %64, %62 : vector<16x16xf32>
    %66 = arith.addf %48, %65 : vector<16x16xf32>
    %c29 = arith.constant 29 : index
    %67 = memref.load %arg2[%c29] : memref<81xf32, #tpu.memory_space<smem>>
    %68 = vector.broadcast %67 : f32 to vector<16x16xf32>
    %69 = arith.mulf %68, %62 : vector<16x16xf32>
    %70 = arith.addf %52, %69 : vector<16x16xf32>
    %c56 = arith.constant 56 : index
    %71 = memref.load %arg2[%c56] : memref<81xf32, #tpu.memory_space<smem>>
    %72 = vector.broadcast %71 : f32 to vector<16x16xf32>
    %73 = arith.mulf %72, %62 : vector<16x16xf32>
    %74 = arith.addf %56, %73 : vector<16x16xf32>
    %c2_39 = arith.constant 2 : index
    %75 = memref.load %arg4[%c2_39] : memref<54xf32, #tpu.memory_space<smem>>
    %76 = vector.broadcast %75 : f32 to vector<16x16xf32>
    %77 = arith.mulf %76, %62 : vector<16x16xf32>
    %78 = arith.addf %60, %77 : vector<16x16xf32>
    %c0_40 = arith.constant 0 : index
    %c1_41 = arith.constant 1 : index
    %c0_42 = arith.constant 0 : index
    %79 = vector.load %arg8[%c0_40, %c1_41, %c0_42] : memref<6x18x18xf32, #tpu.memory_space<vmem>>, vector<1x16x16xf32>
    %80 = vector.shape_cast %79 : vector<1x16x16xf32> to vector<16x16xf32>
    %c3 = arith.constant 3 : index
    %81 = memref.load %arg2[%c3] : memref<81xf32, #tpu.memory_space<smem>>
    %82 = vector.broadcast %81 : f32 to vector<16x16xf32>
    %83 = arith.mulf %82, %80 : vector<16x16xf32>
    %84 = arith.addf %66, %83 : vector<16x16xf32>
    %c30 = arith.constant 30 : index
    %85 = memref.load %arg2[%c30] : memref<81xf32, #tpu.memory_space<smem>>
    %86 = vector.broadcast %85 : f32 to vector<16x16xf32>
    %87 = arith.mulf %86, %80 : vector<16x16xf32>
    %88 = arith.addf %70, %87 : vector<16x16xf32>
    %c57 = arith.constant 57 : index
    %89 = memref.load %arg2[%c57] : memref<81xf32, #tpu.memory_space<smem>>
    %90 = vector.broadcast %89 : f32 to vector<16x16xf32>
    %91 = arith.mulf %90, %80 : vector<16x16xf32>
    %92 = arith.addf %74, %91 : vector<16x16xf32>
    %c3_43 = arith.constant 3 : index
    %93 = memref.load %arg4[%c3_43] : memref<54xf32, #tpu.memory_space<smem>>
    %94 = vector.broadcast %93 : f32 to vector<16x16xf32>
    %95 = arith.mulf %94, %80 : vector<16x16xf32>
    %96 = arith.addf %78, %95 : vector<16x16xf32>
    %c0_44 = arith.constant 0 : index
    %c1_45 = arith.constant 1 : index
    %c1_46 = arith.constant 1 : index
    %97 = vector.load %arg8[%c0_44, %c1_45, %c1_46] : memref<6x18x18xf32, #tpu.memory_space<vmem>>, vector<1x16x16xf32>
    %98 = vector.shape_cast %97 : vector<1x16x16xf32> to vector<16x16xf32>
    %c4 = arith.constant 4 : index
    %99 = memref.load %arg2[%c4] : memref<81xf32, #tpu.memory_space<smem>>
    %100 = vector.broadcast %99 : f32 to vector<16x16xf32>
    %101 = arith.mulf %100, %98 : vector<16x16xf32>
    %102 = arith.addf %84, %101 : vector<16x16xf32>
    %c31 = arith.constant 31 : index
    %103 = memref.load %arg2[%c31] : memref<81xf32, #tpu.memory_space<smem>>
    %104 = vector.broadcast %103 : f32 to vector<16x16xf32>
    %105 = arith.mulf %104, %98 : vector<16x16xf32>
    %106 = arith.addf %88, %105 : vector<16x16xf32>
    %c58 = arith.constant 58 : index
    %107 = memref.load %arg2[%c58] : memref<81xf32, #tpu.memory_space<smem>>
    %108 = vector.broadcast %107 : f32 to vector<16x16xf32>
    %109 = arith.mulf %108, %98 : vector<16x16xf32>
    %110 = arith.addf %92, %109 : vector<16x16xf32>
    %c4_47 = arith.constant 4 : index
    %111 = memref.load %arg4[%c4_47] : memref<54xf32, #tpu.memory_space<smem>>
    %112 = vector.broadcast %111 : f32 to vector<16x16xf32>
    %113 = arith.mulf %112, %98 : vector<16x16xf32>
    %114 = arith.addf %96, %113 : vector<16x16xf32>
    %c0_48 = arith.constant 0 : index
    %c1_49 = arith.constant 1 : index
    %c2_50 = arith.constant 2 : index
    %115 = vector.load %arg8[%c0_48, %c1_49, %c2_50] : memref<6x18x18xf32, #tpu.memory_space<vmem>>, vector<1x16x16xf32>
    %116 = vector.shape_cast %115 : vector<1x16x16xf32> to vector<16x16xf32>
    %c5 = arith.constant 5 : index
    %117 = memref.load %arg2[%c5] : memref<81xf32, #tpu.memory_space<smem>>
    %118 = vector.broadcast %117 : f32 to vector<16x16xf32>
    %119 = arith.mulf %118, %116 : vector<16x16xf32>
    %120 = arith.addf %102, %119 : vector<16x16xf32>
    %c32 = arith.constant 32 : index
    %121 = memref.load %arg2[%c32] : memref<81xf32, #tpu.memory_space<smem>>
    %122 = vector.broadcast %121 : f32 to vector<16x16xf32>
    %123 = arith.mulf %122, %116 : vector<16x16xf32>
    %124 = arith.addf %106, %123 : vector<16x16xf32>
    %c59 = arith.constant 59 : index
    %125 = memref.load %arg2[%c59] : memref<81xf32, #tpu.memory_space<smem>>
    %126 = vector.broadcast %125 : f32 to vector<16x16xf32>
    %127 = arith.mulf %126, %116 : vector<16x16xf32>
    %128 = arith.addf %110, %127 : vector<16x16xf32>
    %c5_51 = arith.constant 5 : index
    %129 = memref.load %arg4[%c5_51] : memref<54xf32, #tpu.memory_space<smem>>
    %130 = vector.broadcast %129 : f32 to vector<16x16xf32>
    %131 = arith.mulf %130, %116 : vector<16x16xf32>
    %132 = arith.addf %114, %131 : vector<16x16xf32>
    %c0_52 = arith.constant 0 : index
    %c2_53 = arith.constant 2 : index
    %c0_54 = arith.constant 0 : index
    %133 = vector.load %arg8[%c0_52, %c2_53, %c0_54] : memref<6x18x18xf32, #tpu.memory_space<vmem>>, vector<1x16x16xf32>
    %134 = vector.shape_cast %133 : vector<1x16x16xf32> to vector<16x16xf32>
    %c6 = arith.constant 6 : index
    %135 = memref.load %arg2[%c6] : memref<81xf32, #tpu.memory_space<smem>>
    %136 = vector.broadcast %135 : f32 to vector<16x16xf32>
    %137 = arith.mulf %136, %134 : vector<16x16xf32>
    %138 = arith.addf %120, %137 : vector<16x16xf32>
    %c33 = arith.constant 33 : index
    %139 = memref.load %arg2[%c33] : memref<81xf32, #tpu.memory_space<smem>>
    %140 = vector.broadcast %139 : f32 to vector<16x16xf32>
    %141 = arith.mulf %140, %134 : vector<16x16xf32>
    %142 = arith.addf %124, %141 : vector<16x16xf32>
    %c60 = arith.constant 60 : index
    %143 = memref.load %arg2[%c60] : memref<81xf32, #tpu.memory_space<smem>>
    %144 = vector.broadcast %143 : f32 to vector<16x16xf32>
    %145 = arith.mulf %144, %134 : vector<16x16xf32>
    %146 = arith.addf %128, %145 : vector<16x16xf32>
    %c6_55 = arith.constant 6 : index
    %147 = memref.load %arg4[%c6_55] : memref<54xf32, #tpu.memory_space<smem>>
    %148 = vector.broadcast %147 : f32 to vector<16x16xf32>
    %149 = arith.mulf %148, %134 : vector<16x16xf32>
    %150 = arith.addf %132, %149 : vector<16x16xf32>
    %c0_56 = arith.constant 0 : index
    %c2_57 = arith.constant 2 : index
    %c1_58 = arith.constant 1 : index
    %151 = vector.load %arg8[%c0_56, %c2_57, %c1_58] : memref<6x18x18xf32, #tpu.memory_space<vmem>>, vector<1x16x16xf32>
    %152 = vector.shape_cast %151 : vector<1x16x16xf32> to vector<16x16xf32>
    %c7 = arith.constant 7 : index
    %153 = memref.load %arg2[%c7] : memref<81xf32, #tpu.memory_space<smem>>
    %154 = vector.broadcast %153 : f32 to vector<16x16xf32>
    %155 = arith.mulf %154, %152 : vector<16x16xf32>
    %156 = arith.addf %138, %155 : vector<16x16xf32>
    %c34 = arith.constant 34 : index
    %157 = memref.load %arg2[%c34] : memref<81xf32, #tpu.memory_space<smem>>
    %158 = vector.broadcast %157 : f32 to vector<16x16xf32>
    %159 = arith.mulf %158, %152 : vector<16x16xf32>
    %160 = arith.addf %142, %159 : vector<16x16xf32>
    %c61 = arith.constant 61 : index
    %161 = memref.load %arg2[%c61] : memref<81xf32, #tpu.memory_space<smem>>
    %162 = vector.broadcast %161 : f32 to vector<16x16xf32>
    %163 = arith.mulf %162, %152 : vector<16x16xf32>
    %164 = arith.addf %146, %163 : vector<16x16xf32>
    %c7_59 = arith.constant 7 : index
    %165 = memref.load %arg4[%c7_59] : memref<54xf32, #tpu.memory_space<smem>>
    %166 = vector.broadcast %165 : f32 to vector<16x16xf32>
    %167 = arith.mulf %166, %152 : vector<16x16xf32>
    %168 = arith.addf %150, %167 : vector<16x16xf32>
    %c0_60 = arith.constant 0 : index
    %c2_61 = arith.constant 2 : index
    %c2_62 = arith.constant 2 : index
    %169 = vector.load %arg8[%c0_60, %c2_61, %c2_62] : memref<6x18x18xf32, #tpu.memory_space<vmem>>, vector<1x16x16xf32>
    %170 = vector.shape_cast %169 : vector<1x16x16xf32> to vector<16x16xf32>
    %c8 = arith.constant 8 : index
    %171 = memref.load %arg2[%c8] : memref<81xf32, #tpu.memory_space<smem>>
    %172 = vector.broadcast %171 : f32 to vector<16x16xf32>
    %173 = arith.mulf %172, %170 : vector<16x16xf32>
    %174 = arith.addf %156, %173 : vector<16x16xf32>
    %c35 = arith.constant 35 : index
    %175 = memref.load %arg2[%c35] : memref<81xf32, #tpu.memory_space<smem>>
    %176 = vector.broadcast %175 : f32 to vector<16x16xf32>
    %177 = arith.mulf %176, %170 : vector<16x16xf32>
    %178 = arith.addf %160, %177 : vector<16x16xf32>
    %c62 = arith.constant 62 : index
    %179 = memref.load %arg2[%c62] : memref<81xf32, #tpu.memory_space<smem>>
    %180 = vector.broadcast %179 : f32 to vector<16x16xf32>
    %181 = arith.mulf %180, %170 : vector<16x16xf32>
    %182 = arith.addf %164, %181 : vector<16x16xf32>
    %c8_63 = arith.constant 8 : index
    %183 = memref.load %arg4[%c8_63] : memref<54xf32, #tpu.memory_space<smem>>
    %184 = vector.broadcast %183 : f32 to vector<16x16xf32>
    %185 = arith.mulf %184, %170 : vector<16x16xf32>
    %186 = arith.addf %168, %185 : vector<16x16xf32>
    %c1_64 = arith.constant 1 : index
    %c0_65 = arith.constant 0 : index
    %c0_66 = arith.constant 0 : index
    %187 = vector.load %arg8[%c1_64, %c0_65, %c0_66] : memref<6x18x18xf32, #tpu.memory_space<vmem>>, vector<1x16x16xf32>
    %188 = vector.shape_cast %187 : vector<1x16x16xf32> to vector<16x16xf32>
    %c9 = arith.constant 9 : index
    %189 = memref.load %arg2[%c9] : memref<81xf32, #tpu.memory_space<smem>>
    %190 = vector.broadcast %189 : f32 to vector<16x16xf32>
    %191 = arith.mulf %190, %188 : vector<16x16xf32>
    %192 = arith.addf %174, %191 : vector<16x16xf32>
    %c36 = arith.constant 36 : index
    %193 = memref.load %arg2[%c36] : memref<81xf32, #tpu.memory_space<smem>>
    %194 = vector.broadcast %193 : f32 to vector<16x16xf32>
    %195 = arith.mulf %194, %188 : vector<16x16xf32>
    %196 = arith.addf %178, %195 : vector<16x16xf32>
    %c63 = arith.constant 63 : index
    %197 = memref.load %arg2[%c63] : memref<81xf32, #tpu.memory_space<smem>>
    %198 = vector.broadcast %197 : f32 to vector<16x16xf32>
    %199 = arith.mulf %198, %188 : vector<16x16xf32>
    %200 = arith.addf %182, %199 : vector<16x16xf32>
    %c9_67 = arith.constant 9 : index
    %201 = memref.load %arg4[%c9_67] : memref<54xf32, #tpu.memory_space<smem>>
    %202 = vector.broadcast %201 : f32 to vector<16x16xf32>
    %203 = arith.mulf %202, %188 : vector<16x16xf32>
    %204 = arith.addf %186, %203 : vector<16x16xf32>
    %c1_68 = arith.constant 1 : index
    %c0_69 = arith.constant 0 : index
    %c1_70 = arith.constant 1 : index
    %205 = vector.load %arg8[%c1_68, %c0_69, %c1_70] : memref<6x18x18xf32, #tpu.memory_space<vmem>>, vector<1x16x16xf32>
    %206 = vector.shape_cast %205 : vector<1x16x16xf32> to vector<16x16xf32>
    %c10 = arith.constant 10 : index
    %207 = memref.load %arg2[%c10] : memref<81xf32, #tpu.memory_space<smem>>
    %208 = vector.broadcast %207 : f32 to vector<16x16xf32>
    %209 = arith.mulf %208, %206 : vector<16x16xf32>
    %210 = arith.addf %192, %209 : vector<16x16xf32>
    %c37 = arith.constant 37 : index
    %211 = memref.load %arg2[%c37] : memref<81xf32, #tpu.memory_space<smem>>
    %212 = vector.broadcast %211 : f32 to vector<16x16xf32>
    %213 = arith.mulf %212, %206 : vector<16x16xf32>
    %214 = arith.addf %196, %213 : vector<16x16xf32>
    %c64 = arith.constant 64 : index
    %215 = memref.load %arg2[%c64] : memref<81xf32, #tpu.memory_space<smem>>
    %216 = vector.broadcast %215 : f32 to vector<16x16xf32>
    %217 = arith.mulf %216, %206 : vector<16x16xf32>
    %218 = arith.addf %200, %217 : vector<16x16xf32>
    %c10_71 = arith.constant 10 : index
    %219 = memref.load %arg4[%c10_71] : memref<54xf32, #tpu.memory_space<smem>>
    %220 = vector.broadcast %219 : f32 to vector<16x16xf32>
    %221 = arith.mulf %220, %206 : vector<16x16xf32>
    %222 = arith.addf %204, %221 : vector<16x16xf32>
    %c1_72 = arith.constant 1 : index
    %c0_73 = arith.constant 0 : index
    %c2_74 = arith.constant 2 : index
    %223 = vector.load %arg8[%c1_72, %c0_73, %c2_74] : memref<6x18x18xf32, #tpu.memory_space<vmem>>, vector<1x16x16xf32>
    %224 = vector.shape_cast %223 : vector<1x16x16xf32> to vector<16x16xf32>
    %c11 = arith.constant 11 : index
    %225 = memref.load %arg2[%c11] : memref<81xf32, #tpu.memory_space<smem>>
    %226 = vector.broadcast %225 : f32 to vector<16x16xf32>
    %227 = arith.mulf %226, %224 : vector<16x16xf32>
    %228 = arith.addf %210, %227 : vector<16x16xf32>
    %c38 = arith.constant 38 : index
    %229 = memref.load %arg2[%c38] : memref<81xf32, #tpu.memory_space<smem>>
    %230 = vector.broadcast %229 : f32 to vector<16x16xf32>
    %231 = arith.mulf %230, %224 : vector<16x16xf32>
    %232 = arith.addf %214, %231 : vector<16x16xf32>
    %c65 = arith.constant 65 : index
    %233 = memref.load %arg2[%c65] : memref<81xf32, #tpu.memory_space<smem>>
    %234 = vector.broadcast %233 : f32 to vector<16x16xf32>
    %235 = arith.mulf %234, %224 : vector<16x16xf32>
    %236 = arith.addf %218, %235 : vector<16x16xf32>
    %c11_75 = arith.constant 11 : index
    %237 = memref.load %arg4[%c11_75] : memref<54xf32, #tpu.memory_space<smem>>
    %238 = vector.broadcast %237 : f32 to vector<16x16xf32>
    %239 = arith.mulf %238, %224 : vector<16x16xf32>
    %240 = arith.addf %222, %239 : vector<16x16xf32>
    %c1_76 = arith.constant 1 : index
    %c1_77 = arith.constant 1 : index
    %c0_78 = arith.constant 0 : index
    %241 = vector.load %arg8[%c1_76, %c1_77, %c0_78] : memref<6x18x18xf32, #tpu.memory_space<vmem>>, vector<1x16x16xf32>
    %242 = vector.shape_cast %241 : vector<1x16x16xf32> to vector<16x16xf32>
    %c12 = arith.constant 12 : index
    %243 = memref.load %arg2[%c12] : memref<81xf32, #tpu.memory_space<smem>>
    %244 = vector.broadcast %243 : f32 to vector<16x16xf32>
    %245 = arith.mulf %244, %242 : vector<16x16xf32>
    %246 = arith.addf %228, %245 : vector<16x16xf32>
    %c39 = arith.constant 39 : index
    %247 = memref.load %arg2[%c39] : memref<81xf32, #tpu.memory_space<smem>>
    %248 = vector.broadcast %247 : f32 to vector<16x16xf32>
    %249 = arith.mulf %248, %242 : vector<16x16xf32>
    %250 = arith.addf %232, %249 : vector<16x16xf32>
    %c66 = arith.constant 66 : index
    %251 = memref.load %arg2[%c66] : memref<81xf32, #tpu.memory_space<smem>>
    %252 = vector.broadcast %251 : f32 to vector<16x16xf32>
    %253 = arith.mulf %252, %242 : vector<16x16xf32>
    %254 = arith.addf %236, %253 : vector<16x16xf32>
    %c12_79 = arith.constant 12 : index
    %255 = memref.load %arg4[%c12_79] : memref<54xf32, #tpu.memory_space<smem>>
    %256 = vector.broadcast %255 : f32 to vector<16x16xf32>
    %257 = arith.mulf %256, %242 : vector<16x16xf32>
    %258 = arith.addf %240, %257 : vector<16x16xf32>
    %c1_80 = arith.constant 1 : index
    %c1_81 = arith.constant 1 : index
    %c1_82 = arith.constant 1 : index
    %259 = vector.load %arg8[%c1_80, %c1_81, %c1_82] : memref<6x18x18xf32, #tpu.memory_space<vmem>>, vector<1x16x16xf32>
    %260 = vector.shape_cast %259 : vector<1x16x16xf32> to vector<16x16xf32>
    %c13 = arith.constant 13 : index
    %261 = memref.load %arg2[%c13] : memref<81xf32, #tpu.memory_space<smem>>
    %262 = vector.broadcast %261 : f32 to vector<16x16xf32>
    %263 = arith.mulf %262, %260 : vector<16x16xf32>
    %264 = arith.addf %246, %263 : vector<16x16xf32>
    %c40 = arith.constant 40 : index
    %265 = memref.load %arg2[%c40] : memref<81xf32, #tpu.memory_space<smem>>
    %266 = vector.broadcast %265 : f32 to vector<16x16xf32>
    %267 = arith.mulf %266, %260 : vector<16x16xf32>
    %268 = arith.addf %250, %267 : vector<16x16xf32>
    %c67 = arith.constant 67 : index
    %269 = memref.load %arg2[%c67] : memref<81xf32, #tpu.memory_space<smem>>
    %270 = vector.broadcast %269 : f32 to vector<16x16xf32>
    %271 = arith.mulf %270, %260 : vector<16x16xf32>
    %272 = arith.addf %254, %271 : vector<16x16xf32>
    %c13_83 = arith.constant 13 : index
    %273 = memref.load %arg4[%c13_83] : memref<54xf32, #tpu.memory_space<smem>>
    %274 = vector.broadcast %273 : f32 to vector<16x16xf32>
    %275 = arith.mulf %274, %260 : vector<16x16xf32>
    %276 = arith.addf %258, %275 : vector<16x16xf32>
    %c1_84 = arith.constant 1 : index
    %c1_85 = arith.constant 1 : index
    %c2_86 = arith.constant 2 : index
    %277 = vector.load %arg8[%c1_84, %c1_85, %c2_86] : memref<6x18x18xf32, #tpu.memory_space<vmem>>, vector<1x16x16xf32>
    %278 = vector.shape_cast %277 : vector<1x16x16xf32> to vector<16x16xf32>
    %c14 = arith.constant 14 : index
    %279 = memref.load %arg2[%c14] : memref<81xf32, #tpu.memory_space<smem>>
    %280 = vector.broadcast %279 : f32 to vector<16x16xf32>
    %281 = arith.mulf %280, %278 : vector<16x16xf32>
    %282 = arith.addf %264, %281 : vector<16x16xf32>
    %c41 = arith.constant 41 : index
    %283 = memref.load %arg2[%c41] : memref<81xf32, #tpu.memory_space<smem>>
    %284 = vector.broadcast %283 : f32 to vector<16x16xf32>
    %285 = arith.mulf %284, %278 : vector<16x16xf32>
    %286 = arith.addf %268, %285 : vector<16x16xf32>
    %c68 = arith.constant 68 : index
    %287 = memref.load %arg2[%c68] : memref<81xf32, #tpu.memory_space<smem>>
    %288 = vector.broadcast %287 : f32 to vector<16x16xf32>
    %289 = arith.mulf %288, %278 : vector<16x16xf32>
    %290 = arith.addf %272, %289 : vector<16x16xf32>
    %c14_87 = arith.constant 14 : index
    %291 = memref.load %arg4[%c14_87] : memref<54xf32, #tpu.memory_space<smem>>
    %292 = vector.broadcast %291 : f32 to vector<16x16xf32>
    %293 = arith.mulf %292, %278 : vector<16x16xf32>
    %294 = arith.addf %276, %293 : vector<16x16xf32>
    %c1_88 = arith.constant 1 : index
    %c2_89 = arith.constant 2 : index
    %c0_90 = arith.constant 0 : index
    %295 = vector.load %arg8[%c1_88, %c2_89, %c0_90] : memref<6x18x18xf32, #tpu.memory_space<vmem>>, vector<1x16x16xf32>
    %296 = vector.shape_cast %295 : vector<1x16x16xf32> to vector<16x16xf32>
    %c15 = arith.constant 15 : index
    %297 = memref.load %arg2[%c15] : memref<81xf32, #tpu.memory_space<smem>>
    %298 = vector.broadcast %297 : f32 to vector<16x16xf32>
    %299 = arith.mulf %298, %296 : vector<16x16xf32>
    %300 = arith.addf %282, %299 : vector<16x16xf32>
    %c42 = arith.constant 42 : index
    %301 = memref.load %arg2[%c42] : memref<81xf32, #tpu.memory_space<smem>>
    %302 = vector.broadcast %301 : f32 to vector<16x16xf32>
    %303 = arith.mulf %302, %296 : vector<16x16xf32>
    %304 = arith.addf %286, %303 : vector<16x16xf32>
    %c69 = arith.constant 69 : index
    %305 = memref.load %arg2[%c69] : memref<81xf32, #tpu.memory_space<smem>>
    %306 = vector.broadcast %305 : f32 to vector<16x16xf32>
    %307 = arith.mulf %306, %296 : vector<16x16xf32>
    %308 = arith.addf %290, %307 : vector<16x16xf32>
    %c15_91 = arith.constant 15 : index
    %309 = memref.load %arg4[%c15_91] : memref<54xf32, #tpu.memory_space<smem>>
    %310 = vector.broadcast %309 : f32 to vector<16x16xf32>
    %311 = arith.mulf %310, %296 : vector<16x16xf32>
    %312 = arith.addf %294, %311 : vector<16x16xf32>
    %c1_92 = arith.constant 1 : index
    %c2_93 = arith.constant 2 : index
    %c1_94 = arith.constant 1 : index
    %313 = vector.load %arg8[%c1_92, %c2_93, %c1_94] : memref<6x18x18xf32, #tpu.memory_space<vmem>>, vector<1x16x16xf32>
    %314 = vector.shape_cast %313 : vector<1x16x16xf32> to vector<16x16xf32>
    %c16 = arith.constant 16 : index
    %315 = memref.load %arg2[%c16] : memref<81xf32, #tpu.memory_space<smem>>
    %316 = vector.broadcast %315 : f32 to vector<16x16xf32>
    %317 = arith.mulf %316, %314 : vector<16x16xf32>
    %318 = arith.addf %300, %317 : vector<16x16xf32>
    %c43 = arith.constant 43 : index
    %319 = memref.load %arg2[%c43] : memref<81xf32, #tpu.memory_space<smem>>
    %320 = vector.broadcast %319 : f32 to vector<16x16xf32>
    %321 = arith.mulf %320, %314 : vector<16x16xf32>
    %322 = arith.addf %304, %321 : vector<16x16xf32>
    %c70 = arith.constant 70 : index
    %323 = memref.load %arg2[%c70] : memref<81xf32, #tpu.memory_space<smem>>
    %324 = vector.broadcast %323 : f32 to vector<16x16xf32>
    %325 = arith.mulf %324, %314 : vector<16x16xf32>
    %326 = arith.addf %308, %325 : vector<16x16xf32>
    %c16_95 = arith.constant 16 : index
    %327 = memref.load %arg4[%c16_95] : memref<54xf32, #tpu.memory_space<smem>>
    %328 = vector.broadcast %327 : f32 to vector<16x16xf32>
    %329 = arith.mulf %328, %314 : vector<16x16xf32>
    %330 = arith.addf %312, %329 : vector<16x16xf32>
    %c1_96 = arith.constant 1 : index
    %c2_97 = arith.constant 2 : index
    %c2_98 = arith.constant 2 : index
    %331 = vector.load %arg8[%c1_96, %c2_97, %c2_98] : memref<6x18x18xf32, #tpu.memory_space<vmem>>, vector<1x16x16xf32>
    %332 = vector.shape_cast %331 : vector<1x16x16xf32> to vector<16x16xf32>
    %c17 = arith.constant 17 : index
    %333 = memref.load %arg2[%c17] : memref<81xf32, #tpu.memory_space<smem>>
    %334 = vector.broadcast %333 : f32 to vector<16x16xf32>
    %335 = arith.mulf %334, %332 : vector<16x16xf32>
    %336 = arith.addf %318, %335 : vector<16x16xf32>
    %c44 = arith.constant 44 : index
    %337 = memref.load %arg2[%c44] : memref<81xf32, #tpu.memory_space<smem>>
    %338 = vector.broadcast %337 : f32 to vector<16x16xf32>
    %339 = arith.mulf %338, %332 : vector<16x16xf32>
    %340 = arith.addf %322, %339 : vector<16x16xf32>
    %c71 = arith.constant 71 : index
    %341 = memref.load %arg2[%c71] : memref<81xf32, #tpu.memory_space<smem>>
    %342 = vector.broadcast %341 : f32 to vector<16x16xf32>
    %343 = arith.mulf %342, %332 : vector<16x16xf32>
    %344 = arith.addf %326, %343 : vector<16x16xf32>
    %c17_99 = arith.constant 17 : index
    %345 = memref.load %arg4[%c17_99] : memref<54xf32, #tpu.memory_space<smem>>
    %346 = vector.broadcast %345 : f32 to vector<16x16xf32>
    %347 = arith.mulf %346, %332 : vector<16x16xf32>
    %348 = arith.addf %330, %347 : vector<16x16xf32>
    %c2_100 = arith.constant 2 : index
    %c0_101 = arith.constant 0 : index
    %c0_102 = arith.constant 0 : index
    %349 = vector.load %arg8[%c2_100, %c0_101, %c0_102] : memref<6x18x18xf32, #tpu.memory_space<vmem>>, vector<1x16x16xf32>
    %350 = vector.shape_cast %349 : vector<1x16x16xf32> to vector<16x16xf32>
    %c18 = arith.constant 18 : index
    %351 = memref.load %arg2[%c18] : memref<81xf32, #tpu.memory_space<smem>>
    %352 = vector.broadcast %351 : f32 to vector<16x16xf32>
    %353 = arith.mulf %352, %350 : vector<16x16xf32>
    %354 = arith.addf %336, %353 : vector<16x16xf32>
    %c45 = arith.constant 45 : index
    %355 = memref.load %arg2[%c45] : memref<81xf32, #tpu.memory_space<smem>>
    %356 = vector.broadcast %355 : f32 to vector<16x16xf32>
    %357 = arith.mulf %356, %350 : vector<16x16xf32>
    %358 = arith.addf %340, %357 : vector<16x16xf32>
    %c72 = arith.constant 72 : index
    %359 = memref.load %arg2[%c72] : memref<81xf32, #tpu.memory_space<smem>>
    %360 = vector.broadcast %359 : f32 to vector<16x16xf32>
    %361 = arith.mulf %360, %350 : vector<16x16xf32>
    %362 = arith.addf %344, %361 : vector<16x16xf32>
    %c18_103 = arith.constant 18 : index
    %363 = memref.load %arg4[%c18_103] : memref<54xf32, #tpu.memory_space<smem>>
    %364 = vector.broadcast %363 : f32 to vector<16x16xf32>
    %365 = arith.mulf %364, %350 : vector<16x16xf32>
    %366 = arith.addf %348, %365 : vector<16x16xf32>
    %c2_104 = arith.constant 2 : index
    %c0_105 = arith.constant 0 : index
    %c1_106 = arith.constant 1 : index
    %367 = vector.load %arg8[%c2_104, %c0_105, %c1_106] : memref<6x18x18xf32, #tpu.memory_space<vmem>>, vector<1x16x16xf32>
    %368 = vector.shape_cast %367 : vector<1x16x16xf32> to vector<16x16xf32>
    %c19 = arith.constant 19 : index
    %369 = memref.load %arg2[%c19] : memref<81xf32, #tpu.memory_space<smem>>
    %370 = vector.broadcast %369 : f32 to vector<16x16xf32>
    %371 = arith.mulf %370, %368 : vector<16x16xf32>
    %372 = arith.addf %354, %371 : vector<16x16xf32>
    %c46 = arith.constant 46 : index
    %373 = memref.load %arg2[%c46] : memref<81xf32, #tpu.memory_space<smem>>
    %374 = vector.broadcast %373 : f32 to vector<16x16xf32>
    %375 = arith.mulf %374, %368 : vector<16x16xf32>
    %376 = arith.addf %358, %375 : vector<16x16xf32>
    %c73 = arith.constant 73 : index
    %377 = memref.load %arg2[%c73] : memref<81xf32, #tpu.memory_space<smem>>
    %378 = vector.broadcast %377 : f32 to vector<16x16xf32>
    %379 = arith.mulf %378, %368 : vector<16x16xf32>
    %380 = arith.addf %362, %379 : vector<16x16xf32>
    %c19_107 = arith.constant 19 : index
    %381 = memref.load %arg4[%c19_107] : memref<54xf32, #tpu.memory_space<smem>>
    %382 = vector.broadcast %381 : f32 to vector<16x16xf32>
    %383 = arith.mulf %382, %368 : vector<16x16xf32>
    %384 = arith.addf %366, %383 : vector<16x16xf32>
    %c2_108 = arith.constant 2 : index
    %c0_109 = arith.constant 0 : index
    %c2_110 = arith.constant 2 : index
    %385 = vector.load %arg8[%c2_108, %c0_109, %c2_110] : memref<6x18x18xf32, #tpu.memory_space<vmem>>, vector<1x16x16xf32>
    %386 = vector.shape_cast %385 : vector<1x16x16xf32> to vector<16x16xf32>
    %c20 = arith.constant 20 : index
    %387 = memref.load %arg2[%c20] : memref<81xf32, #tpu.memory_space<smem>>
    %388 = vector.broadcast %387 : f32 to vector<16x16xf32>
    %389 = arith.mulf %388, %386 : vector<16x16xf32>
    %390 = arith.addf %372, %389 : vector<16x16xf32>
    %c47 = arith.constant 47 : index
    %391 = memref.load %arg2[%c47] : memref<81xf32, #tpu.memory_space<smem>>
    %392 = vector.broadcast %391 : f32 to vector<16x16xf32>
    %393 = arith.mulf %392, %386 : vector<16x16xf32>
    %394 = arith.addf %376, %393 : vector<16x16xf32>
    %c74 = arith.constant 74 : index
    %395 = memref.load %arg2[%c74] : memref<81xf32, #tpu.memory_space<smem>>
    %396 = vector.broadcast %395 : f32 to vector<16x16xf32>
    %397 = arith.mulf %396, %386 : vector<16x16xf32>
    %398 = arith.addf %380, %397 : vector<16x16xf32>
    %c20_111 = arith.constant 20 : index
    %399 = memref.load %arg4[%c20_111] : memref<54xf32, #tpu.memory_space<smem>>
    %400 = vector.broadcast %399 : f32 to vector<16x16xf32>
    %401 = arith.mulf %400, %386 : vector<16x16xf32>
    %402 = arith.addf %384, %401 : vector<16x16xf32>
    %c2_112 = arith.constant 2 : index
    %c1_113 = arith.constant 1 : index
    %c0_114 = arith.constant 0 : index
    %403 = vector.load %arg8[%c2_112, %c1_113, %c0_114] : memref<6x18x18xf32, #tpu.memory_space<vmem>>, vector<1x16x16xf32>
    %404 = vector.shape_cast %403 : vector<1x16x16xf32> to vector<16x16xf32>
    %c21 = arith.constant 21 : index
    %405 = memref.load %arg2[%c21] : memref<81xf32, #tpu.memory_space<smem>>
    %406 = vector.broadcast %405 : f32 to vector<16x16xf32>
    %407 = arith.mulf %406, %404 : vector<16x16xf32>
    %408 = arith.addf %390, %407 : vector<16x16xf32>
    %c48 = arith.constant 48 : index
    %409 = memref.load %arg2[%c48] : memref<81xf32, #tpu.memory_space<smem>>
    %410 = vector.broadcast %409 : f32 to vector<16x16xf32>
    %411 = arith.mulf %410, %404 : vector<16x16xf32>
    %412 = arith.addf %394, %411 : vector<16x16xf32>
    %c75 = arith.constant 75 : index
    %413 = memref.load %arg2[%c75] : memref<81xf32, #tpu.memory_space<smem>>
    %414 = vector.broadcast %413 : f32 to vector<16x16xf32>
    %415 = arith.mulf %414, %404 : vector<16x16xf32>
    %416 = arith.addf %398, %415 : vector<16x16xf32>
    %c21_115 = arith.constant 21 : index
    %417 = memref.load %arg4[%c21_115] : memref<54xf32, #tpu.memory_space<smem>>
    %418 = vector.broadcast %417 : f32 to vector<16x16xf32>
    %419 = arith.mulf %418, %404 : vector<16x16xf32>
    %420 = arith.addf %402, %419 : vector<16x16xf32>
    %c2_116 = arith.constant 2 : index
    %c1_117 = arith.constant 1 : index
    %c1_118 = arith.constant 1 : index
    %421 = vector.load %arg8[%c2_116, %c1_117, %c1_118] : memref<6x18x18xf32, #tpu.memory_space<vmem>>, vector<1x16x16xf32>
    %422 = vector.shape_cast %421 : vector<1x16x16xf32> to vector<16x16xf32>
    %c22 = arith.constant 22 : index
    %423 = memref.load %arg2[%c22] : memref<81xf32, #tpu.memory_space<smem>>
    %424 = vector.broadcast %423 : f32 to vector<16x16xf32>
    %425 = arith.mulf %424, %422 : vector<16x16xf32>
    %426 = arith.addf %408, %425 : vector<16x16xf32>
    %c49 = arith.constant 49 : index
    %427 = memref.load %arg2[%c49] : memref<81xf32, #tpu.memory_space<smem>>
    %428 = vector.broadcast %427 : f32 to vector<16x16xf32>
    %429 = arith.mulf %428, %422 : vector<16x16xf32>
    %430 = arith.addf %412, %429 : vector<16x16xf32>
    %c76 = arith.constant 76 : index
    %431 = memref.load %arg2[%c76] : memref<81xf32, #tpu.memory_space<smem>>
    %432 = vector.broadcast %431 : f32 to vector<16x16xf32>
    %433 = arith.mulf %432, %422 : vector<16x16xf32>
    %434 = arith.addf %416, %433 : vector<16x16xf32>
    %c22_119 = arith.constant 22 : index
    %435 = memref.load %arg4[%c22_119] : memref<54xf32, #tpu.memory_space<smem>>
    %436 = vector.broadcast %435 : f32 to vector<16x16xf32>
    %437 = arith.mulf %436, %422 : vector<16x16xf32>
    %438 = arith.addf %420, %437 : vector<16x16xf32>
    %c2_120 = arith.constant 2 : index
    %c1_121 = arith.constant 1 : index
    %c2_122 = arith.constant 2 : index
    %439 = vector.load %arg8[%c2_120, %c1_121, %c2_122] : memref<6x18x18xf32, #tpu.memory_space<vmem>>, vector<1x16x16xf32>
    %440 = vector.shape_cast %439 : vector<1x16x16xf32> to vector<16x16xf32>
    %c23 = arith.constant 23 : index
    %441 = memref.load %arg2[%c23] : memref<81xf32, #tpu.memory_space<smem>>
    %442 = vector.broadcast %441 : f32 to vector<16x16xf32>
    %443 = arith.mulf %442, %440 : vector<16x16xf32>
    %444 = arith.addf %426, %443 : vector<16x16xf32>
    %c50 = arith.constant 50 : index
    %445 = memref.load %arg2[%c50] : memref<81xf32, #tpu.memory_space<smem>>
    %446 = vector.broadcast %445 : f32 to vector<16x16xf32>
    %447 = arith.mulf %446, %440 : vector<16x16xf32>
    %448 = arith.addf %430, %447 : vector<16x16xf32>
    %c77 = arith.constant 77 : index
    %449 = memref.load %arg2[%c77] : memref<81xf32, #tpu.memory_space<smem>>
    %450 = vector.broadcast %449 : f32 to vector<16x16xf32>
    %451 = arith.mulf %450, %440 : vector<16x16xf32>
    %452 = arith.addf %434, %451 : vector<16x16xf32>
    %c23_123 = arith.constant 23 : index
    %453 = memref.load %arg4[%c23_123] : memref<54xf32, #tpu.memory_space<smem>>
    %454 = vector.broadcast %453 : f32 to vector<16x16xf32>
    %455 = arith.mulf %454, %440 : vector<16x16xf32>
    %456 = arith.addf %438, %455 : vector<16x16xf32>
    %c2_124 = arith.constant 2 : index
    %c2_125 = arith.constant 2 : index
    %c0_126 = arith.constant 0 : index
    %457 = vector.load %arg8[%c2_124, %c2_125, %c0_126] : memref<6x18x18xf32, #tpu.memory_space<vmem>>, vector<1x16x16xf32>
    %458 = vector.shape_cast %457 : vector<1x16x16xf32> to vector<16x16xf32>
    %c24 = arith.constant 24 : index
    %459 = memref.load %arg2[%c24] : memref<81xf32, #tpu.memory_space<smem>>
    %460 = vector.broadcast %459 : f32 to vector<16x16xf32>
    %461 = arith.mulf %460, %458 : vector<16x16xf32>
    %462 = arith.addf %444, %461 : vector<16x16xf32>
    %c51 = arith.constant 51 : index
    %463 = memref.load %arg2[%c51] : memref<81xf32, #tpu.memory_space<smem>>
    %464 = vector.broadcast %463 : f32 to vector<16x16xf32>
    %465 = arith.mulf %464, %458 : vector<16x16xf32>
    %466 = arith.addf %448, %465 : vector<16x16xf32>
    %c78 = arith.constant 78 : index
    %467 = memref.load %arg2[%c78] : memref<81xf32, #tpu.memory_space<smem>>
    %468 = vector.broadcast %467 : f32 to vector<16x16xf32>
    %469 = arith.mulf %468, %458 : vector<16x16xf32>
    %470 = arith.addf %452, %469 : vector<16x16xf32>
    %c24_127 = arith.constant 24 : index
    %471 = memref.load %arg4[%c24_127] : memref<54xf32, #tpu.memory_space<smem>>
    %472 = vector.broadcast %471 : f32 to vector<16x16xf32>
    %473 = arith.mulf %472, %458 : vector<16x16xf32>
    %474 = arith.addf %456, %473 : vector<16x16xf32>
    %c2_128 = arith.constant 2 : index
    %c2_129 = arith.constant 2 : index
    %c1_130 = arith.constant 1 : index
    %475 = vector.load %arg8[%c2_128, %c2_129, %c1_130] : memref<6x18x18xf32, #tpu.memory_space<vmem>>, vector<1x16x16xf32>
    %476 = vector.shape_cast %475 : vector<1x16x16xf32> to vector<16x16xf32>
    %c25 = arith.constant 25 : index
    %477 = memref.load %arg2[%c25] : memref<81xf32, #tpu.memory_space<smem>>
    %478 = vector.broadcast %477 : f32 to vector<16x16xf32>
    %479 = arith.mulf %478, %476 : vector<16x16xf32>
    %480 = arith.addf %462, %479 : vector<16x16xf32>
    %c52 = arith.constant 52 : index
    %481 = memref.load %arg2[%c52] : memref<81xf32, #tpu.memory_space<smem>>
    %482 = vector.broadcast %481 : f32 to vector<16x16xf32>
    %483 = arith.mulf %482, %476 : vector<16x16xf32>
    %484 = arith.addf %466, %483 : vector<16x16xf32>
    %c79 = arith.constant 79 : index
    %485 = memref.load %arg2[%c79] : memref<81xf32, #tpu.memory_space<smem>>
    %486 = vector.broadcast %485 : f32 to vector<16x16xf32>
    %487 = arith.mulf %486, %476 : vector<16x16xf32>
    %488 = arith.addf %470, %487 : vector<16x16xf32>
    %c25_131 = arith.constant 25 : index
    %489 = memref.load %arg4[%c25_131] : memref<54xf32, #tpu.memory_space<smem>>
    %490 = vector.broadcast %489 : f32 to vector<16x16xf32>
    %491 = arith.mulf %490, %476 : vector<16x16xf32>
    %492 = arith.addf %474, %491 : vector<16x16xf32>
    %c2_132 = arith.constant 2 : index
    %c2_133 = arith.constant 2 : index
    %c2_134 = arith.constant 2 : index
    %493 = vector.load %arg8[%c2_132, %c2_133, %c2_134] : memref<6x18x18xf32, #tpu.memory_space<vmem>>, vector<1x16x16xf32>
    %494 = vector.shape_cast %493 : vector<1x16x16xf32> to vector<16x16xf32>
    %c26 = arith.constant 26 : index
    %495 = memref.load %arg2[%c26] : memref<81xf32, #tpu.memory_space<smem>>
    %496 = vector.broadcast %495 : f32 to vector<16x16xf32>
    %497 = arith.mulf %496, %494 : vector<16x16xf32>
    %498 = arith.addf %480, %497 : vector<16x16xf32>
    %c53 = arith.constant 53 : index
    %499 = memref.load %arg2[%c53] : memref<81xf32, #tpu.memory_space<smem>>
    %500 = vector.broadcast %499 : f32 to vector<16x16xf32>
    %501 = arith.mulf %500, %494 : vector<16x16xf32>
    %502 = arith.addf %484, %501 : vector<16x16xf32>
    %c80 = arith.constant 80 : index
    %503 = memref.load %arg2[%c80] : memref<81xf32, #tpu.memory_space<smem>>
    %504 = vector.broadcast %503 : f32 to vector<16x16xf32>
    %505 = arith.mulf %504, %494 : vector<16x16xf32>
    %506 = arith.addf %488, %505 : vector<16x16xf32>
    %c26_135 = arith.constant 26 : index
    %507 = memref.load %arg4[%c26_135] : memref<54xf32, #tpu.memory_space<smem>>
    %508 = vector.broadcast %507 : f32 to vector<16x16xf32>
    %509 = arith.mulf %508, %494 : vector<16x16xf32>
    %510 = arith.addf %492, %509 : vector<16x16xf32>
    %c0_136 = arith.constant 0 : index
    %c0_137 = arith.constant 0 : index
    %c0_138 = arith.constant 0 : index
    %c0_139 = arith.constant 0 : index
    %511 = vector.load %arg6[%c0_136, %c0_137, %c0_138, %c0_139] : memref<1x3x16x16xf32, #tpu.memory_space<vmem>>, vector<1x1x16x16xf32>
    %512 = vector.shape_cast %511 : vector<1x1x16x16xf32> to vector<16x16xf32>
    %513 = vector.shape_cast %498 : vector<16x16xf32> to vector<1x1x16x16xf32>
    tpu.vector_store %arg6[%c0_136, %c0_137, %c0_138, %c0_139], %513 {strides = array<i32>} : memref<1x3x16x16xf32, #tpu.memory_space<vmem>>, vector<1x1x16x16xf32>,
    %c0_140 = arith.constant 0 : index
    %c1_141 = arith.constant 1 : index
    %c0_142 = arith.constant 0 : index
    %c0_143 = arith.constant 0 : index
    %514 = vector.load %arg6[%c0_140, %c1_141, %c0_142, %c0_143] : memref<1x3x16x16xf32, #tpu.memory_space<vmem>>, vector<1x1x16x16xf32>
    %515 = vector.shape_cast %514 : vector<1x1x16x16xf32> to vector<16x16xf32>
    %516 = vector.shape_cast %502 : vector<16x16xf32> to vector<1x1x16x16xf32>
    tpu.vector_store %arg6[%c0_140, %c1_141, %c0_142, %c0_143], %516 {strides = array<i32>} : memref<1x3x16x16xf32, #tpu.memory_space<vmem>>, vector<1x1x16x16xf32>,
    %c0_144 = arith.constant 0 : index
    %c2_145 = arith.constant 2 : index
    %c0_146 = arith.constant 0 : index
    %c0_147 = arith.constant 0 : index
    %517 = vector.load %arg6[%c0_144, %c2_145, %c0_146, %c0_147] : memref<1x3x16x16xf32, #tpu.memory_space<vmem>>, vector<1x1x16x16xf32>
    %518 = vector.shape_cast %517 : vector<1x1x16x16xf32> to vector<16x16xf32>
    %519 = vector.shape_cast %506 : vector<16x16xf32> to vector<1x1x16x16xf32>
    tpu.vector_store %arg6[%c0_144, %c2_145, %c0_146, %c0_147], %519 {strides = array<i32>} : memref<1x3x16x16xf32, #tpu.memory_space<vmem>>, vector<1x1x16x16xf32>,
    %520 = arith.maximumf %498, %502 : vector<16x16xf32>
    %521 = arith.maximumf %520, %506 : vector<16x16xf32>
    %522 = arith.subf %498, %521 : vector<16x16xf32>
    %523 = math.exp %522 : vector<16x16xf32>
    %524 = arith.subf %502, %521 : vector<16x16xf32>
    %525 = math.exp %524 : vector<16x16xf32>
    %526 = arith.subf %506, %521 : vector<16x16xf32>
    %527 = math.exp %526 : vector<16x16xf32>
    %528 = arith.addf %523, %525 : vector<16x16xf32>
    %529 = arith.addf %528, %527 : vector<16x16xf32>
    %cst_148 = arith.constant 1.000000e+00 : f32
    %530 = vector.broadcast %cst_148 : f32 to vector<16x16xf32>
    %531 = arith.divf %530, %529 : vector<16x16xf32>
    %532 = arith.mulf %523, %531 : vector<16x16xf32>
    %533 = arith.mulf %525, %531 : vector<16x16xf32>
    %534 = arith.mulf %527, %531 : vector<16x16xf32>
    %c3_149 = arith.constant 3 : index
    %c1_150 = arith.constant 1 : index
    %c1_151 = arith.constant 1 : index
    %535 = vector.load %arg8[%c3_149, %c1_150, %c1_151] : memref<6x18x18xf32, #tpu.memory_space<vmem>>, vector<1x16x16xf32>
    %536 = vector.shape_cast %535 : vector<1x16x16xf32> to vector<16x16xf32>
    %537 = vector.shape_cast %532 : vector<16x16xf32> to vector<1x16x16xf32>
    tpu.vector_store %arg8[%c3_149, %c1_150, %c1_151], %537 {strides = array<i32>} : memref<6x18x18xf32, #tpu.memory_space<vmem>>, vector<1x16x16xf32>,
    %c4_152 = arith.constant 4 : index
    %c1_153 = arith.constant 1 : index
    %c1_154 = arith.constant 1 : index
    %538 = vector.load %arg8[%c4_152, %c1_153, %c1_154] : memref<6x18x18xf32, #tpu.memory_space<vmem>>, vector<1x16x16xf32>
    %539 = vector.shape_cast %538 : vector<1x16x16xf32> to vector<16x16xf32>
    %540 = vector.shape_cast %533 : vector<16x16xf32> to vector<1x16x16xf32>
    tpu.vector_store %arg8[%c4_152, %c1_153, %c1_154], %540 {strides = array<i32>} : memref<6x18x18xf32, #tpu.memory_space<vmem>>, vector<1x16x16xf32>,
    %c5_155 = arith.constant 5 : index
    %c1_156 = arith.constant 1 : index
    %c1_157 = arith.constant 1 : index
    %541 = vector.load %arg8[%c5_155, %c1_156, %c1_157] : memref<6x18x18xf32, #tpu.memory_space<vmem>>, vector<1x16x16xf32>
    %542 = vector.shape_cast %541 : vector<1x16x16xf32> to vector<16x16xf32>
    %543 = vector.shape_cast %534 : vector<16x16xf32> to vector<1x16x16xf32>
    tpu.vector_store %arg8[%c5_155, %c1_156, %c1_157], %543 {strides = array<i32>} : memref<6x18x18xf32, #tpu.memory_space<vmem>>, vector<1x16x16xf32>,
    %cst_158 = arith.constant 0.000000e+00 : f32
    %544 = vector.broadcast %cst_158 : f32 to vector<16x16xf32>
    %cst_159 = arith.constant 0.000000e+00 : f32
    %545 = vector.broadcast %cst_159 : f32 to vector<16x16xf32>
    %c3_160 = arith.constant 3 : index
    %c0_161 = arith.constant 0 : index
    %c0_162 = arith.constant 0 : index
    %546 = vector.load %arg8[%c3_160, %c0_161, %c0_162] : memref<6x18x18xf32, #tpu.memory_space<vmem>>, vector<1x16x16xf32>
    %547 = vector.shape_cast %546 : vector<1x16x16xf32> to vector<16x16xf32>
    %c27_163 = arith.constant 27 : index
    %548 = memref.load %arg4[%c27_163] : memref<54xf32, #tpu.memory_space<smem>>
    %549 = vector.broadcast %548 : f32 to vector<16x16xf32>
    %550 = arith.mulf %549, %547 : vector<16x16xf32>
    %551 = arith.addf %544, %550 : vector<16x16xf32>
    %c3_164 = arith.constant 3 : index
    %c0_165 = arith.constant 0 : index
    %c1_166 = arith.constant 1 : index
    %552 = vector.load %arg8[%c3_164, %c0_165, %c1_166] : memref<6x18x18xf32, #tpu.memory_space<vmem>>, vector<1x16x16xf32>
    %553 = vector.shape_cast %552 : vector<1x16x16xf32> to vector<16x16xf32>
    %c28_167 = arith.constant 28 : index
    %554 = memref.load %arg4[%c28_167] : memref<54xf32, #tpu.memory_space<smem>>
    %555 = vector.broadcast %554 : f32 to vector<16x16xf32>
    %556 = arith.mulf %555, %553 : vector<16x16xf32>
    %557 = arith.addf %545, %556 : vector<16x16xf32>
    %c3_168 = arith.constant 3 : index
    %c0_169 = arith.constant 0 : index
    %c2_170 = arith.constant 2 : index
    %558 = vector.load %arg8[%c3_168, %c0_169, %c2_170] : memref<6x18x18xf32, #tpu.memory_space<vmem>>, vector<1x16x16xf32>
    %559 = vector.shape_cast %558 : vector<1x16x16xf32> to vector<16x16xf32>
    %c29_171 = arith.constant 29 : index
    %560 = memref.load %arg4[%c29_171] : memref<54xf32, #tpu.memory_space<smem>>
    %561 = vector.broadcast %560 : f32 to vector<16x16xf32>
    %562 = arith.mulf %561, %559 : vector<16x16xf32>
    %563 = arith.addf %551, %562 : vector<16x16xf32>
    %c3_172 = arith.constant 3 : index
    %c1_173 = arith.constant 1 : index
    %c0_174 = arith.constant 0 : index
    %564 = vector.load %arg8[%c3_172, %c1_173, %c0_174] : memref<6x18x18xf32, #tpu.memory_space<vmem>>, vector<1x16x16xf32>
    %565 = vector.shape_cast %564 : vector<1x16x16xf32> to vector<16x16xf32>
    %c30_175 = arith.constant 30 : index
    %566 = memref.load %arg4[%c30_175] : memref<54xf32, #tpu.memory_space<smem>>
    %567 = vector.broadcast %566 : f32 to vector<16x16xf32>
    %568 = arith.mulf %567, %565 : vector<16x16xf32>
    %569 = arith.addf %557, %568 : vector<16x16xf32>
    %c3_176 = arith.constant 3 : index
    %c1_177 = arith.constant 1 : index
    %c1_178 = arith.constant 1 : index
    %570 = vector.load %arg8[%c3_176, %c1_177, %c1_178] : memref<6x18x18xf32, #tpu.memory_space<vmem>>, vector<1x16x16xf32>
    %571 = vector.shape_cast %570 : vector<1x16x16xf32> to vector<16x16xf32>
    %c31_179 = arith.constant 31 : index
    %572 = memref.load %arg4[%c31_179] : memref<54xf32, #tpu.memory_space<smem>>
    %573 = vector.broadcast %572 : f32 to vector<16x16xf32>
    %574 = arith.mulf %573, %571 : vector<16x16xf32>
    %575 = arith.addf %563, %574 : vector<16x16xf32>
    %c3_180 = arith.constant 3 : index
    %c1_181 = arith.constant 1 : index
    %c2_182 = arith.constant 2 : index
    %576 = vector.load %arg8[%c3_180, %c1_181, %c2_182] : memref<6x18x18xf32, #tpu.memory_space<vmem>>, vector<1x16x16xf32>
    %577 = vector.shape_cast %576 : vector<1x16x16xf32> to vector<16x16xf32>
    %c32_183 = arith.constant 32 : index
    %578 = memref.load %arg4[%c32_183] : memref<54xf32, #tpu.memory_space<smem>>
    %579 = vector.broadcast %578 : f32 to vector<16x16xf32>
    %580 = arith.mulf %579, %577 : vector<16x16xf32>
    %581 = arith.addf %569, %580 : vector<16x16xf32>
    %c3_184 = arith.constant 3 : index
    %c2_185 = arith.constant 2 : index
    %c0_186 = arith.constant 0 : index
    %582 = vector.load %arg8[%c3_184, %c2_185, %c0_186] : memref<6x18x18xf32, #tpu.memory_space<vmem>>, vector<1x16x16xf32>
    %583 = vector.shape_cast %582 : vector<1x16x16xf32> to vector<16x16xf32>
    %c33_187 = arith.constant 33 : index
    %584 = memref.load %arg4[%c33_187] : memref<54xf32, #tpu.memory_space<smem>>
    %585 = vector.broadcast %584 : f32 to vector<16x16xf32>
    %586 = arith.mulf %585, %583 : vector<16x16xf32>
    %587 = arith.addf %575, %586 : vector<16x16xf32>
    %c3_188 = arith.constant 3 : index
    %c2_189 = arith.constant 2 : index
    %c1_190 = arith.constant 1 : index
    %588 = vector.load %arg8[%c3_188, %c2_189, %c1_190] : memref<6x18x18xf32, #tpu.memory_space<vmem>>, vector<1x16x16xf32>
    %589 = vector.shape_cast %588 : vector<1x16x16xf32> to vector<16x16xf32>
    %c34_191 = arith.constant 34 : index
    %590 = memref.load %arg4[%c34_191] : memref<54xf32, #tpu.memory_space<smem>>
    %591 = vector.broadcast %590 : f32 to vector<16x16xf32>
    %592 = arith.mulf %591, %589 : vector<16x16xf32>
    %593 = arith.addf %581, %592 : vector<16x16xf32>
    %c3_192 = arith.constant 3 : index
    %c2_193 = arith.constant 2 : index
    %c2_194 = arith.constant 2 : index
    %594 = vector.load %arg8[%c3_192, %c2_193, %c2_194] : memref<6x18x18xf32, #tpu.memory_space<vmem>>, vector<1x16x16xf32>
    %595 = vector.shape_cast %594 : vector<1x16x16xf32> to vector<16x16xf32>
    %c35_195 = arith.constant 35 : index
    %596 = memref.load %arg4[%c35_195] : memref<54xf32, #tpu.memory_space<smem>>
    %597 = vector.broadcast %596 : f32 to vector<16x16xf32>
    %598 = arith.mulf %597, %595 : vector<16x16xf32>
    %599 = arith.addf %587, %598 : vector<16x16xf32>
    %c4_196 = arith.constant 4 : index
    %c0_197 = arith.constant 0 : index
    %c0_198 = arith.constant 0 : index
    %600 = vector.load %arg8[%c4_196, %c0_197, %c0_198] : memref<6x18x18xf32, #tpu.memory_space<vmem>>, vector<1x16x16xf32>
    %601 = vector.shape_cast %600 : vector<1x16x16xf32> to vector<16x16xf32>
    %c36_199 = arith.constant 36 : index
    %602 = memref.load %arg4[%c36_199] : memref<54xf32, #tpu.memory_space<smem>>
    %603 = vector.broadcast %602 : f32 to vector<16x16xf32>
    %604 = arith.mulf %603, %601 : vector<16x16xf32>
    %605 = arith.addf %593, %604 : vector<16x16xf32>
    %c4_200 = arith.constant 4 : index
    %c0_201 = arith.constant 0 : index
    %c1_202 = arith.constant 1 : index
    %606 = vector.load %arg8[%c4_200, %c0_201, %c1_202] : memref<6x18x18xf32, #tpu.memory_space<vmem>>, vector<1x16x16xf32>
    %607 = vector.shape_cast %606 : vector<1x16x16xf32> to vector<16x16xf32>
    %c37_203 = arith.constant 37 : index
    %608 = memref.load %arg4[%c37_203] : memref<54xf32, #tpu.memory_space<smem>>
    %609 = vector.broadcast %608 : f32 to vector<16x16xf32>
    %610 = arith.mulf %609, %607 : vector<16x16xf32>
    %611 = arith.addf %599, %610 : vector<16x16xf32>
    %c4_204 = arith.constant 4 : index
    %c0_205 = arith.constant 0 : index
    %c2_206 = arith.constant 2 : index
    %612 = vector.load %arg8[%c4_204, %c0_205, %c2_206] : memref<6x18x18xf32, #tpu.memory_space<vmem>>, vector<1x16x16xf32>
    %613 = vector.shape_cast %612 : vector<1x16x16xf32> to vector<16x16xf32>
    %c38_207 = arith.constant 38 : index
    %614 = memref.load %arg4[%c38_207] : memref<54xf32, #tpu.memory_space<smem>>
    %615 = vector.broadcast %614 : f32 to vector<16x16xf32>
    %616 = arith.mulf %615, %613 : vector<16x16xf32>
    %617 = arith.addf %605, %616 : vector<16x16xf32>
    %c4_208 = arith.constant 4 : index
    %c1_209 = arith.constant 1 : index
    %c0_210 = arith.constant 0 : index
    %618 = vector.load %arg8[%c4_208, %c1_209, %c0_210] : memref<6x18x18xf32, #tpu.memory_space<vmem>>, vector<1x16x16xf32>
    %619 = vector.shape_cast %618 : vector<1x16x16xf32> to vector<16x16xf32>
    %c39_211 = arith.constant 39 : index
    %620 = memref.load %arg4[%c39_211] : memref<54xf32, #tpu.memory_space<smem>>
    %621 = vector.broadcast %620 : f32 to vector<16x16xf32>
    %622 = arith.mulf %621, %619 : vector<16x16xf32>
    %623 = arith.addf %611, %622 : vector<16x16xf32>
    %c4_212 = arith.constant 4 : index
    %c1_213 = arith.constant 1 : index
    %c1_214 = arith.constant 1 : index
    %624 = vector.load %arg8[%c4_212, %c1_213, %c1_214] : memref<6x18x18xf32, #tpu.memory_space<vmem>>, vector<1x16x16xf32>
    %625 = vector.shape_cast %624 : vector<1x16x16xf32> to vector<16x16xf32>
    %c40_215 = arith.constant 40 : index
    %626 = memref.load %arg4[%c40_215] : memref<54xf32, #tpu.memory_space<smem>>
    %627 = vector.broadcast %626 : f32 to vector<16x16xf32>
    %628 = arith.mulf %627, %625 : vector<16x16xf32>
    %629 = arith.addf %617, %628 : vector<16x16xf32>
    %c4_216 = arith.constant 4 : index
    %c1_217 = arith.constant 1 : index
    %c2_218 = arith.constant 2 : index
    %630 = vector.load %arg8[%c4_216, %c1_217, %c2_218] : memref<6x18x18xf32, #tpu.memory_space<vmem>>, vector<1x16x16xf32>
    %631 = vector.shape_cast %630 : vector<1x16x16xf32> to vector<16x16xf32>
    %c41_219 = arith.constant 41 : index
    %632 = memref.load %arg4[%c41_219] : memref<54xf32, #tpu.memory_space<smem>>
    %633 = vector.broadcast %632 : f32 to vector<16x16xf32>
    %634 = arith.mulf %633, %631 : vector<16x16xf32>
    %635 = arith.addf %623, %634 : vector<16x16xf32>
    %c4_220 = arith.constant 4 : index
    %c2_221 = arith.constant 2 : index
    %c0_222 = arith.constant 0 : index
    %636 = vector.load %arg8[%c4_220, %c2_221, %c0_222] : memref<6x18x18xf32, #tpu.memory_space<vmem>>, vector<1x16x16xf32>
    %637 = vector.shape_cast %636 : vector<1x16x16xf32> to vector<16x16xf32>
    %c42_223 = arith.constant 42 : index
    %638 = memref.load %arg4[%c42_223] : memref<54xf32, #tpu.memory_space<smem>>
    %639 = vector.broadcast %638 : f32 to vector<16x16xf32>
    %640 = arith.mulf %639, %637 : vector<16x16xf32>
    %641 = arith.addf %629, %640 : vector<16x16xf32>
    %c4_224 = arith.constant 4 : index
    %c2_225 = arith.constant 2 : index
    %c1_226 = arith.constant 1 : index
    %642 = vector.load %arg8[%c4_224, %c2_225, %c1_226] : memref<6x18x18xf32, #tpu.memory_space<vmem>>, vector<1x16x16xf32>
    %643 = vector.shape_cast %642 : vector<1x16x16xf32> to vector<16x16xf32>
    %c43_227 = arith.constant 43 : index
    %644 = memref.load %arg4[%c43_227] : memref<54xf32, #tpu.memory_space<smem>>
    %645 = vector.broadcast %644 : f32 to vector<16x16xf32>
    %646 = arith.mulf %645, %643 : vector<16x16xf32>
    %647 = arith.addf %635, %646 : vector<16x16xf32>
    %c4_228 = arith.constant 4 : index
    %c2_229 = arith.constant 2 : index
    %c2_230 = arith.constant 2 : index
    %648 = vector.load %arg8[%c4_228, %c2_229, %c2_230] : memref<6x18x18xf32, #tpu.memory_space<vmem>>, vector<1x16x16xf32>
    %649 = vector.shape_cast %648 : vector<1x16x16xf32> to vector<16x16xf32>
    %c44_231 = arith.constant 44 : index
    %650 = memref.load %arg4[%c44_231] : memref<54xf32, #tpu.memory_space<smem>>
    %651 = vector.broadcast %650 : f32 to vector<16x16xf32>
    %652 = arith.mulf %651, %649 : vector<16x16xf32>
    %653 = arith.addf %641, %652 : vector<16x16xf32>
    %c5_232 = arith.constant 5 : index
    %c0_233 = arith.constant 0 : index
    %c0_234 = arith.constant 0 : index
    %654 = vector.load %arg8[%c5_232, %c0_233, %c0_234] : memref<6x18x18xf32, #tpu.memory_space<vmem>>, vector<1x16x16xf32>
    %655 = vector.shape_cast %654 : vector<1x16x16xf32> to vector<16x16xf32>
    %c45_235 = arith.constant 45 : index
    %656 = memref.load %arg4[%c45_235] : memref<54xf32, #tpu.memory_space<smem>>
    %657 = vector.broadcast %656 : f32 to vector<16x16xf32>
    %658 = arith.mulf %657, %655 : vector<16x16xf32>
    %659 = arith.addf %647, %658 : vector<16x16xf32>
    %c5_236 = arith.constant 5 : index
    %c0_237 = arith.constant 0 : index
    %c1_238 = arith.constant 1 : index
    %660 = vector.load %arg8[%c5_236, %c0_237, %c1_238] : memref<6x18x18xf32, #tpu.memory_space<vmem>>, vector<1x16x16xf32>
    %661 = vector.shape_cast %660 : vector<1x16x16xf32> to vector<16x16xf32>
    %c46_239 = arith.constant 46 : index
    %662 = memref.load %arg4[%c46_239] : memref<54xf32, #tpu.memory_space<smem>>
    %663 = vector.broadcast %662 : f32 to vector<16x16xf32>
    %664 = arith.mulf %663, %661 : vector<16x16xf32>
    %665 = arith.addf %653, %664 : vector<16x16xf32>
    %c5_240 = arith.constant 5 : index
    %c0_241 = arith.constant 0 : index
    %c2_242 = arith.constant 2 : index
    %666 = vector.load %arg8[%c5_240, %c0_241, %c2_242] : memref<6x18x18xf32, #tpu.memory_space<vmem>>, vector<1x16x16xf32>
    %667 = vector.shape_cast %666 : vector<1x16x16xf32> to vector<16x16xf32>
    %c47_243 = arith.constant 47 : index
    %668 = memref.load %arg4[%c47_243] : memref<54xf32, #tpu.memory_space<smem>>
    %669 = vector.broadcast %668 : f32 to vector<16x16xf32>
    %670 = arith.mulf %669, %667 : vector<16x16xf32>
    %671 = arith.addf %659, %670 : vector<16x16xf32>
    %c5_244 = arith.constant 5 : index
    %c1_245 = arith.constant 1 : index
    %c0_246 = arith.constant 0 : index
    %672 = vector.load %arg8[%c5_244, %c1_245, %c0_246] : memref<6x18x18xf32, #tpu.memory_space<vmem>>, vector<1x16x16xf32>
    %673 = vector.shape_cast %672 : vector<1x16x16xf32> to vector<16x16xf32>
    %c48_247 = arith.constant 48 : index
    %674 = memref.load %arg4[%c48_247] : memref<54xf32, #tpu.memory_space<smem>>
    %675 = vector.broadcast %674 : f32 to vector<16x16xf32>
    %676 = arith.mulf %675, %673 : vector<16x16xf32>
    %677 = arith.addf %665, %676 : vector<16x16xf32>
    %c5_248 = arith.constant 5 : index
    %c1_249 = arith.constant 1 : index
    %c1_250 = arith.constant 1 : index
    %678 = vector.load %arg8[%c5_248, %c1_249, %c1_250] : memref<6x18x18xf32, #tpu.memory_space<vmem>>, vector<1x16x16xf32>
    %679 = vector.shape_cast %678 : vector<1x16x16xf32> to vector<16x16xf32>
    %c49_251 = arith.constant 49 : index
    %680 = memref.load %arg4[%c49_251] : memref<54xf32, #tpu.memory_space<smem>>
    %681 = vector.broadcast %680 : f32 to vector<16x16xf32>
    %682 = arith.mulf %681, %679 : vector<16x16xf32>
    %683 = arith.addf %671, %682 : vector<16x16xf32>
    %c5_252 = arith.constant 5 : index
    %c1_253 = arith.constant 1 : index
    %c2_254 = arith.constant 2 : index
    %684 = vector.load %arg8[%c5_252, %c1_253, %c2_254] : memref<6x18x18xf32, #tpu.memory_space<vmem>>, vector<1x16x16xf32>
    %685 = vector.shape_cast %684 : vector<1x16x16xf32> to vector<16x16xf32>
    %c50_255 = arith.constant 50 : index
    %686 = memref.load %arg4[%c50_255] : memref<54xf32, #tpu.memory_space<smem>>
    %687 = vector.broadcast %686 : f32 to vector<16x16xf32>
    %688 = arith.mulf %687, %685 : vector<16x16xf32>
    %689 = arith.addf %677, %688 : vector<16x16xf32>
    %c5_256 = arith.constant 5 : index
    %c2_257 = arith.constant 2 : index
    %c0_258 = arith.constant 0 : index
    %690 = vector.load %arg8[%c5_256, %c2_257, %c0_258] : memref<6x18x18xf32, #tpu.memory_space<vmem>>, vector<1x16x16xf32>
    %691 = vector.shape_cast %690 : vector<1x16x16xf32> to vector<16x16xf32>
    %c51_259 = arith.constant 51 : index
    %692 = memref.load %arg4[%c51_259] : memref<54xf32, #tpu.memory_space<smem>>
    %693 = vector.broadcast %692 : f32 to vector<16x16xf32>
    %694 = arith.mulf %693, %691 : vector<16x16xf32>
    %695 = arith.addf %683, %694 : vector<16x16xf32>
    %c5_260 = arith.constant 5 : index
    %c2_261 = arith.constant 2 : index
    %c1_262 = arith.constant 1 : index
    %696 = vector.load %arg8[%c5_260, %c2_261, %c1_262] : memref<6x18x18xf32, #tpu.memory_space<vmem>>, vector<1x16x16xf32>
    %697 = vector.shape_cast %696 : vector<1x16x16xf32> to vector<16x16xf32>
    %c52_263 = arith.constant 52 : index
    %698 = memref.load %arg4[%c52_263] : memref<54xf32, #tpu.memory_space<smem>>
    %699 = vector.broadcast %698 : f32 to vector<16x16xf32>
    %700 = arith.mulf %699, %697 : vector<16x16xf32>
    %701 = arith.addf %689, %700 : vector<16x16xf32>
    %c5_264 = arith.constant 5 : index
    %c2_265 = arith.constant 2 : index
    %c2_266 = arith.constant 2 : index
    %702 = vector.load %arg8[%c5_264, %c2_265, %c2_266] : memref<6x18x18xf32, #tpu.memory_space<vmem>>, vector<1x16x16xf32>
    %703 = vector.shape_cast %702 : vector<1x16x16xf32> to vector<16x16xf32>
    %c53_267 = arith.constant 53 : index
    %704 = memref.load %arg4[%c53_267] : memref<54xf32, #tpu.memory_space<smem>>
    %705 = vector.broadcast %704 : f32 to vector<16x16xf32>
    %706 = arith.mulf %705, %703 : vector<16x16xf32>
    %707 = arith.addf %695, %706 : vector<16x16xf32>
    %708 = arith.addf %510, %707 : vector<16x16xf32>
    %709 = arith.addf %708, %701 : vector<16x16xf32>
    %710 = arith.mulf %534, %709 : vector<16x16xf32>
    %711 = arith.addf %533, %710 : vector<16x16xf32>
    %c0_268 = arith.constant 0 : index
    %c0_269 = arith.constant 0 : index
    %c0_270 = arith.constant 0 : index
    %c0_271 = arith.constant 0 : index
    %712 = vector.load %arg7[%c0_268, %c0_269, %c0_270, %c0_271] : memref<1x1x16x16xf32, #tpu.memory_space<vmem>>, vector<1x1x16x16xf32>
    %713 = vector.shape_cast %712 : vector<1x1x16x16xf32> to vector<16x16xf32>
    %714 = vector.shape_cast %711 : vector<16x16xf32> to vector<1x1x16x16xf32>
    tpu.vector_store %arg7[%c0_268, %c0_269, %c0_270, %c0_271], %714 {strides = array<i32>} : memref<1x1x16x16xf32, #tpu.memory_space<vmem>>, vector<1x1x16x16xf32>,
    return
  }
  func.func @transform_0(%arg0: i32) -> (i32, i32, i32, i32) {
    %c0_i32 = arith.constant 0 : i32
    %c0_i32_0 = arith.constant 0 : i32
    %c0_i32_1 = arith.constant 0 : i32
    %c0_i32_2 = arith.constant 0 : i32
    return %arg0, %c0_i32, %c0_i32_0, %c0_i32_1 : i32, i32, i32, i32
  }
  func.func @transform_1(%arg0: i32) -> i32 {
    %c0_i32 = arith.constant 0 : i32
    %c0_i32_0 = arith.constant 0 : i32
    return %c0_i32 : i32
  }
  func.func @transform_2(%arg0: i32) -> i32 {
    %c0_i32 = arith.constant 0 : i32
    %c0_i32_0 = arith.constant 0 : i32
    return %c0_i32 : i32
  }
  func.func @transform_3(%arg0: i32) -> i32 {
    %c0_i32 = arith.constant 0 : i32
    %c0_i32_0 = arith.constant 0 : i32
    return %c0_i32 : i32
  }
  func.func @transform_4(%arg0: i32) -> i32 {
    %c0_i32 = arith.constant 0 : i32
    %c0_i32_0 = arith.constant 0 : i32
    return %c0_i32 : i32
  }
  func.func @transform_5(%arg0: i32) -> (i32, i32, i32, i32) {
    %c0_i32 = arith.constant 0 : i32
    %c0_i32_0 = arith.constant 0 : i32
    %c0_i32_1 = arith.constant 0 : i32
    %c0_i32_2 = arith.constant 0 : i32
    return %arg0, %c0_i32, %c0_i32_0, %c0_i32_1 : i32, i32, i32, i32
  }
  func.func @transform_6(%arg0: i32) -> (i32, i32, i32, i32) {
    %c0_i32 = arith.constant 0 : i32
    %c0_i32_0 = arith.constant 0 : i32
    %c0_i32_1 = arith.constant 0 : i32
    %c0_i32_2 = arith.constant 0 : i32
    return %arg0, %c0_i32, %c0_i32_0, %c0_i32_1 : i32, i32, i32, i32
  }
}

</mosaic_0001>

<bundles_post_ra>
// kernel: tpu_custom_call.1
= control target key start
LH: loop header
LB: loop body
LE: loop exit
PB: predicated region body
PF: predicated region fallthrough
CT: control target
= control target key end

     0   :  { %s3879_s0 = inlined_call_operand.hbm [shape: f32[2,3,16,16], index: 0, kind: input, shape index: {}]   ;;  %s3880_s1 = inlined_call_operand.vmem [shape: f32[81], index: 1, kind: input, shape index: {}]   ;;  %s3881_s2 = inlined_call_operand.vmem [shape: f32[3], index: 2, kind: input, shape index: {}]   ;;  %s3882_s3 = inlined_call_operand.vmem [shape: f32[54], index: 3, kind: input, shape index: {}]   ;;  %s3883_s4 = inlined_call_operand.<no memory space> [shape: f32[1], index: 4, kind: input, shape index: {}]   ;;  %s3884_s5 = inlined_call_operand.hbm [shape: f32[2,3,16,16], index: 5, kind: output, shape index: {0}]   ;;  %s3885_s6 = inlined_call_operand.hbm [shape: f32[2,1,16,16], index: 6, kind: output, shape index: {1}]  }
   0x1   :  { %12 = sst [smem:[#allocation3]] %s3883_s4 }
   0x2   :  { %13 = vsyncpa [#allocation5], 0 }
   0x3   :  { %15 = vsyncpa [#allocation5 + $0x1], 0 }
   0x4   :  { %16 = vsyncpa [#allocation7], 0 }
   0x5   :  { %17 = vsyncpa [#allocation10], 0 }
   0x6   :  { %18 = vsyncpa [#allocation6], 0 }
   0x7   :  { %20 = vsyncpa [#allocation6 + $0x1], 0 }
   0x8   :  { %21 = vsyncpa [#allocation14], 0 }
   0x9   :  { %23 = vsyncpa [#allocation14 + $0x1], 0  ;;  %s2734_s23 = smov 0   ;;  %s2736_s24 = smov 0  }
   0xa   :  { %s2738_s25 = smov 0   ;;  %s2740_s26 = smov 0  }
   0xb LB: > { %s2755_s4 = sadd.s32 4294967295, %s2680_s26   ;;  %s2215_s27 = sadd.s32 4294967294, %s2680_s26   ;;  %s2680_s26 = sphi %s2740_s26, %s3909_s26   ;;  %s2676_s25 = sphi %s2738_s25, %s3908_s25   ;;  %s2672_s24 = sphi %s2736_s24, %s3907_s24   ;;  %s2668_s23 = sphi %s2734_s23, %s3906_s23  }
   0xc   : > { %p49_p0 = scmp.ne.s32.totalorder %s2672_s24, %s2668_s23  ;;  %p3886_p1 = scmp.eq.s32.totalorder %s2755_s4, 0 }
   0xd   : > { %p163_p3 = scmp.eq.s32.totalorder %s2215_s27, 1  ;;  %p2216_p5 = scmp.ge.s32.totalorder %s2680_s26, 1 }
   0xe   : > { %p2764_p4 = por %p3886_p1, %p49_p0  ;;  %p196_p7 = scmp.lt.s32.totalorder %s2680_s26, 3 }
   0xf   : > { %p2769_p6 = por %p163_p3, %p49_p0  ;;  %s220_s8 = sshll.u32 %s3881_s2, 4  ;;  %s221_s8 = int_to_ptr.vmem [resolvable:$true] %s220_s8 }
  0x10   : > { %s3890_s28 = scalar_select %p2764_p4, 1, 0 }
  0x11   : > { %s3891_s29 = scalar_select %p2769_p6, 1, 0 }
  0x12   : > { %p2777_p8 = pnand %p2216_p5, %p196_p7  ;;  %s209_s12 = sshll.u32 %s3880_s1, 4  ;;  %s210_s12 = int_to_ptr.vmem [resolvable:$true] %s209_s12 }
  0x13   : > { %s231_s16 = sshll.u32 %s3882_s3, 4  ;;  %s2505_s17 = scalar_lea.vmem %s221_s8, 16  ;;  %s2796_s16 = int_to_ptr.vmem [resolvable:$true] %s231_s16 }
  0x14   : > { %s3892_s9 = scalar_select %p2777_p8, 1, 0 }
  0x15   : > { %p2399_p10 = pneg %p2777_p8  ;;  %p2506_p12 = scmp.ne.s32.totalorder %s221_s8, %s2505_s17 }
  0x16   : > { %p2513_p5 = scmp.lt.s32.totalorder %s221_s8, %s221_s8  ;;  %p2514_p7 = scmp.lt.s32.totalorder %s2505_s17, %s2505_s17 }
  0x17   : > { %p2789_p11 = pnand %p2399_p10, %p3886_p1 }
  0x18   : > { %p2515_p10 = por %p2514_p7, %p2513_p5 }
  0x19   : > { %p2507_p13 = pneg %p2789_p11 }
  0x1b   : > { %p2508_p0 = pnand %p2507_p13, %p2506_p12 }
  0x1d   : > { %p2509_p3 = pneg %p2508_p0 }
  0x1f   : > { %p2516_p9 = pnand %p2515_p10, %p2509_p3 }
  0x21   : > { %2519 = shalt.err (!%p2516_p9)
}
  0x22   : > { %s2682_s18 = smov [#allocation9]   ;;  %s2520_s19 = scalar_lea.vmem %s210_s12, 16 }
  0x23   : > { %2405 = dma.vmem_to_smem (!%p2789_p11), %s221_s8, 16, %s2682_s18, [#allocation10]  }
  0x24   : > { %p2521_p1 = scmp.ne.s32.totalorder %s210_s12, %s2520_s19  ;;  %p2528_p4 = scmp.lt.s32.totalorder %s210_s12, %s210_s12 }
  0x25   : > { %p2529_p8 = scmp.lt.s32.totalorder %s2520_s19, %s2520_s19 }
  0x26   : > { %p2523_p2 = pnand %p2521_p1, %p2507_p13 }
  0x27   : > { %p2530_p12 = por %p2529_p8, %p2528_p4 }
  0x28   : > { %p2524_p6 = pneg %p2523_p2 }
  0x2a   : > { %p2531_p0 = pnand %p2530_p12, %p2524_p6 }
  0x2c   : > { %2534 = shalt.err (!%p2531_p0)
}
  0x2d   : > { %s2683_s20 = smov [#allocation8]   ;;  %s2535_s21 = scalar_lea.vmem %s2796_s16, 16 }
  0x2e   : > { %2402 = dma.vmem_to_smem (!%p2789_p11), %s210_s12, 16, %s2683_s20, [#allocation7]  }
  0x2f   : > { %p2536_p9 = scmp.ne.s32.totalorder %s2796_s16, %s2535_s21  ;;  %p2543_p2 = scmp.lt.s32.totalorder %s2796_s16, %s2796_s16 }
  0x30   : > { %p2544_p5 = scmp.lt.s32.totalorder %s2535_s21, %s2535_s21 }
  0x31   : > { %p2538_p3 = pnand %p2536_p9, %p2507_p13 }
  0x32   : > { %p2545_p4 = por %p2544_p5, %p2543_p2 }
  0x33   : > { %p2539_p1 = pneg %p2538_p3 }
  0x35   : > { %p2546_p6 = pnand %p2545_p4, %p2539_p1 }
  0x37   : > { %2549 = shalt.err (!%p2546_p6)
}
  0x38   : > { %s2684_s22 = smov [#allocation11]   ;;  %s2821_s27 = sadd.s32 1, %s2680_s26  }
  0x39   : > { %2408 = dma.vmem_to_smem (!%p2789_p11), %s2796_s16, 16, %s2684_s22, [#allocation10]  }
  0x3a   : > { %s33_s30 = ssub.s32 %s2680_s26, %s2821_s27  ;;  %s36_s7 = sadd.s32 1, %s2676_s25 }
  0x3b   : > { %p34_p8 = scmp.eq.s32.totalorder %s33_s30, 0  ;;  %p43_p13 = scmp.ne.s32.totalorder %s2676_s25, %s2672_s24 }
  0x3c   : > { %p44_p7 = scmp.eq.s32.totalorder %s2680_s26, 0  ;;  %p2423_p10 = scmp.lt.s32.totalorder %s2680_s26, 2 }
  0x3d   : > { %s2831_s8 = scalar_select %p34_p8, %s2676_s25, %s36_s7  }
  0x3e   : > { %p45_p12 = por %p44_p7, %p43_p13  ;;  %p3894_p0 = scmp.eq.s32.totalorder %s2755_s4, 1 }
  0x3f   : > { %s245_s11 = sand.u32 1, %s2676_s25   ;;  %s2378_s12 = smul.u32 768, %s2680_s26 }
  0x40   : > { %p2835_p9 = por %p3894_p0, %p43_p13  ;;  %s2377_s13 = smul.u32 48, %s245_s11 }
  0x41   : > { %s2844_s16 = scalar_lea.hbm %s3879_s0, %s2378_s12  ;;  %p2846_p11 = pnand %p2423_p10, %p45_p12 }
  0x42   : > { %s3895_s10 = scalar_select %p2835_p9, 1, 0 }
  0x43   : > { %s249_s18 = scalar_lea.vmem [#allocation4], %s2377_s13  ;;  %s2852_s20 = scalar_lea.sflag [#allocation5], %s245_s11 }
  0x44   : > { %s256_s19 = sshll.u32 %s249_s18, 4  ;;  %s2550_s21 = scalar_lea.hbm %s2844_s16, 768  ;;  %s2850_s19 = int_to_ptr.vmem [resolvable:$true] %s256_s19 }
  0x45   : > { %p2551_p3 = scmp.ne.s32.totalorder %s2844_s16, %s2550_s21  ;;  %p2552_p1 = pneg %p2846_p11 }
  0x46   : > { %s2555_s7 = scalar_lea.hbm %s3879_s0, 1536  ;;  %p2556_p4 = scmp.lt.s32.totalorder %s2844_s16, %s3879_s0 }
  0x47   : > { %p2553_p2 = pnand %p2552_p1, %p2551_p3  ;;  %p2557_p6 = scmp.lt.s32.totalorder %s2555_s7, %s2550_s21 }
  0x49   : > { %p2554_p5 = pneg %p2553_p2  ;;  %p2558_p8 = por %p2557_p6, %p2556_p4 }
  0x4b   : > { %p2559_p13 = pnand %p2558_p8, %p2554_p5 }
  0x4d   : > { %2562 = shalt.err (!%p2559_p13)
}
  0x4e   : > { %s2563_s11 = scalar_lea.vmem %s2850_s19, 768  ;;  %s2685_s13 = smov [#allocation4]  }
  0x4f   : > { %p2564_p7 = scmp.ne.s32.totalorder %s2850_s19, %s2563_s11  ;;  %s2568_s15 = sshll.u32 %s2685_s13, 4  ;;  %s2569_s15 = int_to_ptr.vmem [resolvable:$false] %s2568_s15 }
  0x50   : > { %s2570_s18 = scalar_lea.vmem %s2569_s15, 1536  ;;  %p2571_p0 = scmp.lt.s32.totalorder %s2850_s19, %s2569_s15 }
  0x51   : > { %p2566_p10 = pnand %p2564_p7, %p2552_p1  ;;  %p2572_p3 = scmp.lt.s32.totalorder %s2570_s18, %s2563_s11 }
  0x53   : > { %p2567_p12 = pneg %p2566_p10  ;;  %p2573_p2 = por %p2572_p3, %p2571_p0 }
  0x55   : > { %p2574_p9 = pnand %p2573_p2, %p2567_p12 }
  0x57   : > { %2577 = shalt.err (!%p2574_p9)
}
  0x58   : > { %s2686_s21 = smov 128   ;;  %s2687_s22 = smov 8  }
  0x59   : > { %2412 = dma.hbm_to_vmem [thread:$0]  (!%p2846_p11), %s2844_s16, 768, %s2850_s19, %s2852_s20, %s2686_s21, %s2686_s21, %s2687_s22  }
  0x5a   : > { %p3897_p1 = scmp.ne.s32.totalorder %s3892_s9, 0 }
  0x5b   : > { %s2876_s30 = sand.u32 (!%p3897_p1), 1, %s2672_s24   ;;  %p3898_p9 = scmp.ne.s32.totalorder (!%p3897_p1), %s3890_s28, 0 }
  0x5c   : > { %268 = sbr.rel (%p3897_p1) target bundleno = 1024 (0x400), region = 40  ;;  %s271_s12 = scalar_lea.sflag (!%p3897_p1), [#allocation5], %s2876_s30 }
  0x5d   : > { %s2379_s7 = smul.u32 (!%p3897_p1), 48, %s2876_s30 }
  0x5f   : > { %s2882_s14 = scalar_lea.vmem (!%p3897_p1), [#allocation4], %s2379_s7 }
  0x61   : > { %2647 = dma.done.wait (%p3898_p9), %s271_s12, 768  }
  0x62   : > { %2649 = vsyncadd (%p3898_p9), %s271_s12, 4294966528  ;;  %p3899_p11 = scmp.eq.s32.totalorder %s2755_s4, 0 }
  0x64   : > { %2651 = dma.done.wait (%p3899_p11), [#allocation7], 16   ;;  %p3900_p5 = pmov %p3899_p11 }
  0x66   : > { %2653 = vsyncadd (%p3900_p5), [#allocation7], 4294967280  ;;  %p3901_p4 = pmov %p3900_p5 }
  0x68   : > { %2655 = dma.done.wait (%p3901_p4), [#allocation10], 32   ;;  %p3902_p6 = pmov %p3901_p4 }
  0x6a   : > { %2657 = vsyncadd (%p3902_p6), [#allocation10], 4294967264 }
  0x6b   : > { %291 = sfence }
  0x6c   : > { %v341_v0 = vld [vmem:[%s2882_s14] sm:$0xff]  ;;  %v2227_v1 = vld [vmem:[%s2882_s14 + $0x10] sm:$0xff]  ;;  %vm321_vm0 = vcmask 146432   ;;  %s2688_s28 = smov 1   ;;  %vm324_vm1 = vcmask 140288   ;;  %v342_v2 = vld [vmem:[%s2882_s14 + $0x8] sm:$0xff] }
  0x6d   : > { %345 = vrot.lane.b32.xlu0 %v341_v0, %s2688_s28  ;;  %359 = vrot.lane.b32.xlu1 %v2227_v1, %s2688_s28  ;;  %v2228_v3 = vld [vmem:[%s2882_s14 + $0x18] sm:$0xff]  ;;  %v2689_v4 = vmov 0.0   ;;  %v2229_v5 = vld [vmem:[%s2882_s14 + $0x20] sm:$0xff]  ;;  %vm351_vm2 = vcmask 138248   ;;  %s2235_s9 = sld [smem:[#allocation8 + $0x1]]  ;;  %s2690_s20 = smov 127  }
  0x6e   : > { %322 = vst.msk [vmem:[#allocation2] sm:$0xff] %vm321_vm0, %v2689_v4  ;;  %323 = vst.msk [vmem:[#allocation2 + $0x8] sm:$0xff] %vm321_vm0, %v2689_v4  ;;  %v2230_v6 = vld [vmem:[%s2882_s14 + $0x28] sm:$0xff]  ;;  %s2236_s16 = sld [smem:[#allocation8 + $0x1c]]  ;;  %s2691_s18 = smov 126   ;;  %vm1632_vm3 = vcmask 130048  }
  0x6f   : > { %326 = vst.msk [vmem:[#allocation2 + $0x18] sm:$0xff] %vm321_vm0, %v2689_v4  ;;  %327 = vst.msk [vmem:[#allocation2 + $0x20] sm:$0xff] %vm321_vm0, %v2689_v4  ;;  %s2237_s17 = sld [smem:[#allocation8 + $0x37]]  ;;  %p3903_p13 = scmp.ne.s32.totalorder %s3895_s10, 0 }
  0x70   : > { %329 = vst.msk [vmem:[#allocation2 + $0x30] sm:$0xff] %vm321_vm0, %v2689_v4  ;;  %330 = vst.msk [vmem:[#allocation2 + $0x38] sm:$0xff] %vm321_vm0, %v2689_v4  ;;  %s2239_s19 = sld [smem:[#allocation8 + $0x2]] }
  0x71   : > { %332 = vst.msk [vmem:[#allocation2 + $0x48] sm:$0xff] %vm321_vm0, %v2689_v4  ;;  %333 = vst.msk [vmem:[#allocation2 + $0x50] sm:$0xff] %vm321_vm0, %v2689_v4  ;;  %347 = vrot.lane.b32.xlu0 %v342_v2, %s2688_s28  ;;  %361 = vrot.lane.b32.xlu1 %v2228_v3, %s2688_s28  ;;  %s2240_s11 = sld [smem:[#allocation8 + $0x1d]] }
  0x72   : > { %335 = vst.msk [vmem:[#allocation2 + $0x60] sm:$0xff] %vm321_vm0, %v2689_v4  ;;  %336 = vst.msk [vmem:[#allocation2 + $0x68] sm:$0xff] %vm321_vm0, %v2689_v4  ;;  %s2241_s13 = sld [smem:[#allocation8 + $0x38]] }
  0x73   : > { %338 = vst.msk [vmem:[#allocation2 + $0x78] sm:$0xff] %vm321_vm0, %v2689_v4  ;;  %339 = vst.msk [vmem:[#allocation2 + $0x80] sm:$0xff] %vm321_vm0, %v2689_v4  ;;  %v417_v11 = vstv %s2235_s9  ;;  %s2247_s15 = sld [smem:[#allocation8 + $0x4]] }
  0x74   : > { %325 = vst.msk [vmem:[#allocation2 + $0x10] sm:$0x3] %vm324_vm1, %v2689_v4  ;;  %328 = vst.msk [vmem:[#allocation2 + $0x28] sm:$0x3] %vm324_vm1, %v2689_v4  ;;  %v431_v16 = vstv %s2236_s16  ;;  %s2248_s21 = sld [smem:[#allocation8 + $0x1f]] }
  0x75   : > { %331 = vst.msk [vmem:[#allocation2 + $0x40] sm:$0x3] %vm324_vm1, %v2689_v4  ;;  %334 = vst.msk [vmem:[#allocation2 + $0x58] sm:$0x3] %vm324_vm1, %v2689_v4  ;;  %373 = vrot.lane.b32.xlu0 %v2229_v5, %s2688_s28  ;;  %375 = vrot.lane.b32.xlu1 %v2230_v6, %s2688_s28  ;;  %v445_v20 = vstv %s2237_s17  ;;  %s2249_s22 = sld [smem:[#allocation8 + $0x3a]] }
  0x76   : > { %337 = vst.msk [vmem:[#allocation2 + $0x70] sm:$0x3] %vm324_vm1, %v2689_v4  ;;  %340 = vst.msk [vmem:[#allocation2 + $0x88] sm:$0x3] %vm324_vm1, %v2689_v4  ;;  %v473_v23 = vstv %s2239_s19  ;;  %s2251_s12 = sld [smem:[#allocation8 + $0x5]] }
  0x77   : > { %v487_v26 = vstv %s2240_s11  ;;  %s2252_s14 = sld [smem:[#allocation8 + $0x20]] }
  0x78   : > { %v501_v29 = vstv %s2241_s13  ;;  %s2253_s9 = sld [smem:[#allocation8 + $0x3b]] }
  0x79   : > { %v555_v33 = vstv %s2247_s15  ;;  %s2259_s16 = sld [smem:[#allocation8 + $0x7]] }
  0x7a   : > { %v569_v37 = vstv %s2248_s21  ;;  %s2260_s17 = sld [smem:[#allocation8 + $0x22]] }
  0x7b   : > { %v583_v40 = vstv %s2249_s22  ;;  %s2261_s19 = sld [smem:[#allocation8 + $0x3d]] }
  0x7c   : > { %v611_v43 = vstv %s2251_s12  ;;  %s2263_s11 = sld [smem:[#allocation8 + $0x8]] }
  0x7d   : > { %v625_v46 = vstv %s2252_s14  ;;  %s2264_s13 = sld [smem:[#allocation8 + $0x23]] }
  0x7e   : > { %v639_v49 = vstv %s2253_s9  ;;  %s2265_s15 = sld [smem:[#allocation8 + $0x3e]] }
  0x7f   : > { %v693_v53 = vstv %s2259_s16  ;;  %s2271_s21 = sld [smem:[#allocation8 + $0xa]] }
  0x80   : > { %v707_v57 = vstv %s2260_s17  ;;  %s2272_s22 = sld [smem:[#allocation8 + $0x25]] }
  0x81   : > { %v721_v60 = vstv %s2261_s19  ;;  %s2273_s12 = sld [smem:[#allocation8 + $0x40]] }
  0x82   : > { %v749_v63 = vstv %s2263_s11  ;;  %s2275_s14 = sld [smem:[#allocation8 + $0xb]] }
  0x83   : > { %v763_v2 = vstv %s2264_s13  ;;  %s2276_s9 = sld [smem:[#allocation8 + $0x26]] }
  0x84   : > { %v777_v5 = vstv %s2265_s15  ;;  %s2277_s16 = sld [smem:[#allocation8 + $0x41]] }
  0x85   : > { %s2283_s17 = sld [smem:[#allocation8 + $0xd]] }
  0x86   : > { %s2284_s19 = sld [smem:[#allocation8 + $0x28]] }
  0x87   : > { %s2285_s11 = sld [smem:[#allocation8 + $0x43]] }
  0x88   : > { %s2287_s13 = sld [smem:[#allocation8 + $0xe]] }
  0x89   : > { %s2288_s15 = sld [smem:[#allocation8 + $0x29]] }
  0xdf   : > { %v346_v7 = vpop.permute.xlu0 %345  ;;  %v360_v8 = vpop.permute.xlu1 %359 }
  0xe0   : > { %352 = vst.msk [vmem:[#allocation2 + $0x1] sm:$0xff] %vm351_vm2, %v346_v7  ;;  %366 = vst.msk [vmem:[#allocation2 + $0x19] sm:$0xff] %vm351_vm2, %v360_v8  ;;  %v831_v7 = vstv %s2271_s21  ;;  %s3056_s21 = sld [smem:[#allocation8 + $0x44]] }
  0xe3   : > { %v348_v9 = vpop.permute.xlu0 %347  ;;  %v362_v10 = vpop.permute.xlu1 %361 }
  0xe4   : > { %353 = vst.msk [vmem:[#allocation2 + $0x9] sm:$0xff] %vm351_vm2, %v348_v9  ;;  %367 = vst.msk [vmem:[#allocation2 + $0x21] sm:$0xff] %vm351_vm2, %v362_v10 }
  0xe7   : > { %v2930_v12 = vld [vmem:[#allocation2] sm:$0xff]  ;;  %v374_v13 = vpop.permute.xlu0 %373  ;;  %v376_v14 = vpop.permute.xlu1 %375  ;;  %v3010_v6 = vld [vmem:[#allocation2 + $0x18] sm:$0xff] }
  0xe8   : > { %v418_v15 = vmul.f32 %v417_v11, %v2930_v12  ;;  %380 = vst.msk [vmem:[#allocation2 + $0x31] sm:$0xff] %vm351_vm2, %v374_v13  ;;  %381 = vst.msk [vmem:[#allocation2 + $0x39] sm:$0xff] %vm351_vm2, %v376_v14  ;;  %v432_v19 = vmul.f32 %v431_v16, %v2930_v12  ;;  %v446_v22 = vmul.f32 %v445_v20, %v2930_v12  ;;  %v2956_v32 = vld [vmem:[#allocation2 + $0x1] sm:$0xff]  ;;  %v845_v14 = vstv %s2272_s22  ;;  %s3062_s22 = sld [smem:[#allocation8 + $0x10]] }
  0xe9   : > { %v474_v25 = vmul.f32 %v473_v23, %v2930_v12  ;;  %v488_v28 = vmul.f32 %v487_v26, %v2930_v12  ;;  %v502_v31 = vmul.f32 %v501_v29, %v2930_v12  ;;  %v556_v35 = vmul.f32 %v555_v33, %v2956_v32 }
  0xea   : > { %422 = vrot.lane.b32.xlu0 %v418_v15, %s2690_s20  ;;  %v570_v39 = vmul.f32 %v569_v37, %v2956_v32  ;;  %v584_v42 = vmul.f32 %v583_v40, %v2956_v32  ;;  %v612_v45 = vmul.f32 %v611_v43, %v2956_v32  ;;  %v626_v48 = vmul.f32 %v625_v46, %v2956_v32 }
  0xeb   : > { %v2936_v17 = vld [vmem:[#allocation2 + $0x8] sm:$0xff]  ;;  %v640_v51 = vmul.f32 %v639_v49, %v2956_v32  ;;  %v832_v10 = vmul.f32 %v831_v7, %v3010_v6  ;;  %v3018_v13 = vld [vmem:[#allocation2 + $0x20] sm:$0xff] }
  0xec   : > { %v419_v18 = vmul.f32 %v417_v11, %v2936_v17  ;;  %v433_v21 = vmul.f32 %v431_v16, %v2936_v17  ;;  %v447_v24 = vmul.f32 %v445_v20, %v2936_v17  ;;  %v475_v27 = vmul.f32 %v473_v23, %v2936_v17  ;;  %v2962_v36 = vld [vmem:[#allocation2 + $0x9] sm:$0xff] }
  0xed   : > { %v489_v30 = vmul.f32 %v487_v26, %v2936_v17  ;;  %v503_v34 = vmul.f32 %v501_v29, %v2936_v17  ;;  %v557_v38 = vmul.f32 %v555_v33, %v2962_v36  ;;  %v571_v41 = vmul.f32 %v569_v37, %v2962_v36  ;;  %v2984_v52 = vld [vmem:[#allocation2 + $0x2] sm:$0xff]  ;;  %v2990_v56 = vld [vmem:[#allocation2 + $0xa] sm:$0xff] }
  0xee   : > { %424 = vrot.lane.b32.xlu1 %v419_v18, %s2690_s20  ;;  %436 = vrot.lane.b32.xlu0 %v432_v19, %s2690_s20  ;;  %v585_v44 = vmul.f32 %v583_v40, %v2962_v36  ;;  %v613_v47 = vmul.f32 %v611_v43, %v2962_v36  ;;  %v627_v50 = vmul.f32 %v625_v46, %v2962_v36  ;;  %v859_v18 = vstv %s2273_s12  ;;  %s3066_s12 = sld [smem:[#allocation8]] }
  0xef   : > { %v641_v54 = vmul.f32 %v639_v49, %v2962_v36  ;;  %v694_v55 = vmul.f32 %v693_v53, %v2984_v52  ;;  %v695_v58 = vmul.f32 %v693_v53, %v2990_v56  ;;  %v708_v59 = vmul.f32 %v707_v57, %v2984_v52 }
  0xf0   : > { %v709_v61 = vmul.f32 %v707_v57, %v2990_v56  ;;  %v722_v62 = vmul.f32 %v721_v60, %v2984_v52  ;;  %v723_v0 = vmul.f32 %v721_v60, %v2990_v56  ;;  %v750_v1 = vmul.f32 %v749_v63, %v2984_v52 }
  0xf1   : > { %v751_v3 = vmul.f32 %v749_v63, %v2990_v56  ;;  %v764_v4 = vmul.f32 %v763_v2, %v2984_v52  ;;  %v765_v8 = vmul.f32 %v763_v2, %v2990_v56  ;;  %v778_v9 = vmul.f32 %v777_v5, %v2984_v52 }
  0xf2   : > { %438 = vrot.lane.b32.xlu1 %v433_v21, %s2690_s20  ;;  %450 = vrot.lane.b32.xlu0 %v446_v22, %s2690_s20  ;;  %v779_v11 = vmul.f32 %v777_v5, %v2990_v56  ;;  %v833_v15 = vmul.f32 %v831_v7, %v3018_v13  ;;  %v846_v16 = vmul.f32 %v845_v14, %v3010_v6  ;;  %v887_v21 = vstv %s2275_s14  ;;  %s3070_s14 = sld [smem:[#allocation9]] }
  0xf3   : > { %v847_v19 = vmul.f32 %v845_v14, %v3018_v13  ;;  %v860_v20 = vmul.f32 %v859_v18, %v3010_v6  ;;  %v861_v22 = vmul.f32 %v859_v18, %v3018_v13  ;;  %v888_v23 = vmul.f32 %v887_v21, %v3010_v6 }
  0xf4   : > { %v983_v37 = vstv %s2284_s19  ;;  %v997_v40 = vstv %s2285_s11  ;;  %v1025_v43 = vstv %s2287_s13  ;;  %v1039_v46 = vstv %s2288_s15  ;;  %s3083_s19 = sld [smem:[#allocation8 + $0x36]] }
  0xf5   : > { %v1053_v49 = vstv %s3056_s21  ;;  %s3088_s11 = sld [smem:[#allocation8 + $0x46]]  ;;  %v393_v57 = vstv %s3066_s12 }
  0xf6   : > { %452 = vrot.lane.b32.xlu1 %v447_v24, %s2690_s20  ;;  %478 = vrot.lane.b32.xlu0 %v474_v25, %s2691_s18  ;;  %v901_v24 = vstv %s2276_s9  ;;  %v889_v25 = vmul.f32 %v887_v21, %v3018_v13  ;;  %s3073_s9 = sld [smem:[#allocation8 + $0x2b]]  ;;  %v394_v63 = vmul.f32 %v393_v57, %v2930_v12 }
  0xf7   : > { %v902_v26 = vmul.f32 %v901_v24, %v3010_v6  ;;  %s3093_s13 = sld [smem:[#allocation8 + $0x3]] }
  0xf8   : > { %s3095_s15 = sld [smem:[#allocation9 + $0x2]] }
  0xf9   : > { %s3099_s21 = sld [smem:[#allocation8 + $0x11]] }
  0xfa   : > { %480 = vrot.lane.b32.xlu1 %v475_v27, %s2691_s18  ;;  %492 = vrot.lane.b32.xlu0 %v488_v28, %s2691_s18  ;;  %v915_v27 = vstv %s2277_s16  ;;  %v903_v28 = vmul.f32 %v901_v24, %v3018_v13  ;;  %s3077_s16 = sld [smem:[#allocation8 + $0x1b]] }
  0xfb   : > { %v916_v29 = vmul.f32 %v915_v27, %v3010_v6  ;;  %v917_v33 = vmul.f32 %v915_v27, %v3018_v13  ;;  %s3111_s12 = sld [smem:[#allocation8 + $0x2c]]  ;;  %v1135_v14 = vstv %s3088_s11 }
  0xfc   : > { %s3177_s11 = sld [smem:[#allocation8 + $0x6]] }
  0xfe   : > { %494 = vrot.lane.b32.xlu1 %v489_v30, %s2691_s18  ;;  %506 = vrot.lane.b32.xlu0 %v502_v31, %s2691_s18  ;;  %v3040_v30 = vld [vmem:[#allocation2 + $0x19] sm:$0xff]  ;;  %v969_v31 = vstv %s2283_s17  ;;  %s3079_s17 = sld [smem:[#allocation9 + $0x1]] }
  0xff   : > { %v1054_v53 = vmul.f32 %v1053_v49, %v3040_v30 }
 0x100   : > { %v399_v2 = vstv %s3077_s16  ;;  %s3145_s16 = sld [smem:[#allocation8 + $0x13]] }
 0x102   : > { %508 = vrot.lane.b32.xlu1 %v503_v34, %s2691_s18  ;;  %560 = vrot.lane.b32.xlu0 %v556_v35, %s2690_s20  ;;  %v970_v34 = vmul.f32 %v969_v31, %v3040_v30  ;;  %v3046_v35 = vld [vmem:[#allocation2 + $0x21] sm:$0xff] }
 0x103   : > { %v1055_v60 = vmul.f32 %v1053_v49, %v3046_v35 }
 0x106   : > { %562 = vrot.lane.b32.xlu1 %v557_v38, %s2690_s20  ;;  %574 = vrot.lane.b32.xlu0 %v570_v39, %s2690_s20  ;;  %v971_v38 = vmul.f32 %v969_v31, %v3046_v35  ;;  %v984_v39 = vmul.f32 %v983_v37, %v3040_v30 }
 0x10a   : > { %576 = vrot.lane.b32.xlu1 %v571_v41, %s2690_s20  ;;  %588 = vrot.lane.b32.xlu0 %v584_v42, %s2690_s20  ;;  %v985_v41 = vmul.f32 %v983_v37, %v3046_v35  ;;  %v998_v42 = vmul.f32 %v997_v40, %v3040_v30 }
 0x10e   : > { %590 = vrot.lane.b32.xlu1 %v585_v44, %s2690_s20  ;;  %616 = vrot.lane.b32.xlu0 %v612_v45, %s2691_s18  ;;  %v999_v44 = vmul.f32 %v997_v40, %v3046_v35  ;;  %v1026_v45 = vmul.f32 %v1025_v43, %v3040_v30 }
 0x112   : > { %618 = vrot.lane.b32.xlu1 %v613_v47, %s2691_s18  ;;  %630 = vrot.lane.b32.xlu0 %v626_v48, %s2691_s18  ;;  %v1027_v47 = vmul.f32 %v1025_v43, %v3046_v35  ;;  %v1040_v48 = vmul.f32 %v1039_v46, %v3040_v30 }
 0x116   : > { %632 = vrot.lane.b32.xlu1 %v627_v50, %s2691_s18  ;;  %644 = vrot.lane.b32.xlu0 %v640_v51, %s2691_s18  ;;  %v1041_v51 = vmul.f32 %v1039_v46, %v3046_v35 }
 0x11a   : > { %646 = vrot.lane.b32.xlu1 %v641_v54, %s2691_s18  ;;  %698 = vrot.lane.b32.xlu0 %v694_v55, %s2690_s20  ;;  %v3085_v54 = vld [vmem:[#allocation2 + $0x1a] sm:$0xff]  ;;  %v1107_v55 = vstv %s3062_s22  ;;  %s3105_s22 = sld [smem:[#allocation8 + $0x1e]] }
 0x11e   : > { %700 = vrot.lane.b32.xlu1 %v695_v58, %s2690_s20  ;;  %712 = vrot.lane.b32.xlu0 %v708_v59, %s2690_s20 }
 0x122   : > { %714 = vrot.lane.b32.xlu1 %v709_v61, %s2690_s20  ;;  %726 = vrot.lane.b32.xlu0 %v722_v62, %s2690_s20  ;;  %v1108_v61 = vmul.f32 %v1107_v55, %v3085_v54  ;;  %v3101_v62 = vld [vmem:[#allocation2 + $0x22] sm:$0xff] }
 0x123   : > { %v1109_v7 = vmul.f32 %v1107_v55, %v3101_v62 }
 0x126   : > { %728 = vrot.lane.b32.xlu1 %v723_v0, %s2690_s20  ;;  %754 = vrot.lane.b32.xlu0 %v750_v1, %s2691_s18  ;;  %v1121_v0 = vstv %s3073_s9  ;;  %v383_v1 = vstv %s3070_s14  ;;  %s3123_s14 = sld [smem:[#allocation8 + $0x39]] }
 0x127   : > { %v1123_v24 = vmul.f32 %v1121_v0, %v3101_v62  ;;  %s3131_s9 = sld [smem:[#allocation8 + $0x47]] }
 0x12a   : > { %756 = vrot.lane.b32.xlu1 %v751_v3, %s2691_s18  ;;  %768 = vrot.lane.b32.xlu0 %v764_v4, %s2691_s18  ;;  %v405_v4 = vstv %s3083_s19  ;;  %s3173_s19 = sld [smem:[#allocation8 + $0x49]] }
 0x12b   : > { %v406_v21 = vmul.f32 %v405_v4, %v2930_v12 }
 0x12e   : > { %770 = vrot.lane.b32.xlu1 %v765_v8, %s2691_s18  ;;  %782 = vrot.lane.b32.xlu0 %v778_v9, %s2691_s18  ;;  %v1122_v8 = vmul.f32 %v1121_v0, %v3085_v54  ;;  %v396_v9 = vadd.f32 %v394_v63, %v383_v1  ;;  %v1191_v63 = vstv %s3131_s9  ;;  %s3233_s9 = sld [smem:[#allocation8 + $0x31]] }
 0x132   : > { %784 = vrot.lane.b32.xlu1 %v779_v11, %s2691_s18  ;;  %836 = vrot.lane.b32.xlu0 %v832_v10, %s2690_s20  ;;  %v395_v10 = vmul.f32 %v393_v57, %v2936_v17  ;;  %v400_v11 = vmul.f32 %v399_v2, %v2930_v12  ;;  %v537_v12 = vstv %s3105_s22  ;;  %s3200_s22 = sld [smem:[#allocation8 + $0x3c]] }
 0x133   : > { %v538_v49 = vmul.f32 %v537_v12, %v2956_v32 }
 0x134   : > { %v397_v27 = vadd.f32 %v395_v10, %v383_v1 }
 0x136   : > { %838 = vrot.lane.b32.xlu1 %v833_v15, %s2690_s20  ;;  %850 = vrot.lane.b32.xlu0 %v846_v16, %s2690_s20  ;;  %v385_v15 = vstv %s3079_s17  ;;  %v531_v16 = vstv %s3093_s13  ;;  %s3159_s17 = sld [smem:[#allocation8 + $0x2e]] }
 0x137   : > { %v532_v31 = vmul.f32 %v531_v16, %v2956_v32  ;;  %s3186_s13 = sld [smem:[#allocation8 + $0x14]] }
 0x13a   : > { %852 = vrot.lane.b32.xlu1 %v847_v19, %s2690_s20  ;;  %864 = vrot.lane.b32.xlu0 %v860_v20, %s2690_s20  ;;  %v401_v19 = vmul.f32 %v399_v2, %v2936_v17  ;;  %v387_v20 = vstv %s3095_s15  ;;  %v539_v2 = vmul.f32 %v537_v12, %v2962_v36  ;;  %s3190_s15 = sld [smem:[#allocation8 + $0x21]] }
 0x13b   : > { %v408_v40 = vadd.f32 %v406_v21, %v387_v20  ;;  %v1193_v21 = vmul.f32 %v1191_v63, %v3101_v62 }
 0x13e   : > { %866 = vrot.lane.b32.xlu1 %v861_v22, %s2690_s20  ;;  %892 = vrot.lane.b32.xlu0 %v888_v23, %s2691_s18 }
 0x142   : > { %894 = vrot.lane.b32.xlu1 %v889_v25, %s2691_s18  ;;  %906 = vrot.lane.b32.xlu0 %v902_v26, %s2691_s18  ;;  %v1136_v25 = vmul.f32 %v1135_v14, %v3085_v54  ;;  %v1163_v26 = vstv %s3099_s21  ;;  %s3194_s21 = sld [smem:[#allocation8 + $0x2f]] }
 0x146   : > { %908 = vrot.lane.b32.xlu1 %v903_v28, %s2691_s18  ;;  %920 = vrot.lane.b32.xlu0 %v916_v29, %s2691_s18  ;;  %v402_v28 = vadd.f32 %v400_v11, %v385_v15  ;;  %v1192_v11 = vmul.f32 %v1191_v63, %v3085_v54 }
 0x14a   : > { %922 = vrot.lane.b32.xlu1 %v917_v33, %s2691_s18  ;;  %974 = vrot.lane.b32.xlu0 %v970_v34, %s2690_s20  ;;  %v1177_v33 = vstv %s3111_s12  ;;  %s3205_s12 = sld [smem:[#allocation8 + $0x4a]] }
 0x14b   : > { %v1179_v10 = vmul.f32 %v1177_v33, %v3101_v62 }
 0x14e   : > { %976 = vrot.lane.b32.xlu1 %v971_v38, %s2690_s20  ;;  %988 = vrot.lane.b32.xlu0 %v984_v39, %s2690_s20  ;;  %v403_v38 = vadd.f32 %v401_v19, %v385_v15  ;;  %v1245_v15 = vstv %s3145_s16  ;;  %s3248_s16 = sld [smem:[#allocation8 + $0x4c]] }
 0x152   : > { %990 = vrot.lane.b32.xlu1 %v985_v41, %s2690_s20  ;;  %1002 = vrot.lane.b32.xlu0 %v998_v42, %s2690_s20  ;;  %v407_v41 = vmul.f32 %v405_v4, %v2936_v17  ;;  %v543_v17 = vstv %s3123_s14  ;;  %s3221_s14 = sld [smem:[#allocation8 + $0x16]] }
 0x154   : > { %v409_v57 = vadd.f32 %v407_v41, %v387_v20 }
 0x156   : > { %1004 = vrot.lane.b32.xlu1 %v999_v44, %s2690_s20  ;;  %1030 = vrot.lane.b32.xlu0 %v1026_v45, %s2691_s18  ;;  %v1137_v44 = vmul.f32 %v1135_v14, %v3101_v62  ;;  %v1164_v45 = vmul.f32 %v1163_v26, %v3085_v54  ;;  %v3169_v14 = vld [vmem:[#allocation2 + $0x30] sm:$0xff] }
 0x15a   : > { %1032 = vrot.lane.b32.xlu1 %v1027_v47, %s2691_s18  ;;  %1044 = vrot.lane.b32.xlu0 %v1040_v48, %s2691_s18  ;;  %v533_v48 = vmul.f32 %v531_v16, %v2962_v36  ;;  %v545_v16 = vmul.f32 %v543_v17, %v2962_v36  ;;  %v1259_v36 = vstv %s3159_s17  ;;  %s3252_s17 = sld [smem:[#allocation8 + $0x9]] }
 0x15c   : > { %v423_v50 = vpop.permute.xlu0 %422 }
 0x15d   : > { %v428_v18 = vadd.f32 %v423_v50, %v396_v9 }
 0x15e   : > { %1046 = vrot.lane.b32.xlu1 %v1041_v51, %s2691_s18  ;;  %1058 = vrot.lane.b32.xlu0 %v1054_v53, %s2691_s18 }
 0x160   : > { %v425_v58 = vpop.permute.xlu1 %424  ;;  %v437_v59 = vpop.permute.xlu0 %436 }
 0x161   : > { %v429_v34 = vadd.f32 %v425_v58, %v397_v27  ;;  %v442_v37 = vadd.f32 %v437_v59, %v402_v28  ;;  %v1260_v27 = vmul.f32 %v1259_v36, %v3169_v14  ;;  %v1273_v28 = vstv %s3173_s19  ;;  %s3261_s19 = sld [smem:[#allocation8 + $0x17]] }
 0x162   : > { %1060 = vrot.lane.b32.xlu1 %v1055_v60, %s2691_s18  ;;  %1112 = vrot.lane.b32.xlu0 %v1108_v61, %s2690_s20  ;;  %v1165_v60 = vmul.f32 %v1163_v26, %v3101_v62  ;;  %v1178_v61 = vmul.f32 %v1177_v33, %v3085_v54 }
 0x164   : > { %v439_v3 = vpop.permute.xlu1 %438  ;;  %v451_v5 = vpop.permute.xlu0 %450 }
 0x165   : > { %v443_v50 = vadd.f32 %v439_v3, %v403_v38  ;;  %v456_v51 = vadd.f32 %v451_v5, %v408_v40  ;;  %v544_v3 = vmul.f32 %v543_v17, %v2956_v32  ;;  %v1301_v40 = vstv %s3186_s13  ;;  %s3269_s13 = sld [smem:[#allocation8 + $0x32]] }
 0x166   : > { %1114 = vrot.lane.b32.xlu1 %v1109_v7, %s2690_s20  ;;  %1126 = vrot.lane.b32.xlu0 %v1122_v8, %s2690_s20 }
 0x168   : > { %v453_v22 = vpop.permute.xlu1 %452  ;;  %v479_v23 = vpop.permute.xlu0 %478 }
 0x169   : > { %v484_v29 = vadd.f32 %v479_v23, %v428_v18  ;;  %v457_v4 = vadd.f32 %v453_v22, %v409_v57  ;;  %v1246_v22 = vmul.f32 %v1245_v15, %v3169_v14  ;;  %v3183_v23 = vld [vmem:[#allocation2 + $0x38] sm:$0xff] }
 0x16a   : > { %1128 = vrot.lane.b32.xlu1 %v1123_v24, %s2690_s20  ;;  %1140 = vrot.lane.b32.xlu0 %v1136_v25, %s2690_s20  ;;  %v1247_v26 = vmul.f32 %v1245_v15, %v3183_v23 }
 0x16b   : > { %v3138_v39 = vadd.f32 %v532_v31, %v484_v29  ;;  %v669_v29 = vstv %s3177_s11  ;;  %s3265_s11 = sld [smem:[#allocation8 + $0x24]] }
 0x16c   : > { %v481_v42 = vpop.permute.xlu1 %480  ;;  %v493_v43 = vpop.permute.xlu0 %492  ;;  %v670_v41 = vmul.f32 %v669_v29, %v2984_v52 }
 0x16d   : > { %v485_v46 = vadd.f32 %v481_v42, %v429_v34  ;;  %v498_v47 = vadd.f32 %v493_v43, %v442_v37  ;;  %v1261_v34 = vmul.f32 %v1259_v36, %v3183_v23  ;;  %v1274_v37 = vmul.f32 %v1273_v28, %v3169_v14 }
 0x16e   : > { %1142 = vrot.lane.b32.xlu1 %v1137_v44, %s2690_s20  ;;  %1168 = vrot.lane.b32.xlu0 %v1164_v45, %s2691_s18  ;;  %v675_v42 = vstv %s3190_s15  ;;  %s3275_s15 = sld [smem:[#allocation8 + $0x3f]] }
 0x16f   : > { %v3150_v53 = vadd.f32 %v533_v48, %v485_v46  ;;  %v3152_v55 = vadd.f32 %v538_v49, %v498_v47  ;;  %v1275_v47 = vmul.f32 %v1273_v28, %v3183_v23  ;;  %v1302_v48 = vmul.f32 %v1301_v40, %v3169_v14 }
 0x170   : > { %v495_v58 = vpop.permute.xlu1 %494  ;;  %v507_v59 = vpop.permute.xlu0 %506  ;;  %v1315_v49 = vstv %s3194_s21  ;;  %v676_v57 = vmul.f32 %v675_v42, %v2984_v52  ;;  %s3280_s21 = sld [smem:[#allocation8 + $0x4d]] }
 0x171   : > { %v499_v0 = vadd.f32 %v495_v58, %v443_v50  ;;  %v512_v1 = vadd.f32 %v507_v59, %v456_v51  ;;  %v671_v51 = vmul.f32 %v669_v29, %v2990_v56  ;;  %v1317_v15 = vmul.f32 %v1315_v49, %v3183_v23 }
 0x172   : > { %1170 = vrot.lane.b32.xlu1 %v1165_v60, %s2691_s18  ;;  %1182 = vrot.lane.b32.xlu0 %v1178_v61, %s2691_s18 }
 0x173   : > { %v3163_v5 = vadd.f32 %v539_v2, %v499_v0  ;;  %v3165_v7 = vadd.f32 %v544_v3, %v512_v1  ;;  %v1303_v0 = vmul.f32 %v1301_v40, %v3183_v23  ;;  %v1316_v1 = vmul.f32 %v1315_v49, %v3169_v14 }
 0x174   : > { %v509_v8 = vpop.permute.xlu1 %508  ;;  %v561_v9 = vpop.permute.xlu0 %560  ;;  %v1329_v2 = vstv %s3205_s12  ;;  %s3306_s12 = sld [smem:[#allocation8 + $0x34]] }
 0x175   : > { %v513_v32 = vadd.f32 %v509_v8, %v457_v4  ;;  %v566_v31 = vadd.f32 %v561_v9, %v3138_v39  ;;  %v677_v8 = vmul.f32 %v675_v42, %v2990_v56 }
 0x176   : > { %1184 = vrot.lane.b32.xlu1 %v1179_v10, %s2691_s18  ;;  %1196 = vrot.lane.b32.xlu0 %v1192_v11, %s2691_s18 }
 0x177   : > { %v3179_v18 = vadd.f32 %v545_v16, %v513_v32  ;;  %v1330_v16 = vmul.f32 %v1329_v2, %v3169_v14 }
 0x178   : > { %v563_v19 = vpop.permute.xlu1 %562  ;;  %v575_v20 = vpop.permute.xlu0 %574 }
 0x179   : > { %v567_v39 = vadd.f32 %v563_v19, %v3150_v53  ;;  %v580_v43 = vadd.f32 %v575_v20, %v3152_v55  ;;  %v681_v53 = vstv %s3200_s22  ;;  %v1383_v20 = vstv %s3221_s14  ;;  %s3294_s22 = sld [smem:[#allocation8 + $0x19]] }
 0x17a   : > { %1198 = vrot.lane.b32.xlu1 %v1193_v21, %s2691_s18  ;;  %1250 = vrot.lane.b32.xlu0 %v1246_v22, %s2690_s20  ;;  %v682_v9 = vmul.f32 %v681_v53, %v2984_v52  ;;  %v3244_v52 = vld [vmem:[#allocation2 + $0x31] sm:$0xff]  ;;  %v683_v21 = vmul.f32 %v681_v53, %v2990_v56  ;;  %v1397_v56 = vstv %s3233_s9  ;;  %s3317_s14 = sld [smem:[#allocation8 + $0x4f]] }
 0x17b   : > { %s3321_s9 = sld [smem:[#allocation8 + $0xc]] }
 0x17c   : > { %v577_v24 = vpop.permute.xlu1 %576  ;;  %v589_v25 = vpop.permute.xlu0 %588 }
 0x17d   : > { %v581_v55 = vadd.f32 %v577_v24, %v3163_v5  ;;  %v594_v58 = vadd.f32 %v589_v25, %v3165_v7  ;;  %v1331_v24 = vmul.f32 %v1329_v2, %v3183_v23  ;;  %v1384_v25 = vmul.f32 %v1383_v20, %v3244_v52 }
 0x17e   : > { %1252 = vrot.lane.b32.xlu1 %v1247_v26, %s2690_s20  ;;  %1264 = vrot.lane.b32.xlu0 %v1260_v27, %s2690_s20  ;;  %v3258_v26 = vld [vmem:[#allocation2 + $0x39] sm:$0xff] }
 0x17f   : > { %v1385_v29 = vmul.f32 %v1383_v20, %v3258_v26  ;;  %v1399_v40 = vmul.f32 %v1397_v56, %v3258_v26 }
 0x180   : > { %v591_v33 = vpop.permute.xlu1 %590  ;;  %v617_v12 = vpop.permute.xlu0 %616 }
 0x181   : > { %v622_v38 = vadd.f32 %v617_v12, %v566_v31  ;;  %v595_v5 = vadd.f32 %v591_v33, %v3179_v18  ;;  %v1398_v31 = vmul.f32 %v1397_v56, %v3244_v52  ;;  %v1411_v33 = vstv %s3248_s16  ;;  %s3330_s16 = sld [smem:[#allocation8 + $0x1a]] }
 0x182   : > { %1266 = vrot.lane.b32.xlu1 %v1261_v34, %s2690_s20  ;;  %1278 = vrot.lane.b32.xlu0 %v1274_v37, %s2690_s20  ;;  %v807_v12 = vstv %s3252_s17  ;;  %s3334_s17 = sld [smem:[#allocation8 + $0x27]] }
 0x183   : > { %v3214_v44 = vadd.f32 %v670_v41, %v622_v38  ;;  %v1412_v41 = vmul.f32 %v1411_v33, %v3244_v52 }
 0x184   : > { %v619_v45 = vpop.permute.xlu1 %618  ;;  %v631_v46 = vpop.permute.xlu0 %630 }
 0x185   : > { %v623_v17 = vadd.f32 %v619_v45, %v567_v39  ;;  %v636_v50 = vadd.f32 %v631_v46, %v580_v43  ;;  %v1439_v39 = vstv %s3261_s19  ;;  %v808_v43 = vmul.f32 %v807_v12, %v3010_v6  ;;  %s3338_s19 = sld [smem:[#allocation8 + $0x35]] }
 0x186   : > { %1280 = vrot.lane.b32.xlu1 %v1275_v47, %s2690_s20  ;;  %1306 = vrot.lane.b32.xlu0 %v1302_v48, %s2691_s18  ;;  %v813_v45 = vstv %s3265_s11  ;;  %s3344_s11 = sld [smem:[#allocation8 + $0x42]] }
 0x187   : > { %v673_v59 = vadd.f32 %v671_v51, %v623_v17  ;;  %v678_v60 = vadd.f32 %v676_v57, %v636_v50  ;;  %v1413_v17 = vmul.f32 %v1411_v33, %v3258_v26  ;;  %v1440_v50 = vmul.f32 %v1439_v39, %v3244_v52 }
 0x188   : > { %v633_v61 = vpop.permute.xlu1 %632  ;;  %v645_v63 = vpop.permute.xlu0 %644  ;;  %v1453_v51 = vstv %s3269_s13  ;;  %s3349_s13 = sld [smem:[#allocation8 + $0x50]] }
 0x189   : > { %v637_v3 = vadd.f32 %v633_v61, %v581_v55  ;;  %v650_v4 = vadd.f32 %v645_v63, %v594_v58  ;;  %v809_v55 = vmul.f32 %v807_v12, %v3018_v13  ;;  %v814_v58 = vmul.f32 %v813_v45, %v3010_v6 }
 0x18a   : > { %1308 = vrot.lane.b32.xlu1 %v1303_v0, %s2691_s18  ;;  %1320 = vrot.lane.b32.xlu0 %v1316_v1, %s2691_s18  ;;  %v1455_v20 = vmul.f32 %v1453_v51, %v3258_v26 }
 0x18b   : > { %v3238_v7 = vadd.f32 %v677_v8, %v637_v3  ;;  %v3240_v10 = vadd.f32 %v682_v9, %v650_v4  ;;  %v1441_v3 = vmul.f32 %v1439_v39, %v3258_v26  ;;  %v1454_v4 = vmul.f32 %v1453_v51, %v3244_v52 }
 0x18c   : > { %v647_v11 = vpop.permute.xlu1 %646  ;;  %v699_v32 = vpop.permute.xlu0 %698  ;;  %v1467_v8 = vstv %s3280_s21  ;;  %s2292_s21 = sld [smem:[#allocation8 + $0x2a]] }
 0x18d   : > { %v651_v19 = vadd.f32 %v647_v11, %v595_v5  ;;  %v704_v34 = vadd.f32 %v699_v32, %v3214_v44  ;;  %v815_v11 = vmul.f32 %v813_v45, %v3018_v13 }
 0x18e   : > { %1322 = vrot.lane.b32.xlu1 %v1317_v15, %s2691_s18  ;;  %1334 = vrot.lane.b32.xlu0 %v1330_v16, %s2691_s18 }
 0x18f   : > { %v3254_v18 = vadd.f32 %v683_v21, %v651_v19  ;;  %v1468_v21 = vmul.f32 %v1467_v8, %v3244_v52 }
 0x190   : > { %v701_v22 = vpop.permute.xlu1 %700  ;;  %v713_v36 = vpop.permute.xlu0 %712 }
 0x191   : > { %v705_v44 = vadd.f32 %v701_v22, %v673_v59  ;;  %v718_v46 = vadd.f32 %v713_v36, %v678_v60  ;;  %v819_v59 = vstv %s3275_s15  ;;  %v3313_v22 = vld [vmem:[#allocation2 + $0x32] sm:$0xff]  ;;  %v1521_v36 = vstv %s3294_s22  ;;  %s2291_s15 = sld [smem:[#allocation8 + $0xf]] }
 0x192   : > { %1336 = vrot.lane.b32.xlu1 %v1331_v24, %s2691_s18  ;;  %1388 = vrot.lane.b32.xlu0 %v1384_v25, %s2690_s20  ;;  %v820_v32 = vmul.f32 %v819_v59, %v3010_v6  ;;  %v821_v24 = vmul.f32 %v819_v59, %v3018_v13  ;;  %v1535_v13 = vstv %s3306_s12  ;;  %s3379_s22 = sld [smem:[#allocation8 + $0x45]] }
 0x193   : > { %s2303_s12 = sld [smem:[#allocation8 + $0x12]] }
 0x194   : > { %v715_v27 = vpop.permute.xlu1 %714  ;;  %v727_v28 = vpop.permute.xlu0 %726 }
 0x195   : > { %v719_v60 = vadd.f32 %v715_v27, %v3238_v7  ;;  %v732_v61 = vadd.f32 %v727_v28, %v3240_v10  ;;  %v1469_v27 = vmul.f32 %v1467_v8, %v3258_v26  ;;  %v1522_v28 = vmul.f32 %v1521_v36, %v3313_v22 }
 0x196   : > { %1390 = vrot.lane.b32.xlu1 %v1385_v29, %s2690_s20  ;;  %1402 = vrot.lane.b32.xlu0 %v1398_v31, %s2690_s20  ;;  %v3327_v29 = vld [vmem:[#allocation2 + $0x3a] sm:$0xff] }
 0x197   : > { %v1523_v12 = vmul.f32 %v1521_v36, %v3327_v29  ;;  %v1537_v39 = vmul.f32 %v1535_v13, %v3327_v29 }
 0x198   : > { %v729_v37 = vpop.permute.xlu1 %728  ;;  %v755_v38 = vpop.permute.xlu0 %754 }
 0x199   : > { %v760_v42 = vadd.f32 %v755_v38, %v704_v34  ;;  %v733_v7 = vadd.f32 %v729_v37, %v3254_v18  ;;  %v1536_v34 = vmul.f32 %v1535_v13, %v3313_v22  ;;  %v1549_v37 = vstv %s3317_s14  ;;  %s2304_s14 = sld [smem:[#allocation8 + $0x2d]] }
 0x19a   : > { %1404 = vrot.lane.b32.xlu1 %v1399_v40, %s2690_s20  ;;  %1416 = vrot.lane.b32.xlu0 %v1412_v41, %s2690_s20  ;;  %v945_v38 = vstv %s3321_s9  ;;  %s3388_s9 = sld [smem:[#allocation8 + $0x48]] }
 0x19b   : > { %v3287_v47 = vadd.f32 %v808_v43, %v760_v42  ;;  %v1550_v43 = vmul.f32 %v1549_v37, %v3313_v22 }
 0x19c   : > { %v757_v48 = vpop.permute.xlu1 %756  ;;  %v769_v49 = vpop.permute.xlu0 %768 }
 0x19d   : > { %v761_v57 = vadd.f32 %v757_v48, %v705_v44  ;;  %v774_v53 = vadd.f32 %v769_v49, %v718_v46  ;;  %v1577_v44 = vstv %s3330_s16  ;;  %v946_v46 = vmul.f32 %v945_v38, %v3040_v30  ;;  %s2315_s16 = sld [smem:[#allocation8 + $0x15]] }
 0x19e   : > { %1418 = vrot.lane.b32.xlu1 %v1413_v17, %s2690_s20  ;;  %1444 = vrot.lane.b32.xlu0 %v1440_v50, %s2691_s18  ;;  %v951_v48 = vstv %s3334_s17  ;;  %s2316_s17 = sld [smem:[#allocation8 + $0x30]] }
 0x19f   : > { %v811_v63 = vadd.f32 %v809_v55, %v761_v57  ;;  %v816_v0 = vadd.f32 %v814_v58, %v774_v53  ;;  %v1551_v57 = vmul.f32 %v1549_v37, %v3327_v29  ;;  %v1578_v53 = vmul.f32 %v1577_v44, %v3313_v22 }
 0x1a0   : > { %v771_v1 = vpop.permute.xlu1 %770  ;;  %v783_v2 = vpop.permute.xlu0 %782  ;;  %v1591_v55 = vstv %s3338_s19  ;;  %s3397_s19 = sld [smem:[#allocation8 + $0x4b]] }
 0x1a1   : > { %v775_v9 = vadd.f32 %v771_v1, %v719_v60  ;;  %v788_v5 = vadd.f32 %v783_v2, %v732_v61  ;;  %v947_v60 = vmul.f32 %v945_v38, %v3046_v35  ;;  %v952_v61 = vmul.f32 %v951_v48, %v3040_v30 }
 0x1a2   : > { %1446 = vrot.lane.b32.xlu1 %v1441_v3, %s2691_s18  ;;  %1458 = vrot.lane.b32.xlu0 %v1454_v4, %s2691_s18  ;;  %v1593_v36 = vmul.f32 %v1591_v55, %v3327_v29 }
 0x1a3   : > { %v817_v10 = vadd.f32 %v815_v11, %v775_v9  ;;  %v822_v15 = vadd.f32 %v820_v32, %v788_v5  ;;  %v1579_v9 = vmul.f32 %v1577_v44, %v3327_v29  ;;  %v1592_v5 = vmul.f32 %v1591_v55, %v3313_v22 }
 0x1a4   : > { %v785_v16 = vpop.permute.xlu1 %784  ;;  %v837_v19 = vpop.permute.xlu0 %836  ;;  %v1605_v11 = vstv %s3349_s13  ;;  %s2328_s13 = sld [smem:[#allocation8 + $0x33]] }
 0x1a5   : > { %v789_v6 = vadd.f32 %v785_v16, %v733_v7  ;;  %v842_v40 = vadd.f32 %v837_v19, %v3287_v47  ;;  %v953_v16 = vmul.f32 %v951_v48, %v3046_v35 }
 0x1a6   : > { %1460 = vrot.lane.b32.xlu1 %v1455_v20, %s2691_s18  ;;  %1472 = vrot.lane.b32.xlu0 %v1468_v21, %s2691_s18 }
 0x1a7   : > { %v3323_v18 = vadd.f32 %v821_v24, %v789_v6  ;;  %v1606_v24 = vmul.f32 %v1605_v11, %v3313_v22 }
 0x1a8   : > { %v839_v25 = vpop.permute.xlu1 %838  ;;  %v851_v56 = vpop.permute.xlu0 %850 }
 0x1a9   : > { %v843_v47 = vadd.f32 %v839_v25, %v811_v63  ;;  %v856_v49 = vadd.f32 %v851_v56, %v816_v0  ;;  %v957_v63 = vstv %s3344_s11  ;;  %s2327_s11 = sld [smem:[#allocation8 + $0x18]] }
 0x1aa   : > { %1474 = vrot.lane.b32.xlu1 %v1469_v27, %s2691_s18  ;;  %1526 = vrot.lane.b32.xlu0 %v1522_v28, %s2690_s20  ;;  %v958_v19 = vmul.f32 %v957_v63, %v3040_v30  ;;  %v959_v56 = vmul.f32 %v957_v63, %v3046_v35 }
 0x1ac   : > { %v853_v31 = vpop.permute.xlu1 %852  ;;  %v865_v33 = vpop.permute.xlu0 %864 }
 0x1ad   : > { %v857_v0 = vadd.f32 %v853_v31, %v817_v10  ;;  %v870_v1 = vadd.f32 %v865_v33, %v822_v15  ;;  %v1083_v33 = vstv %s2291_s15  ;;  %s3406_s15 = sld [smem:[#allocation8 + $0x4e]] }
 0x1ae   : > { %1528 = vrot.lane.b32.xlu1 %v1523_v12, %s2690_s20  ;;  %1540 = vrot.lane.b32.xlu0 %v1536_v34, %s2690_s20  ;;  %v1084_v38 = vmul.f32 %v1083_v33, %v3085_v54  ;;  %v1085_v48 = vmul.f32 %v1083_v33, %v3101_v62 }
 0x1b0   : > { %v867_v41 = vpop.permute.xlu1 %866  ;;  %v893_v42 = vpop.permute.xlu0 %892 }
 0x1b1   : > { %v898_v45 = vadd.f32 %v893_v42, %v842_v40  ;;  %v871_v10 = vadd.f32 %v867_v41, %v3323_v18  ;;  %v1607_v18 = vmul.f32 %v1605_v11, %v3327_v29  ;;  %v1089_v40 = vstv %s2292_s21  ;;  %s3417_s21 = scalar_lea.vmem [#allocation12], %s2379_s7  ;;  %s2238_s7 = sld [smem:[#allocation11 + $0x1]] }
 0x1b2   : > { %1542 = vrot.lane.b32.xlu1 %v1537_v39, %s2690_s20  ;;  %1554 = vrot.lane.b32.xlu0 %v1550_v43, %s2690_s20 }
 0x1b3   : > { %v948_v17 = vadd.f32 %v946_v46, %v898_v45 }
 0x1b4   : > { %v895_v50 = vpop.permute.xlu1 %894  ;;  %v907_v51 = vpop.permute.xlu0 %906 }
 0x1b5   : > { %v899_v58 = vadd.f32 %v895_v50, %v843_v47  ;;  %v912_v59 = vadd.f32 %v907_v51, %v856_v49  ;;  %v1090_v47 = vmul.f32 %v1089_v40, %v3085_v54  ;;  %v1095_v49 = vstv %s3379_s22  ;;  %s2242_s22 = sld [smem:[#allocation11 + $0x2]] }
 0x1b6   : > { %1556 = vrot.lane.b32.xlu1 %v1551_v57, %s2690_s20  ;;  %1582 = vrot.lane.b32.xlu0 %v1578_v53, %s2691_s18 }
 0x1b7   : > { %v949_v2 = vadd.f32 %v947_v60, %v899_v58  ;;  %v954_v3 = vadd.f32 %v952_v61, %v912_v59  ;;  %v1091_v60 = vmul.f32 %v1089_v40, %v3101_v62  ;;  %v1096_v61 = vmul.f32 %v1095_v49, %v3085_v54 }
 0x1b8   : > { %v909_v4 = vpop.permute.xlu1 %908  ;;  %v921_v8 = vpop.permute.xlu0 %920 }
 0x1b9   : > { %v913_v32 = vadd.f32 %v909_v4, %v857_v0  ;;  %v926_v7 = vadd.f32 %v921_v8, %v870_v1  ;;  %v1097_v8 = vmul.f32 %v1095_v49, %v3101_v62 }
 0x1ba   : > { %1584 = vrot.lane.b32.xlu1 %v1579_v9, %s2691_s18  ;;  %1596 = vrot.lane.b32.xlu0 %v1592_v5, %s2691_s18 }
 0x1bb   : > { %v955_v15 = vadd.f32 %v953_v16, %v913_v32  ;;  %v960_v20 = vadd.f32 %v958_v19, %v926_v7  ;;  %v1221_v16 = vstv %s2303_s12  ;;  %s2250_s12 = sld [smem:[#allocation11 + $0x4]] }
 0x1bc   : > { %v923_v21 = vpop.permute.xlu1 %922  ;;  %v975_v6 = vpop.permute.xlu0 %974 }
 0x1bd   : > { %v927_v25 = vadd.f32 %v923_v21, %v871_v10  ;;  %v980_v35 = vadd.f32 %v975_v6, %v948_v17  ;;  %v1227_v21 = vstv %s2304_s14  ;;  %s2254_s14 = sld [smem:[#allocation11 + $0x5]] }
 0x1be   : > { %1598 = vrot.lane.b32.xlu1 %v1593_v36, %s2691_s18  ;;  %1610 = vrot.lane.b32.xlu0 %v1606_v24, %s2691_s18  ;;  %v1229_v40 = vmul.f32 %v1227_v21, %v3183_v23 }
 0x1bf   : > { %v961_v30 = vadd.f32 %v959_v56, %v927_v25 }
 0x1c0   : > { %v977_v27 = vpop.permute.xlu1 %976  ;;  %v989_v28 = vpop.permute.xlu0 %988 }
 0x1c1   : > { %v981_v41 = vadd.f32 %v977_v27, %v949_v2  ;;  %v994_v42 = vadd.f32 %v989_v28, %v954_v3  ;;  %v1223_v27 = vmul.f32 %v1221_v16, %v3183_v23  ;;  %v1228_v28 = vmul.f32 %v1227_v21, %v3169_v14 }
 0x1c2   : > { %1612 = vrot.lane.b32.xlu1 %v1607_v18, %s2691_s18  ;;  %v1233_v18 = vstv %s3388_s9  ;;  %s2262_s9 = sld [smem:[#allocation11 + $0x7]] }
 0x1c4   : > { %v991_v13 = vpop.permute.xlu1 %990  ;;  %v1003_v31 = vpop.permute.xlu0 %1002 }
 0x1c5   : > { %v995_v50 = vadd.f32 %v991_v13, %v955_v15  ;;  %v1008_v17 = vadd.f32 %v1003_v31, %v960_v20  ;;  %v1222_v20 = vmul.f32 %v1221_v16, %v3169_v14 }
 0x1c8   : > { %v1005_v12 = vpop.permute.xlu1 %1004  ;;  %v1031_v34 = vpop.permute.xlu0 %1030 }
 0x1c9   : > { %v1036_v37 = vadd.f32 %v1031_v34, %v980_v35  ;;  %v1009_v63 = vadd.f32 %v1005_v12, %v961_v30 }
 0x1cb   : > { %v1086_v39 = vadd.f32 %v1084_v38, %v1036_v37 }
 0x1cc   : > { %v1033_v43 = vpop.permute.xlu1 %1032  ;;  %v1045_v45 = vpop.permute.xlu0 %1044 }
 0x1cd   : > { %v1037_v44 = vadd.f32 %v1033_v43, %v981_v41  ;;  %v1050_v46 = vadd.f32 %v1045_v45, %v994_v42  ;;  %v1234_v41 = vmul.f32 %v1233_v18, %v3169_v14 }
 0x1cf   : > { %v1087_v51 = vadd.f32 %v1085_v48, %v1037_v44  ;;  %v1092_v57 = vadd.f32 %v1090_v47, %v1050_v46  ;;  %v1235_v48 = vmul.f32 %v1233_v18, %v3183_v23 }
 0x1d0   : > { %v1047_v53 = vpop.permute.xlu1 %1046  ;;  %v1059_v55 = vpop.permute.xlu0 %1058 }
 0x1d1   : > { %v1051_v58 = vadd.f32 %v1047_v53, %v995_v50  ;;  %v1064_v59 = vadd.f32 %v1059_v55, %v1008_v17 }
 0x1d3   : > { %v1093_v0 = vadd.f32 %v1091_v60, %v1051_v58  ;;  %v1098_v1 = vadd.f32 %v1096_v61, %v1064_v59  ;;  %v1365_v60 = vstv %s2316_s17  ;;  %s2274_s17 = sld [smem:[#allocation11 + $0xa]] }
 0x1d4   : > { %v1061_v2 = vpop.permute.xlu1 %1060  ;;  %v1113_v3 = vpop.permute.xlu0 %1112 }
 0x1d5   : > { %v1065_v4 = vadd.f32 %v1061_v2, %v1009_v63  ;;  %v1118_v54 = vadd.f32 %v1113_v3, %v1086_v39 }
 0x1d7   : > { %v1099_v9 = vadd.f32 %v1097_v8, %v1065_v4  ;;  %v1366_v8 = vmul.f32 %v1365_v60, %v3244_v52 }
 0x1d8   : > { %v1115_v5 = vpop.permute.xlu1 %1114  ;;  %v1127_v11 = vpop.permute.xlu0 %1126 }
 0x1d9   : > { %v1119_v6 = vadd.f32 %v1115_v5, %v1087_v51  ;;  %v1132_v62 = vadd.f32 %v1127_v11, %v1092_v57  ;;  %v1359_v57 = vstv %s2315_s16  ;;  %s2266_s16 = sld [smem:[#allocation11 + $0x8]] }
 0x1da   : > { %v1360_v59 = vmul.f32 %v1359_v57, %v3244_v52  ;;  %v1361_v4 = vmul.f32 %v1359_v57, %v3258_v26 }
 0x1dc   : > { %v1129_v32 = vpop.permute.xlu1 %1128  ;;  %v1141_v7 = vpop.permute.xlu0 %1140 }
 0x1dd   : > { %v1133_v13 = vadd.f32 %v1129_v32, %v1093_v0  ;;  %v1146_v31 = vadd.f32 %v1141_v7, %v1098_v1 }
 0x1e0   : > { %v1143_v19 = vpop.permute.xlu1 %1142  ;;  %v1169_v10 = vpop.permute.xlu0 %1168 }
 0x1e1   : > { %v1174_v15 = vadd.f32 %v1169_v10, %v1118_v54  ;;  %v1147_v42 = vadd.f32 %v1143_v19, %v1099_v9  ;;  %v1371_v9 = vstv %s3397_s19  ;;  %s2278_s19 = sld [smem:[#allocation11 + $0xb]] }
 0x1e3   : > { %v1224_v36 = vadd.f32 %v1222_v20, %v1174_v15  ;;  %v1367_v15 = vmul.f32 %v1365_v60, %v3258_v26  ;;  %v1372_v20 = vmul.f32 %v1371_v9, %v3244_v52 }
 0x1e4   : > { %v1171_v24 = vpop.permute.xlu1 %1170  ;;  %v1183_v25 = vpop.permute.xlu0 %1182 }
 0x1e5   : > { %v1175_v56 = vadd.f32 %v1171_v24, %v1119_v6  ;;  %v1188_v30 = vadd.f32 %v1183_v25, %v1132_v62 }
 0x1e7   : > { %v1225_v33 = vadd.f32 %v1223_v27, %v1175_v56  ;;  %v1230_v35 = vadd.f32 %v1228_v28, %v1188_v30  ;;  %v1373_v56 = vmul.f32 %v1371_v9, %v3258_v26 }
 0x1e8   : > { %v1185_v12 = vpop.permute.xlu1 %1184  ;;  %v1197_v34 = vpop.permute.xlu0 %1196 }
 0x1e9   : > { %v1189_v37 = vadd.f32 %v1185_v12, %v1133_v13  ;;  %v1202_v38 = vadd.f32 %v1197_v34, %v1146_v31  ;;  %v1497_v31 = vstv %s2327_s11  ;;  %s2286_s11 = sld [smem:[#allocation11 + $0xd]] }
 0x1ea   : > { %v1498_v34 = vmul.f32 %v1497_v31, %v3313_v22 }
 0x1eb   : > { %v1231_v39 = vadd.f32 %v1229_v40, %v1189_v37  ;;  %v1236_v43 = vadd.f32 %v1234_v41, %v1202_v38  ;;  %v1503_v37 = vstv %s2328_s13  ;;  %s2290_s13 = sld [smem:[#allocation11 + $0xe]] }
 0x1ec   : > { %v1199_v45 = vpop.permute.xlu1 %1198  ;;  %v1251_v44 = vpop.permute.xlu0 %1250 }
 0x1ed   : > { %v1203_v46 = vadd.f32 %v1199_v45, %v1147_v42  ;;  %v1256_v14 = vadd.f32 %v1251_v44, %v1224_v36  ;;  %v1499_v45 = vmul.f32 %v1497_v31, %v3327_v29  ;;  %v1504_v44 = vmul.f32 %v1503_v37, %v3313_v22 }
 0x1ef   : > { %v1237_v47 = vadd.f32 %v1235_v48, %v1203_v46  ;;  %v1509_v46 = vstv %s3406_s15  ;;  %s2298_s15 = sld [smem:[#allocation11 + $0x10]] }
 0x1f0   : > { %v1253_v49 = vpop.permute.xlu1 %1252  ;;  %v1265_v50 = vpop.permute.xlu0 %1264 }
 0x1f1   : > { %v1257_v61 = vadd.f32 %v1253_v49, %v1225_v33  ;;  %v1270_v23 = vadd.f32 %v1265_v50, %v1230_v35 }
 0x1f4   : > { %v1267_v17 = vpop.permute.xlu1 %1266  ;;  %v1279_v51 = vpop.permute.xlu0 %1278 }
 0x1f5   : > { %v1271_v5 = vadd.f32 %v1267_v17, %v1231_v39  ;;  %v1284_v11 = vadd.f32 %v1279_v51, %v1236_v43 }
 0x1f8   : > { %v1281_v53 = vpop.permute.xlu1 %1280  ;;  %v1307_v55 = vpop.permute.xlu0 %1306 }
 0x1f9   : > { %v1312_v58 = vadd.f32 %v1307_v55, %v1256_v14  ;;  %v1285_v21 = vadd.f32 %v1281_v53, %v1237_v47  ;;  %v1505_v53 = vmul.f32 %v1503_v37, %v3327_v29  ;;  %v1510_v55 = vmul.f32 %v1509_v46, %v3313_v22 }
 0x1fb   : > { %v1362_v63 = vadd.f32 %v1360_v59, %v1312_v58 }
 0x1fc   : > { %v1309_v0 = vpop.permute.xlu1 %1308  ;;  %v1321_v1 = vpop.permute.xlu0 %1320 }
 0x1fd   : > { %v1313_v2 = vadd.f32 %v1309_v0, %v1257_v61  ;;  %v1326_v3 = vadd.f32 %v1321_v1, %v1270_v23  ;;  %v1511_v0 = vmul.f32 %v1509_v46, %v3327_v29 }
 0x1ff   : > { %v1363_v32 = vadd.f32 %v1361_v4, %v1313_v2  ;;  %v1368_v7 = vadd.f32 %v1366_v8, %v1326_v3 }
 0x200   : > { %v1323_v16 = vpop.permute.xlu1 %1322  ;;  %v1335_v54 = vpop.permute.xlu0 %1334 }
 0x201   : > { %v1327_v19 = vadd.f32 %v1323_v16, %v1271_v5  ;;  %v1340_v10 = vadd.f32 %v1335_v54, %v1284_v11 }
 0x203   : > { %v1369_v6 = vadd.f32 %v1367_v15, %v1327_v19  ;;  %v1374_v62 = vadd.f32 %v1372_v20, %v1340_v10 }
 0x204   : > { %v1337_v36 = vpop.permute.xlu1 %1336  ;;  %v1389_v24 = vpop.permute.xlu0 %1388 }
 0x205   : > { %v1341_v25 = vadd.f32 %v1337_v36, %v1285_v21  ;;  %v1394_v52 = vadd.f32 %v1389_v24, %v1362_v63 }
 0x207   : > { %v1375_v30 = vadd.f32 %v1373_v56, %v1341_v25 }
 0x208   : > { %v1391_v27 = vpop.permute.xlu1 %1390  ;;  %v1403_v28 = vpop.permute.xlu0 %1402 }
 0x209   : > { %v1395_v38 = vadd.f32 %v1391_v27, %v1363_v32  ;;  %v1408_v26 = vadd.f32 %v1403_v28, %v1368_v7 }
 0x20c   : > { %v1405_v18 = vpop.permute.xlu1 %1404  ;;  %v1417_v13 = vpop.permute.xlu0 %1416 }
 0x20d   : > { %v1409_v48 = vadd.f32 %v1405_v18, %v1369_v6  ;;  %v1422_v47 = vadd.f32 %v1417_v13, %v1374_v62 }
 0x210   : > { %v1419_v33 = vpop.permute.xlu1 %1418  ;;  %v1445_v35 = vpop.permute.xlu0 %1444 }
 0x211   : > { %v1450_v12 = vadd.f32 %v1445_v35, %v1394_v52  ;;  %v1423_v58 = vadd.f32 %v1419_v33, %v1375_v30 }
 0x213   : > { %v1500_v40 = vadd.f32 %v1498_v34, %v1450_v12 }
 0x214   : > { %v1447_v41 = vpop.permute.xlu1 %1446  ;;  %v1459_v42 = vpop.permute.xlu0 %1458 }
 0x215   : > { %v1451_v39 = vadd.f32 %v1447_v41, %v1395_v38  ;;  %v1464_v43 = vadd.f32 %v1459_v42, %v1408_v26 }
 0x217   : > { %v1501_v49 = vadd.f32 %v1499_v45, %v1451_v39  ;;  %v1506_v50 = vadd.f32 %v1504_v44, %v1464_v43 }
 0x218   : > { %v1461_v17 = vpop.permute.xlu1 %1460  ;;  %v1473_v51 = vpop.permute.xlu0 %1472 }
 0x219   : > { %v1465_v57 = vadd.f32 %v1461_v17, %v1409_v48  ;;  %v1478_v14 = vadd.f32 %v1473_v51, %v1422_v47 }
 0x21b   : > { %v1507_v59 = vadd.f32 %v1505_v53, %v1465_v57  ;;  %v1512_v60 = vadd.f32 %v1510_v55, %v1478_v14  ;;  %v459_v14 = vstv %s2238_s7  ;;  %s2302_s7 = sld [smem:[#allocation11 + $0x11]] }
 0x21c   : > { %v1475_v61 = vpop.permute.xlu1 %1474  ;;  %v1527_v23 = vpop.permute.xlu0 %1526 }
 0x21d   : > { %v1479_v63 = vadd.f32 %v1475_v61, %v1423_v58  ;;  %v1532_v9 = vadd.f32 %v1527_v23, %v1500_v40  ;;  %v3436_v58 = vld [vmem:[#allocation2] sm:$0xff]  ;;  %v3445_v23 = vld [vmem:[#allocation2 + $0x8] sm:$0xff] }
 0x21f   : > { %v1513_v1 = vadd.f32 %v1511_v0, %v1479_v63  ;;  %v461_v63 = vmul.f32 %v3445_v23, %v459_v14  ;;  %v515_v0 = vstv %s2242_s22  ;;  %s410_s22 = sld [smem:[#allocation11]] }
 0x220   : > { %v1529_v2 = vpop.permute.xlu1 %1528  ;;  %v1541_v3 = vpop.permute.xlu0 %1540 }
 0x221   : > { %v1533_v22 = vadd.f32 %v1529_v2, %v1501_v49  ;;  %v1546_v7 = vadd.f32 %v1541_v3, %v1506_v50  ;;  %v597_v2 = vstv %s2250_s12  ;;  %v517_v3 = vmul.f32 %v3445_v23, %v515_v0  ;;  %s388_s12 = sld [smem:[#allocation3]] }
 0x224   : > { %v1543_v4 = vpop.permute.xlu1 %1542  ;;  %v1555_v8 = vpop.permute.xlu0 %1554 }
 0x225   : > { %v1547_v10 = vadd.f32 %v1543_v4, %v1507_v59  ;;  %v1560_v15 = vadd.f32 %v1555_v8, %v1512_v60  ;;  %v460_v59 = vmul.f32 %v3436_v58, %v459_v14  ;;  %v3456_v4 = vld [vmem:[#allocation2 + $0x1] sm:$0xff] }
 0x226   : > { %v598_v8 = vmul.f32 %v3456_v4, %v597_v2 }
 0x228   : > { %v1557_v5 = vpop.permute.xlu1 %1556  ;;  %v1583_v11 = vpop.permute.xlu0 %1582 }
 0x229   : > { %v1588_v32 = vadd.f32 %v1583_v11, %v1532_v9  ;;  %v1561_v24 = vadd.f32 %v1557_v5, %v1513_v1  ;;  %v516_v1 = vmul.f32 %v3436_v58, %v515_v0  ;;  %v3461_v9 = vld [vmem:[#allocation2 + $0x9] sm:$0xff]  ;;  %v653_v11 = vstv %s2254_s14  ;;  %s3521_s14 = sld [smem:[#allocation11 + $0x1e]] }
 0x22a   : > { %v599_v5 = vmul.f32 %v3461_v9, %v597_v2 }
 0x22b   : > { %1633 = vst.msk [vmem:[%s3417_s21] sm:$0xff] %vm1632_vm3, %v1588_v32 }
 0x22c   : > { %v1585_v29 = vpop.permute.xlu1 %1584  ;;  %v1597_v16 = vpop.permute.xlu0 %1596 }
 0x22d   : > { %v1589_v54 = vadd.f32 %v1585_v29, %v1533_v22  ;;  %v1602_v19 = vadd.f32 %v1597_v16, %v1546_v7  ;;  %v735_v22 = vstv %s2262_s9  ;;  %v655_v7 = vmul.f32 %v3461_v9, %v653_v11  ;;  %v3472_v29 = vld [vmem:[#allocation2 + $0x2] sm:$0xff]  ;;  %s3525_s9 = sld [smem:[#allocation11 + $0x3]] }
 0x22e   : > { %v736_v16 = vmul.f32 %v3472_v29, %v735_v22 }
 0x22f   : > { %1634 = vst.msk [vmem:[%s3417_s21 + $0x8] sm:$0xff] %vm1632_vm3, %v1589_v54  ;;  %2339 = vst.msk [vmem:[%s3417_s21 + $0x10] sm:$0xff] %vm1632_vm3, %v1602_v19  ;;  %v1641_v20 = vmax.f32 %v1588_v32, %v1602_v19 }
 0x230   : > { %v1599_v21 = vpop.permute.xlu1 %1598  ;;  %v1611_v6 = vpop.permute.xlu0 %1610 }
 0x231   : > { %v1603_v62 = vadd.f32 %v1599_v21, %v1547_v10  ;;  %v1616_v36 = vadd.f32 %v1611_v6, %v1560_v15  ;;  %v3484_v6 = vld [vmem:[#allocation2 + $0x18] sm:$0xff] }
 0x233   : > { %2340 = vst.msk [vmem:[%s3417_s21 + $0x18] sm:$0xff] %vm1632_vm3, %v1603_v62  ;;  %v1642_v25 = vmax.f32 %v1589_v54, %v1603_v62  ;;  %2341 = vst.msk [vmem:[%s3417_s21 + $0x20] sm:$0xff] %vm1632_vm3, %v1616_v36  ;;  %v1643_v56 = vmax.f32 %v1641_v20, %v1616_v36  ;;  %v873_v20 = vstv %s2274_s17  ;;  %s3532_s17 = sld [smem:[#allocation11 + $0x24]]  ;;  %v549_v0 = vstv %s3525_s9 }
 0x234   : > { %v1613_v30 = vpop.permute.xlu1 %1612  ;;  %s3601_s9 = sld [smem:[#allocation11 + $0xc]] }
 0x235   : > { %v1645_v27 = vsub.f32 %v1588_v32, %v1643_v56  ;;  %v1651_v28 = vsub.f32 %v1602_v19, %v1643_v56  ;;  %v1657_v18 = vsub.f32 %v1616_v36, %v1643_v56  ;;  %v1617_v13 = vadd.f32 %v1613_v30, %v1561_v24  ;;  %v3477_v19 = vld [vmem:[#allocation2 + $0xa] sm:$0xff]  ;;  %v3489_v24 = vld [vmem:[#allocation2 + $0x20] sm:$0xff] }
 0x236   : > { %v654_v32 = vmul.f32 %v3456_v4, %v653_v11  ;;  %v737_v10 = vmul.f32 %v3477_v19, %v735_v22  ;;  %v929_v36 = vstv %s2278_s19  ;;  %v1011_v30 = vstv %s2286_s11  ;;  %s3540_s19 = sld [smem:[#allocation11 + $0x26]] }
 0x237   : > { %v1647_v31 = vmul.f32 1.442695, %v1645_v27  ;;  %v1653_v52 = vmul.f32 1.442695, %v1651_v28  ;;  %2342 = vst.msk [vmem:[%s3417_s21 + $0x28] sm:$0xff] %vm1632_vm3, %v1617_v13  ;;  %v1644_v33 = vmax.f32 %v1642_v25, %v1617_v13  ;;  %v875_v25 = vmul.f32 %v3489_v24, %v873_v20  ;;  %v3496_v28 = vld [vmem:[#allocation2 + $0x19] sm:$0xff] }
 0x238   : > { %v1659_v35 = vmul.f32 1.442695, %v1657_v18  ;;  %v930_v56 = vmul.f32 %v3484_v6, %v929_v36  ;;  %v931_v27 = vmul.f32 %v3489_v24, %v929_v36  ;;  %v1012_v18 = vmul.f32 %v3496_v28, %v1011_v30  ;;  %s3549_s11 = sld [smem:[#allocation11 + $0x6]] }
 0x239   : > { %2471 = vpow2.f32 %v1647_v31  ;;  %v1646_v12 = vsub.f32 %v1589_v54, %v1644_v33  ;;  %v1652_v34 = vsub.f32 %v1603_v62, %v1644_v33  ;;  %v1658_v37 = vsub.f32 %v1617_v13, %v1644_v33  ;;  %v3501_v31 = vld [vmem:[#allocation2 + $0x21] sm:$0xff] }
 0x23a   : > { %2473 = vpow2.f32 %v1653_v52  ;;  %v791_v54 = vstv %s2266_s16  ;;  %v874_v62 = vmul.f32 %v3484_v6, %v873_v20  ;;  %v1067_v13 = vstv %s2290_s13  ;;  %s3527_s16 = sld [smem:[#allocation11 + $0x20]] }
 0x23b   : > { %v1649_v38 = vmul.f32 1.442695, %v1646_v12  ;;  %v1655_v26 = vmul.f32 1.442695, %v1652_v34  ;;  %2475 = vpow2.f32 %v1659_v35  ;;  %v1661_v40 = vmul.f32 1.442695, %v1658_v37 }
 0x23c   : > { %v792_v15 = vmul.f32 %v3472_v29, %v791_v54  ;;  %v793_v21 = vmul.f32 %v3477_v19, %v791_v54  ;;  %v1013_v52 = vmul.f32 %v3501_v31, %v1011_v30  ;;  %v1068_v33 = vmul.f32 %v3496_v28, %v1067_v13  ;;  %v3508_v34 = vld [vmem:[#allocation2 + $0x1a] sm:$0xff]  ;;  %s3552_s13 = sld [smem:[#allocation11 + $0x2a]] }
 0x23d   : > { %2477 = vpow2.f32 %v1649_v38  ;;  %v1149_v35 = vstv %s2298_s15  ;;  %v1069_v12 = vmul.f32 %v3501_v31, %v1067_v13  ;;  %v1205_v38 = vstv %s2302_s7  ;;  %s3562_s15 = sld [smem:[#allocation11 + $0x2c]] }
 0x23e   : > { %2479 = vpow2.f32 %v1655_v26  ;;  %v1150_v37 = vmul.f32 %v3508_v34, %v1149_v35  ;;  %v3513_v26 = vld [vmem:[#allocation2 + $0x22] sm:$0xff]  ;;  %v1813_v22 = vstv %s3532_s17  ;;  %v1841_v36 = vstv %s3540_s19  ;;  %s3568_s7 = sld [smem:[#allocation11 + $0x9]] }
 0x23f   : > { %2481 = vpow2.f32 %v1661_v40  ;;  %v1151_v40 = vmul.f32 %v3513_v26, %v1149_v35  ;;  %v687_v35 = vstv %s3549_s11  ;;  %s3619_s17 = sld [smem:[#allocation11 + $0xf]] }
 0x240   : > { %s3622_s19 = sld [smem:[#allocation11 + $0x16]] }
 0x241   : > { %s3629_s11 = sld [smem:[#allocation11 + $0x17]] }
 0x246   : > { %v2472_v41 = vpop.eup %2471 }
 0x247   : > { %v2474_v42 = vpop.eup %2473 }
 0x248   : > { %v1663_v39 = vadd.f32 %v2474_v42, %v2472_v41  ;;  %v2476_v43 = vpop.eup %2475 }
 0x24a   : > { %v2478_v45 = vpop.eup %2477  ;;  %v1665_v44 = vadd.f32 %v2476_v43, %v1663_v39  ;;  %v411_v39 = vstv %s410_s22  ;;  %s3577_s22 = sld [smem:[#allocation11 + $0x30]] }
 0x24b   : > { %v2480_v46 = vpop.eup %2479 }
 0x24c   : > { %2483 = vrcp.f32 %v1665_v44  ;;  %v1664_v48 = vadd.f32 %v2480_v46, %v2478_v45  ;;  %v2482_v47 = vpop.eup %2481  ;;  %v389_v44 = vstv %s388_s12  ;;  %s3588_s12 = sld [smem:[#allocation11 + $0x32]] }
 0x24e   : > { %v1666_v49 = vadd.f32 %v2482_v47, %v1664_v48  ;;  %v413_v48 = vmul.f32 %v3445_v23, %v411_v39  ;;  %v1769_v23 = vstv %s3527_s16  ;;  %s3611_s16 = sld [smem:[#allocation11 + $0x14]] }
 0x250   : > { %2485 = vrcp.f32 %v1666_v49  ;;  %v415_v14 = vadd.f32 %v413_v48, %v389_v44  ;;  %v689_v48 = vmul.f32 %v3477_v19, %v687_v35 }
 0x259   : > { %v2484_v50 = vpop.eup %2483 }
 0x25a   : > { %v1671_v17 = vmul.f32 %v2484_v50, %v2472_v41  ;;  %v3431_v51 = vmul.f32 %v2484_v50, %v2474_v42  ;;  %v3433_v57 = vmul.f32 %v2484_v50, %v2476_v43  ;;  %v1206_v41 = vmul.f32 %v3508_v34, %v1205_v38 }
 0x25b   : > { %v1207_v42 = vmul.f32 %v3513_v26, %v1205_v38  ;;  %v412_v43 = vmul.f32 %v3436_v58, %v411_v39 }
 0x25c   : > { %1679 = vrot.lane.b32.xlu0 %v1671_v17, %s2688_s28  ;;  %v1741_v17 = vstv %s3521_s14  ;;  %s3594_s14 = sld [smem:[#allocation11 + $0x13]] }
 0x25d   : > { %v2486_v53 = vpop.eup %2485 }
 0x25e   : > { %v1672_v55 = vmul.f32 %v2486_v53, %v2478_v45  ;;  %v3439_v60 = vmul.f32 %v2486_v53, %v2480_v46  ;;  %v3441_v61 = vmul.f32 %v2486_v53, %v2482_v47  ;;  %v414_v46 = vadd.f32 %v412_v43, %v389_v44 }
 0x25f   : > { %v1913_v43 = vstv %s3562_s15  ;;  %s3647_s15 = sld [smem:[#allocation11 + $0x1a]] }
 0x260   : > { %1681 = vrot.lane.b32.xlu1 %v1672_v55, %s2688_s28  ;;  %464 = vrot.lane.b32.xlu0 %v460_v59, %s2690_s20 }
 0x264   : > { %466 = vrot.lane.b32.xlu1 %v461_v63, %s2690_s20  ;;  %1690 = vrot.lane.b32.xlu0 %v3431_v51, %s2688_s28 }
 0x268   : > { %1692 = vrot.lane.b32.xlu1 %v3439_v60, %s2688_s28  ;;  %520 = vrot.lane.b32.xlu0 %v516_v1, %s2691_s18 }
 0x26c   : > { %522 = vrot.lane.b32.xlu1 %v517_v3, %s2691_s18  ;;  %602 = vrot.lane.b32.xlu0 %v598_v8, %s2690_s20 }
 0x270   : > { %604 = vrot.lane.b32.xlu1 %v599_v5, %s2690_s20  ;;  %1701 = vrot.lane.b32.xlu0 %v3433_v57, %s2688_s28 }
 0x274   : > { %1703 = vrot.lane.b32.xlu1 %v3441_v61, %s2688_s28  ;;  %658 = vrot.lane.b32.xlu0 %v654_v32, %s2691_s18  ;;  %v550_v32 = vmul.f32 %v3456_v4, %v549_v0 }
 0x278   : > { %660 = vrot.lane.b32.xlu1 %v655_v7, %s2691_s18  ;;  %740 = vrot.lane.b32.xlu0 %v736_v16, %s2690_s20 }
 0x27c   : > { %742 = vrot.lane.b32.xlu1 %v737_v10, %s2690_s20  ;;  %796 = vrot.lane.b32.xlu0 %v792_v15, %s2691_s18  ;;  %v551_v15 = vmul.f32 %v3461_v9, %v549_v0 }
 0x280   : > { %798 = vrot.lane.b32.xlu1 %v793_v21, %s2691_s18  ;;  %878 = vrot.lane.b32.xlu0 %v874_v62, %s2690_s20 }
 0x284   : > { %880 = vrot.lane.b32.xlu1 %v875_v25, %s2690_s20  ;;  %934 = vrot.lane.b32.xlu0 %v930_v56, %s2691_s18 }
 0x288   : > { %936 = vrot.lane.b32.xlu1 %v931_v27, %s2691_s18  ;;  %1016 = vrot.lane.b32.xlu0 %v1012_v18, %s2690_s20 }
 0x28c   : > { %1018 = vrot.lane.b32.xlu1 %v1013_v52, %s2690_s20  ;;  %1072 = vrot.lane.b32.xlu0 %v1068_v33, %s2691_s18  ;;  %v1885_v33 = vstv %s3552_s13  ;;  %s3638_s13 = sld [smem:[#allocation11 + $0x12]] }
 0x290   : > { %1074 = vrot.lane.b32.xlu1 %v1069_v12, %s2691_s18  ;;  %1154 = vrot.lane.b32.xlu0 %v1150_v37, %s2690_s20 }
 0x294   : > { %1156 = vrot.lane.b32.xlu1 %v1151_v40, %s2690_s20  ;;  %1210 = vrot.lane.b32.xlu0 %v1206_v41, %s2691_s18 }
 0x298   : > { %1212 = vrot.lane.b32.xlu1 %v1207_v42, %s2691_s18  ;;  %v688_v42 = vmul.f32 %v3472_v29, %v687_v35 }
 0x2ce   : > { %v1680_v45 = vpop.permute.xlu0 %1679 }
 0x2cf   : > { %1686 = vst.msk [vmem:[#allocation2 + $0x49] sm:$0xff] %vm351_vm2, %v1680_v45 }
 0x2d2   : > { %v1682_v47 = vpop.permute.xlu1 %1681  ;;  %v465_v49 = vpop.permute.xlu0 %464 }
 0x2d3   : > { %1687 = vst.msk [vmem:[#allocation2 + $0x51] sm:$0xff] %vm351_vm2, %v1682_v47  ;;  %v470_v50 = vadd.f32 %v465_v49, %v414_v46  ;;  %v825_v47 = vstv %s3568_s7  ;;  %s3657_s7 = sld [smem:[#allocation11 + $0x1d]] }
 0x2d6   : > { %v467_v53 = vpop.permute.xlu1 %466  ;;  %v1691_v55 = vpop.permute.xlu0 %1690  ;;  %v3534_v58 = vld [vmem:[#allocation2 + $0x49] sm:$0xff] }
 0x2d7   : > { %v471_v59 = vadd.f32 %v467_v53, %v415_v14  ;;  %1697 = vst.msk [vmem:[#allocation2 + $0x61] sm:$0xff] %vm351_vm2, %v1691_v55  ;;  %v1742_v63 = vmul.f32 %v1741_v17, %v3534_v58  ;;  %v1770_v11 = vmul.f32 %v1769_v23, %v3534_v58  ;;  %v1957_v53 = vstv %s3577_s22  ;;  %s3667_s22 = sld [smem:[#allocation11 + $0x1f]] }
 0x2d9   : > { %1746 = vrot.lane.b32.xlu0 %v1742_v63, %s2688_s28  ;;  %v826_v63 = vmul.f32 %v3484_v6, %v825_v47  ;;  %v827_v6 = vmul.f32 %v3489_v24, %v825_v47 }
 0x2da   : > { %v1693_v1 = vpop.permute.xlu1 %1692  ;;  %v521_v2 = vpop.permute.xlu0 %520  ;;  %v3543_v3 = vld [vmem:[#allocation2 + $0x51] sm:$0xff] }
 0x2db   : > { %1698 = vst.msk [vmem:[#allocation2 + $0x69] sm:$0xff] %vm351_vm2, %v1693_v1  ;;  %v526_v8 = vadd.f32 %v521_v2, %v470_v50  ;;  %v1743_v5 = vmul.f32 %v1741_v17, %v3543_v3  ;;  %v1771_v4 = vmul.f32 %v1769_v23, %v3543_v3 }
 0x2dd   : > { %1748 = vrot.lane.b32.xlu1 %v1743_v5, %s2688_s28  ;;  %1774 = vrot.lane.b32.xlu0 %v1770_v11, %s2690_s20  ;;  %v552_v7 = vadd.f32 %v550_v32, %v526_v8  ;;  %v1985_v5 = vstv %s3588_s12  ;;  %s2351_s12 = sld [smem:[#allocation11 + $0x23]] }
 0x2de   : > { %v523_v16 = vpop.permute.xlu1 %522  ;;  %v603_v54 = vpop.permute.xlu0 %602  ;;  %v3556_v10 = vld [vmem:[#allocation2 + $0x60] sm:$0xff] }
 0x2df   : > { %v527_v20 = vadd.f32 %v523_v16, %v471_v59  ;;  %v608_v21 = vadd.f32 %v603_v54, %v552_v7  ;;  %v1814_v62 = vmul.f32 %v1813_v22, %v3556_v10  ;;  %v1842_v13 = vmul.f32 %v1841_v36, %v3556_v10 }
 0x2e0   : > { %v1287_v7 = vstv %s3594_s14  ;;  %s2353_s14 = sld [smem:[#allocation11 + $0x25]] }
 0x2e1   : > { %1776 = vrot.lane.b32.xlu1 %v1771_v4, %s2690_s20  ;;  %1818 = vrot.lane.b32.xlu0 %v1814_v62, %s2688_s28  ;;  %v553_v25 = vadd.f32 %v551_v15, %v527_v20 }
 0x2e2   : > { %v605_v56 = vpop.permute.xlu1 %604  ;;  %v1702_v30 = vpop.permute.xlu0 %1701  ;;  %v3566_v27 = vld [vmem:[#allocation2 + $0x68] sm:$0xff] }
 0x2e3   : > { %v609_v9 = vadd.f32 %v605_v56, %v553_v25  ;;  %1708 = vst.msk [vmem:[#allocation2 + $0x79] sm:$0xff] %vm351_vm2, %v1702_v30  ;;  %v1815_v18 = vmul.f32 %v1813_v22, %v3566_v27  ;;  %v3573_v52 = vld [vmem:[#allocation2 + $0x62] sm:$0xff]  ;;  %v1843_v40 = vmul.f32 %v1841_v36, %v3566_v27  ;;  %v3585_v39 = vld [vmem:[#allocation2 + $0x6a] sm:$0xff] }
 0x2e4   : > { %v1886_v41 = vmul.f32 %v1885_v33, %v3573_v52  ;;  %v1887_v50 = vmul.f32 %v1885_v33, %v3585_v39  ;;  %v1914_v17 = vmul.f32 %v1913_v43, %v3573_v52  ;;  %v1915_v1 = vmul.f32 %v1913_v43, %v3585_v39  ;;  %v2499_v36 = vld [vmem:[#allocation2 + $0x30] sm:$0xff] }
 0x2e5   : > { %1820 = vrot.lane.b32.xlu1 %v1815_v18, %s2688_s28  ;;  %1846 = vrot.lane.b32.xlu0 %v1842_v13, %s2690_s20  ;;  %v1288_v25 = vmul.f32 %v2499_v36, %v1287_v7  ;;  %v1343_v13 = vstv %s3611_s16  ;;  %s2359_s16 = sld [smem:[#allocation11 + $0x2b]] }
 0x2e6   : > { %v1704_v12 = vpop.permute.xlu1 %1703  ;;  %v659_v37 = vpop.permute.xlu0 %658 }
 0x2e7   : > { %1709 = vst.msk [vmem:[#allocation2 + $0x81] sm:$0xff] %vm351_vm2, %v1704_v12  ;;  %v664_v38 = vadd.f32 %v659_v37, %v608_v21  ;;  %v963_v21 = vstv %s3601_s9  ;;  %v2500_v37 = vld [vmem:[#allocation2 + $0x38] sm:$0xff]  ;;  %s2357_s9 = sld [smem:[#allocation11 + $0x29]] }
 0x2e8   : > { %v964_v18 = vmul.f32 %v3496_v28, %v963_v21  ;;  %v965_v43 = vmul.f32 %v3501_v31, %v963_v21  ;;  %v1425_v28 = vstv %s3622_s19  ;;  %v1345_v47 = vmul.f32 %v2500_v37, %v1343_v13  ;;  %s2365_s19 = sld [smem:[#allocation11 + $0x31]] }
 0x2e9   : > { %1848 = vrot.lane.b32.xlu1 %v1843_v40, %s2690_s20  ;;  %1890 = vrot.lane.b32.xlu0 %v1886_v41, %s2688_s28  ;;  %v690_v45 = vadd.f32 %v688_v42, %v664_v38  ;;  %v1289_v38 = vmul.f32 %v2500_v37, %v1287_v7  ;;  %v1344_v42 = vmul.f32 %v2499_v36, %v1343_v13  ;;  %v1619_v21 = vstv %s3647_s15  ;;  %s2356_s15 = sld [smem:[#allocation11 + $0x28]] }
 0x2ea   : > { %v661_v44 = vpop.permute.xlu1 %660  ;;  %v741_v46 = vpop.permute.xlu0 %740  ;;  %v3598_v14 = vld [vmem:[#allocation2 + $0x79] sm:$0xff] }
 0x2eb   : > { %v665_v49 = vadd.f32 %v661_v44, %v609_v9  ;;  %v746_v29 = vadd.f32 %v741_v46, %v690_v45  ;;  %v1958_v2 = vmul.f32 %v1957_v53, %v3598_v14  ;;  %v1986_v20 = vmul.f32 %v1985_v5, %v3598_v14 }
 0x2ec   : > { %v1101_v45 = vstv %s3619_s17  ;;  %s2363_s17 = sld [smem:[#allocation11 + $0x2f]] }
 0x2ed   : > { %1892 = vrot.lane.b32.xlu1 %v1887_v50, %s2688_s28  ;;  %1918 = vrot.lane.b32.xlu0 %v1914_v17, %s2690_s20  ;;  %v691_v19 = vadd.f32 %v689_v48, %v665_v49  ;;  %v3642_v50 = vld [vmem:[#allocation2 + $0x31] sm:$0xff]  ;;  %v1102_v17 = vmul.f32 %v3508_v34, %v1101_v45  ;;  %v1103_v34 = vmul.f32 %v3513_v26, %v1101_v45 }
 0x2ee   : > { %v743_v55 = vpop.permute.xlu1 %742  ;;  %v797_v59 = vpop.permute.xlu0 %796  ;;  %v3608_v8 = vld [vmem:[#allocation2 + $0x81] sm:$0xff]  ;;  %v1426_v31 = vmul.f32 %v3642_v50, %v1425_v28  ;;  %v3699_v45 = vld [vmem:[#allocation2 + $0x52] sm:$0xff] }
 0x2ef   : > { %v747_v23 = vadd.f32 %v743_v55, %v691_v19  ;;  %v802_v0 = vadd.f32 %v797_v59, %v746_v29  ;;  %v1959_v15 = vmul.f32 %v1957_v53, %v3608_v8  ;;  %v1987_v9 = vmul.f32 %v1985_v5, %v3608_v8 }
 0x2f0   : > { %v1481_v53 = vstv %s3629_s11  ;;  %s2369_s11 = sld [smem:[#allocation11 + $0x35]] }
 0x2f1   : > { %1920 = vrot.lane.b32.xlu1 %v1915_v1, %s2690_s20  ;;  %1962 = vrot.lane.b32.xlu0 %v1958_v2, %s2688_s28  ;;  %v828_v11 = vadd.f32 %v826_v63, %v802_v0  ;;  %v3651_v63 = vld [vmem:[#allocation2 + $0x39] sm:$0xff]  ;;  %v1482_v2 = vmul.f32 %v3642_v50, %v1481_v53 }
 0x2f2   : > { %v799_v32 = vpop.permute.xlu1 %798  ;;  %v879_v22 = vpop.permute.xlu0 %878  ;;  %v1483_v7 = vmul.f32 %v3651_v63, %v1481_v53  ;;  %v3717_v53 = vld [vmem:[#allocation2 + $0x78] sm:$0xff] }
 0x2f3   : > { %v803_v16 = vadd.f32 %v799_v32, %v747_v23  ;;  %v884_v54 = vadd.f32 %v879_v22, %v828_v11  ;;  %v1427_v23 = vmul.f32 %v3651_v63, %v1425_v28  ;;  %v1239_v11 = vstv %s3638_s13  ;;  %s2350_s13 = sld [smem:[#allocation11 + $0x22]] }
 0x2f5   : > { %1964 = vrot.lane.b32.xlu1 %v1959_v15, %s2688_s28  ;;  %1990 = vrot.lane.b32.xlu0 %v1986_v20, %s2690_s20  ;;  %v829_v4 = vadd.f32 %v827_v6, %v803_v16  ;;  %s3634_s28 = sld [smem:[#allocation11 + $0x19]]  ;;  %v3663_v15 = vld [vmem:[#allocation2 + $0x32] sm:$0xff]  ;;  %v1240_v20 = vmul.f32 %v2499_v36, %v1239_v11  ;;  %v3677_v36 = vld [vmem:[#allocation2 + $0x48] sm:$0xff] }
 0x2f6   : > { %v881_v62 = vpop.permute.xlu1 %880  ;;  %v935_v24 = vpop.permute.xlu0 %934 }
 0x2f7   : > { %v885_v56 = vadd.f32 %v881_v62, %v829_v4  ;;  %v940_v30 = vadd.f32 %v935_v24, %v884_v54 }
 0x2f9   : > { %1992 = vrot.lane.b32.xlu1 %v1987_v9, %s2690_s20  ;;  %1292 = vrot.lane.b32.xlu0 %v1288_v25, %s2690_s20  ;;  %v966_v33 = vadd.f32 %v964_v18, %v940_v30  ;;  %v3673_v25 = vld [vmem:[#allocation2 + $0x3a] sm:$0xff]  ;;  %v1620_v30 = vmul.f32 %v3663_v15, %v1619_v21  ;;  %v1241_v9 = vmul.f32 %v2500_v37, %v1239_v11  ;;  %v1725_v18 = vstv %s3657_s7  ;;  %s3747_s7 = sld [smem:[#allocation11 + $0x34]] }
 0x2fa   : > { %v937_v35 = vpop.permute.xlu1 %936  ;;  %v1017_v12 = vpop.permute.xlu0 %1016 }
 0x2fb   : > { %v941_v40 = vadd.f32 %v937_v35, %v885_v56  ;;  %v1022_v41 = vadd.f32 %v1017_v12, %v966_v33  ;;  %v1563_v5 = vstv %s3634_s28  ;;  %v1621_v33 = vmul.f32 %v3673_v25, %v1619_v21  ;;  %v3686_v12 = vld [vmem:[#allocation2 + $0x50] sm:$0xff]  ;;  %s2344_s28 = sld [smem:[#allocation11 + $0x1c]] }
 0x2fc   : > { %v1564_v26 = vmul.f32 %v3663_v15, %v1563_v5  ;;  %v1565_v56 = vmul.f32 %v3673_v25, %v1563_v5  ;;  %v1726_v35 = vmul.f32 %v1725_v18, %v3677_v36  ;;  %v1727_v37 = vmul.f32 %v1725_v18, %v3686_v12  ;;  %v3735_v5 = vld [vmem:[#allocation2 + $0x82] sm:$0xff] }
 0x2fd   : > { %1294 = vrot.lane.b32.xlu1 %v1289_v38, %s2690_s20  ;;  %1348 = vrot.lane.b32.xlu0 %v1344_v42, %s2691_s18  ;;  %v967_v44 = vadd.f32 %v965_v43, %v941_v40  ;;  %v1755_v38 = vstv %s3667_s22  ;;  %v1797_v42 = vstv %s2351_s12  ;;  %s3751_s22 = sld [smem:[#allocation11 + $0x15]]  ;;  %s2063_s12 = sshll.u32 %s3417_s21, 4  ;;  %s3757_s12 = int_to_ptr.vmem [resolvable:$true] %s2063_s12 }
 0x2fe   : > { %v1019_v46 = vpop.permute.xlu1 %1018  ;;  %v1073_v48 = vpop.permute.xlu0 %1072  ;;  %v1756_v40 = vmul.f32 %v1755_v38, %v3534_v58  ;;  %v1757_v43 = vmul.f32 %v1755_v38, %v3543_v3  ;;  %v1799_v58 = vmul.f32 %v1797_v42, %v3699_v45  ;;  %v1863_v18 = vstv %s2356_s15 }
 0x2ff   : > { %v1023_v49 = vadd.f32 %v1019_v46, %v967_v44  ;;  %v1078_v29 = vadd.f32 %v1073_v48, %v1022_v41  ;;  %v3693_v41 = vld [vmem:[#allocation2 + $0x4a] sm:$0xff]  ;;  %v1827_v44 = vstv %s2353_s14  ;;  %v3705_v48 = vld [vmem:[#allocation2 + $0x61] sm:$0xff]  ;;  %s2380_s14 = smul.u32 768, %s2755_s4 }
 0x300   : > { %v1798_v28 = vmul.f32 %v1797_v42, %v3693_v41  ;;  %v1828_v46 = vmul.f32 %v1827_v44, %v3556_v10  ;;  %v1829_v3 = vmul.f32 %v1827_v44, %v3566_v27  ;;  %v1864_v42 = vmul.f32 %v1863_v18, %v3705_v48 }
 0x301   : > { %1350 = vrot.lane.b32.xlu1 %v1345_v47, %s2691_s18  ;;  %1430 = vrot.lane.b32.xlu0 %v1426_v31, %s2690_s20  ;;  %v1104_v19 = vadd.f32 %v1102_v17, %v1078_v29  ;;  %v1869_v47 = vstv %s2357_s9  ;;  %v3711_v29 = vld [vmem:[#allocation2 + $0x69] sm:$0xff]  ;;  %v1899_v31 = vstv %s2359_s16  ;;  %s3762_s21 = scalar_lea.hbm %s3884_s5, %s2380_s14 }
 0x302   : > { %v1075_v55 = vpop.permute.xlu1 %1074  ;;  %v1155_v59 = vpop.permute.xlu0 %1154  ;;  %v1871_v10 = vmul.f32 %v1869_v47, %v3711_v29  ;;  %v1900_v17 = vmul.f32 %v1899_v31, %v3573_v52  ;;  %v1901_v27 = vmul.f32 %v1899_v31, %v3585_v39 }
 0x303   : > { %v1079_v0 = vadd.f32 %v1075_v55, %v1023_v49  ;;  %v1160_v1 = vadd.f32 %v1155_v59, %v1104_v19  ;;  %v1870_v49 = vmul.f32 %v1869_v47, %v3705_v48  ;;  %v1941_v19 = vstv %s2363_s17  ;;  %v3723_v59 = vld [vmem:[#allocation2 + $0x80] sm:$0xff]  ;;  %s3767_s17 = sld [smem:[#allocation11 + $0x18]] }
 0x304   : > { %v1942_v55 = vmul.f32 %v1941_v19, %v3717_v53  ;;  %v1943_v52 = vmul.f32 %v1941_v19, %v3723_v59  ;;  %v1865_v47 = vmul.f32 %v1863_v18, %v3711_v29 }
 0x305   : > { %1432 = vrot.lane.b32.xlu1 %v1427_v23, %s2690_s20  ;;  %1486 = vrot.lane.b32.xlu0 %v1482_v2, %s2691_s18  ;;  %v1105_v32 = vadd.f32 %v1103_v34, %v1079_v0  ;;  %v1971_v23 = vstv %s2365_s19  ;;  %v2013_v2 = vstv %s2369_s11  ;;  %s2045_s19 = scalar_lea.sflag [#allocation6], %s2876_s30  ;;  %s2578_s11 = scalar_lea.vmem %s3757_s12, 768 }
 0x306   : > { %v1157_v22 = vpop.permute.xlu1 %1156  ;;  %v1211_v6 = vpop.permute.xlu0 %1210  ;;  %v1972_v0 = vmul.f32 %v1971_v23, %v3598_v14  ;;  %v1973_v39 = vmul.f32 %v1971_v23, %v3608_v8  ;;  %v2015_v11 = vmul.f32 %v2013_v2, %v3735_v5  ;;  %v1719_v14 = vstv %s2344_s28  ;;  %p2579_p8 = scmp.ne.s32.totalorder %s3757_s12, %s2578_s11  ;;  %s2692_s28 = smov [#allocation12]  }
 0x307   : > { %v1161_v16 = vadd.f32 %v1157_v22, %v1105_v32  ;;  %v1216_v54 = vadd.f32 %v1211_v6, %v1160_v1  ;;  %v3729_v1 = vld [vmem:[#allocation2 + $0x7a] sm:$0xff]  ;;  %v1720_v22 = vmul.f32 %v1719_v14, %v3677_v36  ;;  %v1791_v6 = vstv %s2350_s13  ;;  %s2582_s13 = sshll.u32 %s2692_s28, 4  ;;  %s2583_s13 = int_to_ptr.vmem [resolvable:$false] %s2582_s13 }
 0x308   : > { %v2014_v34 = vmul.f32 %v2013_v2, %v3729_v1  ;;  %p2580_p7 = pnand %p2579_p8, %p3903_p13  ;;  %s2584_s15 = scalar_lea.vmem %s2583_s13, 1536 }
 0x309   : > { %1488 = vrot.lane.b32.xlu1 %v1483_v7, %s2691_s18  ;;  %1568 = vrot.lane.b32.xlu0 %v1564_v26, %s2690_s20  ;;  %v3671_v4 = vadd.f32 %v1240_v20, %v1216_v54  ;;  %v1721_v54 = vmul.f32 %v1719_v14, %v3686_v12  ;;  %v1792_v20 = vmul.f32 %v1791_v6, %v3693_v41  ;;  %p2585_p12 = scmp.lt.s32.totalorder %s3757_s12, %s2583_s13  ;;  %p2586_p0 = scmp.lt.s32.totalorder %s2584_s15, %s2578_s11 }
 0x30a   : > { %v1213_v62 = vpop.permute.xlu1 %1212  ;;  %p2581_p10 = pneg %p2580_p7 }
 0x30b   : > { %v1217_v24 = vadd.f32 %v1213_v62, %v1161_v16  ;;  %p2587_p3 = por %p2586_p0, %p2585_p12 }
 0x30d   : > { %1570 = vrot.lane.b32.xlu1 %v1565_v56, %s2690_s20  ;;  %1624 = vrot.lane.b32.xlu0 %v1620_v30, %s2691_s18  ;;  %v3682_v13 = vadd.f32 %v1241_v9, %v1217_v24  ;;  %v1793_v9 = vmul.f32 %v1791_v6, %v3699_v45  ;;  %p2588_p2 = pnand %p2587_p3, %p2581_p10 }
 0x311   : > { %1626 = vrot.lane.b32.xlu1 %v1621_v33, %s2691_s18  ;;  %1730 = vrot.lane.b32.xlu0 %v1726_v35, %s2691_s18 }
 0x315   : > { %1732 = vrot.lane.b32.xlu1 %v1727_v37, %s2691_s18  ;;  %1760 = vrot.lane.b32.xlu0 %v1756_v40, %s2690_s20 }
 0x319   : > { %1762 = vrot.lane.b32.xlu1 %v1757_v43, %s2690_s20  ;;  %1802 = vrot.lane.b32.xlu0 %v1798_v28, %s2691_s18 }
 0x31d   : > { %1804 = vrot.lane.b32.xlu1 %v1799_v58, %s2691_s18  ;;  %1832 = vrot.lane.b32.xlu0 %v1828_v46, %s2690_s20 }
 0x321   : > { %1834 = vrot.lane.b32.xlu1 %v1829_v3, %s2690_s20  ;;  %1874 = vrot.lane.b32.xlu0 %v1870_v49, %s2691_s18 }
 0x325   : > { %1876 = vrot.lane.b32.xlu1 %v1871_v10, %s2691_s18  ;;  %1904 = vrot.lane.b32.xlu0 %v1900_v17, %s2690_s20 }
 0x329   : > { %1906 = vrot.lane.b32.xlu1 %v1901_v27, %s2690_s20  ;;  %1946 = vrot.lane.b32.xlu0 %v1942_v55, %s2691_s18 }
 0x32d   : > { %1948 = vrot.lane.b32.xlu1 %v1943_v52, %s2691_s18  ;;  %1976 = vrot.lane.b32.xlu0 %v1972_v0, %s2690_s20 }
 0x331   : > { %1978 = vrot.lane.b32.xlu1 %v1973_v39, %s2690_s20  ;;  %2018 = vrot.lane.b32.xlu0 %v2014_v34, %s2691_s18  ;;  %v2007_v34 = vstv %s3747_s7 }
 0x332   : > { %v2008_v6 = vmul.f32 %v2007_v34, %v3729_v1 }
 0x335   : > { %2020 = vrot.lane.b32.xlu1 %v2015_v11, %s2691_s18  ;;  %s2362_s18 = sld [smem:[#allocation11 + $0x2e]] }
 0x33b   : > { %v1935_v3 = vstv %s2362_s18 }
 0x33c   : > { %v1936_v27 = vmul.f32 %v1935_v3, %v3717_v53  ;;  %v1937_v39 = vmul.f32 %v1935_v3, %v3723_v59 }
 0x34b   : > { %v1747_v32 = vpop.permute.xlu0 %1746 }
 0x34c   : > { %v1752_v8 = vadd.f32 %v1747_v32, %v1720_v22 }
 0x34f   : > { %v1749_v7 = vpop.permute.xlu1 %1748  ;;  %v1775_v16 = vpop.permute.xlu0 %1774 }
 0x350   : > { %v1780_v26 = vadd.f32 %v1775_v16, %v1752_v8  ;;  %v1753_v21 = vadd.f32 %v1749_v7, %v1721_v54 }
 0x352   : > { %v1794_v62 = vadd.f32 %v1792_v20, %v1780_v26  ;;  %v2009_v20 = vmul.f32 %v2007_v34, %v3735_v5 }
 0x353   : > { %v1777_v24 = vpop.permute.xlu1 %1776  ;;  %v1819_v56 = vpop.permute.xlu0 %1818 }
 0x354   : > { %v1781_v30 = vadd.f32 %v1777_v24, %v1753_v21  ;;  %v1824_v33 = vadd.f32 %v1819_v56, %v1794_v62  ;;  %v1377_v62 = vstv %s3751_s22 }
 0x356   : > { %v1795_v35 = vadd.f32 %v1793_v9, %v1781_v30 }
 0x357   : > { %v1821_v38 = vpop.permute.xlu1 %1820  ;;  %v1847_v37 = vpop.permute.xlu0 %1846 }
 0x358   : > { %v1852_v40 = vadd.f32 %v1847_v37, %v1824_v33  ;;  %v1825_v43 = vadd.f32 %v1821_v38, %v1795_v35 }
 0x35a   : > { %v1866_v28 = vadd.f32 %v1864_v42, %v1852_v40 }
 0x35b   : > { %v1849_v44 = vpop.permute.xlu1 %1848  ;;  %v1891_v58 = vpop.permute.xlu0 %1890 }
 0x35c   : > { %v1853_v46 = vadd.f32 %v1849_v44, %v1825_v43  ;;  %v1896_v49 = vadd.f32 %v1891_v58, %v1866_v28 }
 0x35e   : > { %v1867_v31 = vadd.f32 %v1865_v47, %v1853_v46 }
 0x35f   : > { %v1893_v10 = vpop.permute.xlu1 %1892  ;;  %v1919_v17 = vpop.permute.xlu0 %1918 }
 0x360   : > { %v1924_v19 = vadd.f32 %v1919_v17, %v1896_v49  ;;  %v1897_v55 = vadd.f32 %v1893_v10, %v1867_v31 }
 0x362   : > { %v1938_v23 = vadd.f32 %v1936_v27, %v1924_v19 }
 0x363   : > { %v1921_v52 = vpop.permute.xlu1 %1920  ;;  %v1963_v0 = vpop.permute.xlu0 %1962 }
 0x364   : > { %v1925_v2 = vadd.f32 %v1921_v52, %v1897_v55  ;;  %v1968_v11 = vadd.f32 %v1963_v0, %v1938_v23 }
 0x366   : > { %v1939_v14 = vadd.f32 %v1937_v39, %v1925_v2 }
 0x367   : > { %v1965_v32 = vpop.permute.xlu1 %1964  ;;  %v1991_v22 = vpop.permute.xlu0 %1990 }
 0x368   : > { %v1996_v8 = vadd.f32 %v1991_v22, %v1968_v11  ;;  %v1969_v7 = vadd.f32 %v1965_v32, %v1939_v14 }
 0x36a   : > { %v2010_v16 = vadd.f32 %v2008_v6, %v1996_v8 }
 0x36b   : > { %v1993_v54 = vpop.permute.xlu1 %1992  ;;  %v1293_v26 = vpop.permute.xlu0 %1292 }
 0x36c   : > { %v1997_v21 = vadd.f32 %v1993_v54, %v1969_v7  ;;  %2030 = vrot.lane.b32.xlu0 %v2010_v16, %s2690_s20 }
 0x36d   : > { %2591 = shalt.err (!%p2588_p2)
}
 0x36e   : > { %s2592_s18 = scalar_lea.hbm %s3762_s21, 768  ;;  %s2596_s14 = scalar_lea.hbm %s3884_s5, 1536 }
 0x36f   : > { %p2593_p1 = scmp.ne.s32.totalorder %s3762_s21, %s2592_s18  ;;  %p2597_p5 = scmp.lt.s32.totalorder %s3762_s21, %s3884_s5 }
 0x370   : > { %p2598_p4 = scmp.lt.s32.totalorder %s2596_s14, %s2592_s18 }
 0x371   : > { %p2594_p9 = pnand %p2593_p1, %p3903_p13 }
 0x372   : > { %p2599_p6 = por %p2598_p4, %p2597_p5 }
 0x373   : > { %p2595_p11 = pneg %p2594_p9 }
 0x375   : > { %p2600_p8 = pnand %p2599_p6, %p2595_p11 }
 0x377   : > { %2603 = shalt.err (!%p2600_p8)
}
 0x378   : > { %s2693_s11 = smov 128   ;;  %s2694_s28 = smov 8   ;;  %v2011_v24 = vadd.f32 %v2009_v20, %v1997_v21  ;;  %v1298_v56 = vadd.f32 %v1293_v26, %v3671_v4  ;;  %v1295_v30 = vpop.permute.xlu1 %1294  ;;  %v1349_v9 = vpop.permute.xlu0 %1348  ;;  %v1378_v33 = vmul.f32 %v3642_v50, %v1377_v62  ;;  %v1379_v43 = vmul.f32 %v3651_v63, %v1377_v62 }
 0x379   : > { %2395 = dma.vmem_to_hbm [thread:$0]  (%p3903_p13), %s3757_s12, 768, %s3762_s21, %s2045_s19, %s2693_s11, %s2693_s11, %s2694_s28   ;;  %v1299_v35 = vadd.f32 %v1295_v30, %v3682_v13 }
 0x37a   : > { %v1354_v18 = vadd.f32 %v1349_v9, %v1298_v56  ;;  %2032 = vrot.lane.b32.xlu1 %v2011_v24, %s2690_s20  ;;  %v1515_v28 = vstv %s3767_s17  ;;  %s2343_s12 = sld [smem:[#allocation11 + $0x1b]]  ;;  %s2226_s13 = sshll.u32 %s2876_s30, 4 }
 0x37b   : > { %v1516_v3 = vmul.f32 %v3663_v15, %v1515_v28  ;;  %v1517_v17 = vmul.f32 %v3673_v25, %v1515_v28  ;;  %s2349_s20 = sld [smem:[#allocation11 + $0x21]]  ;;  %s2376_s15 = sshll.u32 %s2755_s4, 8 }
 0x37c   : > { %v1380_v38 = vadd.f32 %v1378_v33, %v1354_v18  ;;  %v1351_v37 = vpop.permute.xlu1 %1350  ;;  %v1431_v40 = vpop.permute.xlu0 %1430  ;;  %s2355_s21 = sld [smem:[#allocation11 + $0x27]]  ;;  %s320_s18 = scalar_lea.vmem [#allocation13], %s2226_s13 }
 0x37d   : > { %v1355_v42 = vadd.f32 %v1351_v37, %v1299_v35  ;;  %s2361_s17 = sld [smem:[#allocation11 + $0x2d]]  ;;  %s2079_s7 = sshll.u32 %s320_s18, 4  ;;  %s3834_s7 = int_to_ptr.vmem [resolvable:$true] %s2079_s7 }
 0x37e   : > { %v1436_v44 = vadd.f32 %v1431_v40, %v1380_v38  ;;  %s2367_s19 = sld [smem:[#allocation11 + $0x33]]  ;;  %s3832_s9 = scalar_lea.hbm %s3885_s6, %s2376_s15 }
 0x37f   : > { %v1381_v58 = vadd.f32 %v1379_v43, %v1355_v42  ;;  %s2050_s4 = scalar_lea.sflag [#allocation14], %s2876_s30  ;;  %s2604_s16 = scalar_lea.vmem %s3834_s7, 256 }
 0x380   : > { %v1433_v46 = vpop.permute.xlu1 %1432  ;;  %v1487_v4 = vpop.permute.xlu0 %1486  ;;  %v1713_v55 = vstv %s2343_s12  ;;  %p2605_p7 = scmp.ne.s32.totalorder %s3834_s7, %s2604_s16  ;;  %s2695_s12 = smov [#allocation13]  }
 0x381   : > { %v1492_v47 = vadd.f32 %v1487_v4, %v1436_v44  ;;  %v1437_v49 = vadd.f32 %v1433_v46, %v1381_v58  ;;  %v1714_v15 = vmul.f32 %v1713_v55, %v3677_v36  ;;  %v1785_v0 = vstv %s2349_s20  ;;  %s2608_s20 = sshll.u32 %s2695_s12, 4  ;;  %s2609_s20 = int_to_ptr.vmem [resolvable:$false] %s2608_s20 }
 0x382   : > { %v1715_v11 = vmul.f32 %v1713_v55, %v3686_v12  ;;  %v1786_v14 = vmul.f32 %v1785_v0, %v3693_v41  ;;  %v1787_v16 = vmul.f32 %v1785_v0, %v3699_v45  ;;  %v1857_v54 = vstv %s2355_s21  ;;  %p2606_p10 = pnand %p2605_p7, %p3903_p13  ;;  %s2610_s21 = scalar_lea.vmem %s2609_s20, 512 }
 0x383   : > { %v1518_v31 = vadd.f32 %v1516_v3, %v1492_v47  ;;  %v1858_v24 = vmul.f32 %v1857_v54, %v3705_v48  ;;  %v1859_v18 = vmul.f32 %v1857_v54, %v3711_v29  ;;  %v1929_v33 = vstv %s2361_s17  ;;  %p2611_p0 = scmp.lt.s32.totalorder %s3834_s7, %s2609_s20  ;;  %p2612_p3 = scmp.lt.s32.totalorder %s2610_s21, %s2604_s16 }
 0x384   : > { %v1489_v50 = vpop.permute.xlu1 %1488  ;;  %v1569_v10 = vpop.permute.xlu0 %1568  ;;  %v1930_v42 = vmul.f32 %v1929_v33, %v3717_v53  ;;  %v1931_v46 = vmul.f32 %v1929_v33, %v3723_v59  ;;  %v2001_v4 = vstv %s2367_s19  ;;  %p2607_p12 = pneg %p2606_p10 }
 0x385   : > { %v1493_v13 = vadd.f32 %v1489_v50, %v1437_v49  ;;  %v2003_v59 = vmul.f32 %v2001_v4, %v3735_v5  ;;  %p2613_p2 = por %p2612_p3, %p2611_p0 }
 0x387   : > { %v3803_v19 = vadd.f32 %v1517_v17, %v1493_v13  ;;  %v2002_v13 = vmul.f32 %v2001_v4, %v3729_v1  ;;  %v1574_v17 = vadd.f32 %v1569_v10, %v1518_v31  ;;  %p2614_p1 = pnand %p2613_p2, %p2607_p12 }
 0x388   : > { %v3805_v63 = vpop.permute.xlu1 %1570  ;;  %v1625_v27 = vpop.permute.xlu0 %1624 }
 0x389   : > { %v1630_v0 = vadd.f32 %v1625_v27, %v1574_v17 }
 0x38c   : > { %v3807_v23 = vpop.permute.xlu1 %1626  ;;  %v1731_v52 = vpop.permute.xlu0 %1730 }
 0x38d   : > { %v1736_v2 = vadd.f32 %v1731_v52, %v1714_v15 }
 0x390   : > { %v1733_v39 = vpop.permute.xlu1 %1732  ;;  %v1761_v34 = vpop.permute.xlu0 %1760 }
 0x391   : > { %v1766_v25 = vadd.f32 %v1761_v34, %v1736_v2  ;;  %v1737_v32 = vadd.f32 %v1733_v39, %v1715_v11  ;;  %v1575_v34 = vadd.f32 %v3805_v63, %v3803_v19 }
 0x393   : > { %v1788_v22 = vadd.f32 %v1786_v14, %v1766_v25  ;;  %v1631_v1 = vadd.f32 %v3807_v23, %v1575_v34 }
 0x394   : > { %v1763_v6 = vpop.permute.xlu1 %1762  ;;  %v1803_v8 = vpop.permute.xlu0 %1802 }
 0x395   : > { %v1767_v7 = vadd.f32 %v1763_v6, %v1737_v32  ;;  %v1808_v36 = vadd.f32 %v1803_v8, %v1788_v22 }
 0x397   : > { %v1789_v26 = vadd.f32 %v1787_v16, %v1767_v7 }
 0x398   : > { %v1805_v20 = vpop.permute.xlu1 %1804  ;;  %v1833_v21 = vpop.permute.xlu0 %1832 }
 0x399   : > { %v1838_v62 = vadd.f32 %v1833_v21, %v1808_v36  ;;  %v1809_v12 = vadd.f32 %v1805_v20, %v1789_v26 }
 0x39b   : > { %v1860_v56 = vadd.f32 %v1858_v24, %v1838_v62 }
 0x39c   : > { %v1835_v30 = vpop.permute.xlu1 %1834  ;;  %v1875_v41 = vpop.permute.xlu0 %1874 }
 0x39d   : > { %v1839_v9 = vadd.f32 %v1835_v30, %v1809_v12  ;;  %v1880_v35 = vadd.f32 %v1875_v41, %v1860_v56 }
 0x39f   : > { %v1861_v45 = vadd.f32 %v1859_v18, %v1839_v9 }
 0x3a0   : > { %v1877_v38 = vpop.permute.xlu1 %1876  ;;  %v1905_v37 = vpop.permute.xlu0 %1904 }
 0x3a1   : > { %v1910_v40 = vadd.f32 %v1905_v37, %v1880_v35  ;;  %v1881_v43 = vadd.f32 %v1877_v38, %v1861_v45 }
 0x3a3   : > { %v1932_v28 = vadd.f32 %v1930_v42, %v1910_v40 }
 0x3a4   : > { %v1907_v44 = vpop.permute.xlu1 %1906  ;;  %v1947_v48 = vpop.permute.xlu0 %1946 }
 0x3a5   : > { %v1911_v58 = vadd.f32 %v1907_v44, %v1881_v43  ;;  %v1952_v47 = vadd.f32 %v1947_v48, %v1932_v28 }
 0x3a7   : > { %v1933_v3 = vadd.f32 %v1931_v46, %v1911_v58 }
 0x3a8   : > { %v1949_v29 = vpop.permute.xlu1 %1948  ;;  %v1977_v49 = vpop.permute.xlu0 %1976 }
 0x3a9   : > { %v1982_v50 = vadd.f32 %v1977_v49, %v1952_v47  ;;  %v1953_v55 = vadd.f32 %v1949_v29, %v1933_v3 }
 0x3ab   : > { %v2004_v52 = vadd.f32 %v2002_v13, %v1982_v50 }
 0x3ac   : > { %v1979_v53 = vpop.permute.xlu1 %1978  ;;  %v2019_v15 = vpop.permute.xlu0 %2018 }
 0x3ad   : > { %v1983_v2 = vadd.f32 %v1979_v53, %v1953_v55  ;;  %v2024_v39 = vadd.f32 %v2019_v15, %v2004_v52 }
 0x3af   : > { %v2005_v11 = vadd.f32 %v2003_v59, %v1983_v2  ;;  %v2026_v25 = vadd.f32 %v2024_v39, %v1630_v0 }
 0x3b0   : > { %v2021_v14 = vpop.permute.xlu1 %2020 }
 0x3b1   : > { %v2025_v31 = vadd.f32 %v2021_v14, %v2005_v11 }
 0x3b3   : > { %v2027_v10 = vadd.f32 %v2025_v31, %v1631_v1 }
 0x3de   : > { %v2031_v32 = vpop.permute.xlu0 %2030 }
 0x3df   : > { %v2036_v22 = vadd.f32 %v2031_v32, %v2026_v25 }
 0x3e1   : > { %v2038_v27 = vmul.f32 %v2036_v22, %v3433_v57 }
 0x3e3   : > { %v2040_v5 = vadd.f32 %v2038_v27, %v3431_v51 }
 0x3e5   : > { %2042 = vst.msk [vmem:[%s320_s18] sm:$0xff] %vm1632_vm3, %v2040_v5 }
 0x3ec   : > { %v2033_v6 = vpop.permute.xlu1 %2032 }
 0x3ed   : > { %v2037_v8 = vadd.f32 %v2033_v6, %v2027_v10 }
 0x3ef   : > { %v2039_v19 = vmul.f32 %v2037_v8, %v3441_v61 }
 0x3f1   : > { %v2041_v63 = vadd.f32 %v2039_v19, %v3439_v60 }
 0x3f3   : > { %2043 = vst.msk [vmem:[%s320_s18 + $0x8] sm:$0xff] %vm1632_vm3, %v2041_v63 }
 0x3f4   : > { %2617 = shalt.err (!%p2614_p1)
}
 0x3f5   : > { %s2618_s17 = scalar_lea.hbm %s3832_s9, 256  ;;  %s2622_s13 = scalar_lea.hbm %s3885_s6, 512 }
 0x3f6   : > { %p2619_p9 = scmp.ne.s32.totalorder %s3832_s9, %s2618_s17  ;;  %p2623_p4 = scmp.lt.s32.totalorder %s3832_s9, %s3885_s6 }
 0x3f7   : > { %p2624_p6 = scmp.lt.s32.totalorder %s2622_s13, %s2618_s17 }
 0x3f8   : > { %p2620_p11 = pnand %p2619_p9, %p3903_p13 }
 0x3f9   : > { %p2625_p8 = por %p2624_p6, %p2623_p4 }
 0x3fa   : > { %p2621_p5 = pneg %p2620_p11 }
 0x3fc   : > { %p2626_p7 = pnand %p2625_p8, %p2621_p5 }
 0x3fe   : > { %2629 = shalt.err (!%p2626_p7)
}
 0x3ff   : > { %2396 = dma.vmem_to_hbm [thread:$0]  (%p3903_p13), %s3834_s7, 256, %s3832_s9, %s2050_s4, %s2693_s11, %s2693_s11, %s2694_s28  }
 0x400 PF: > { %s2094_s22 = sand.u32 1, %s2668_s23   ;;  %p3904_p10 = scmp.ne.s32.totalorder %s3891_s29, 0 }
 0x401   : > { %p3905_p12 = scmp.ge.s32.totalorder %s2680_s26, 2  ;;  %s2095_s14 = scalar_lea.sflag [#allocation6], %s2094_s22 }
 0x403   : > { %p2414_p0 = pnand %p3905_p12, %p3904_p10 }
 0x405   : > { %p2415_p3 = pneg %p2414_p0 }
 0x407   : > { %2659 = dma.done.wait (%p2415_p3), %s2095_s14, 768  }
 0x408   : > { %2661 = vsyncadd (%p2415_p3), %s2095_s14, 4294966528  ;;  %s2104_s16 = scalar_lea.sflag [#allocation14], %s2094_s22 }
 0x409   : > { %2663 = dma.done.wait (%p2415_p3), %s2104_s16, 256  }
 0x40a   : > { %2665 = vsyncadd (%p2415_p3), %s2104_s16, 4294967040  ;;  %p26_p13 = scmp.ge.s32.totalorder %s2821_s27, 4   ;;  %s3906_s23 = smov %s2672_s24 }
 0x40b   : > { %s3907_s24 = smov %s2676_s25  ;;  %s3908_s25 = smov %s2831_s8 }
 0x40c   : > { %s3909_s26 = smov %s2821_s27  ;;  %28 = sbr.rel (!%p26_p13) target bundleno = 11 (0xb), region = 124 }
 0x411   :  { %2109 = vsyncpa [#allocation5], 1 }
 0x412   :  { %2111 = vsyncpa [#allocation5 + $0x1], 1 }
 0x413   :  { %2112 = vsyncpa [#allocation6], 1 }
 0x414   :  { %2114 = vsyncpa [#allocation6 + $0x1], 1 }
 0x415   :  { %2115 = vsyncpa [#allocation14], 1 }
 0x416   :  { %2117 = vsyncpa [#allocation14 + $0x1], 1 }
 0x417   :  { %2118 = vsyncpa [#allocation7], 1 }
 0x418   :  { %2120 = vsyncpa [#allocation7 + $0x1], 1 }
 0x419   :  { %2121 = vsyncpa [#allocation10], 1 }

</bundles_post_ra>
